<compile_context>
chip_gen: v6e
topology: v6e:2x2x1
jax: 0.10.0
libtpu: 0.0.40
codegen_flags: <defaults>
</compile_context>

<pallas_src>
import jax
import jax.numpy as jnp
from jax.experimental import pallas as pl
from jax.experimental.pallas import tpu as pltpu


def _round_up(x, m):
    return ((x + m - 1) // m) * m


# ---------------------------------------------------------------------------
# XLA-side weight preprocessing: Toeplitz expansion of the W direction.
# (Tiny tensors; rebuilt per call, negligible cost.)
# ---------------------------------------------------------------------------
def _conv1_toeplitz(w1, dw):
    """w1: (16,1,5,5) torch (co,ci,kh,kw) -> (5*32, 256) bf16.

    Row = kh*32 + wp  (wp = padded input column 0..31)
    Col = wo*16 + co  (wo = pooled output column 0..13; lanes 224..255 are zero)
    Entry = w1[co,0,kh, wp - 2*wo - dw] inside the 5-tap window, else 0.
    """
    w1k = jnp.transpose(w1[:, 0], (1, 2, 0))            # (kh, kw, co)
    wp = jnp.arange(32)[:, None]
    wo = jnp.arange(14)[None, :]
    kw = wp - 2 * wo - dw                                # (32, 14)
    valid = (kw >= 0) & (kw < 5)
    t = w1k[:, jnp.clip(kw, 0, 4), :]                    # (5, 32, 14, 16)
    t = jnp.where(valid[None, :, :, None], t, 0.0)
    t = t.reshape(5, 32, 14 * 16)
    t = jnp.pad(t, ((0, 0), (0, 0), (0, 256 - 224)))
    return t.reshape(5 * 32, 256).astype(jnp.bfloat16)


def _conv2_toeplitz(w2, dw):
    """w2: (32,16,5,5) torch (co,ci,kh,kw) -> (5*256, 256) bf16.

    Row = kh*256 + wo1*16 + ci (wo1 = conv1 pooled column 0..13; pad rows zero)
    Col = wo2*32 + co          (wo2 = conv2 pooled column 0..6; pad cols zero)
    Entry = w2[co,ci,kh, wo1 - 2*wo2 - dw + 2] inside the 5-tap window, else 0.
    """
    w2k = jnp.transpose(w2, (2, 3, 1, 0))                # (kh, kw, ci, co)
    wo1 = jnp.arange(14)[:, None]
    wo2 = jnp.arange(7)[None, :]
    kw = wo1 - 2 * wo2 - dw + 2                          # (14, 7)
    valid = (kw >= 0) & (kw < 5)
    t = w2k[:, jnp.clip(kw, 0, 4), :, :]                 # (5, 14, 7, 16, 32)
    t = jnp.where(valid[None, :, :, None, None], t, 0.0)
    t = jnp.transpose(t, (0, 1, 3, 2, 4))                # (kh, wo1, ci, wo2, co)
    t = t.reshape(5, 14 * 16, 7 * 32)
    t = jnp.pad(t, ((0, 0), (0, 256 - 224), (0, 256 - 224)))
    return t.reshape(5 * 256, 256).astype(jnp.bfloat16)


# ---------------------------------------------------------------------------
# Fused whole-network kernel (conv1+pool -> conv2+pool), one batch tile / step.
# ---------------------------------------------------------------------------
def _fused_cnn_kernel(xph_ref, w1_ref, b1_ref, w2_ref, b2_ref, o_ref):
    """
    xph_ref: (4, R, 32) bf16  -- phase-split padded input rows:
             plane p, row b*8+m  ==  padded_image[b, 4*m + p, :]   (R = bt*8)
    w1_ref : (2, 160, 256) bf16  conv1 Toeplitz weights (one per pool column dw)
    b1_ref : (1, 256) f32        conv1 bias tiled over pooled columns
    w2_ref : (2, 1280, 256) bf16 conv2 Toeplitz weights
    b2_ref : (1, 256) f32
    o_ref  : (R, 256) f32   row b*8 + h2 (h2 valid 0..6), lane = w2*32 + co
    """
    bf16 = jnp.bfloat16
    R = o_ref.shape[0]

    # ---- conv1 + bias + ReLU + 2x2 maxpool --------------------------------
    ph = [xph_ref[0], xph_ref[1], xph_ref[2], xph_ref[3]]
    zrow = jnp.zeros((1, 32), dtype=bf16)

    def down1(x):  # per-image row m -> m+1 (zero fill past the block end)
        return jnp.concatenate([x[1:], zrow], axis=0)

    # s[t][row b*8+m] == padded_image[b, 4*m + t]   for t = 0..7
    s = ph + [down1(ph[0]), down1(ph[1]), down1(ph[2]), down1(ph[3])]

    def conv1_rows(q):
        # pooled conv1 output rows ho1 = 2*m + q  (valid for m = 0..6)
        pooled = None
        for dh in (0, 1):
            t0 = 2 * q + dh
            patch = jnp.concatenate([s[t0 + k] for k in range(5)], axis=1)
            for dw in (0, 1):
                acc = jnp.dot(patch, w1_ref[dw],
                              preferred_element_type=jnp.float32)
                pooled = acc if pooled is None else jnp.maximum(pooled, acc)
        # bias + ReLU hoisted out of the 4 pooling taps (monotone => identical)
        return jnp.maximum(pooled + b1_ref[...], 0.0)

    a_even = conv1_rows(0)          # rows ho1 = 0,2,...,14  (14 is garbage)
    a_odd = conv1_rows(1)           # rows ho1 = 1,3,...,15  (15 is garbage)

    # per-image row m == 7 lies outside the 14-row activation; conv2's halo
    # must read it as zero padding.
    m_in_img = jax.lax.broadcasted_iota(jnp.int32, (R, 256), 0) & 7
    keep = m_in_img < 7
    a_even = jnp.where(keep, a_even, 0.0).astype(bf16)
    a_odd = jnp.where(keep, a_odd, 0.0).astype(bf16)

    # ---- conv2 + bias + ReLU + 2x2 maxpool --------------------------------
    zact = jnp.zeros((1, 256), dtype=bf16)

    def up1(x):     # per-image row m -> m-1 (zero fill before the block start)
        return jnp.concatenate([zact, x[:-1]], axis=0)

    def down1a(x):
        return jnp.concatenate([x[1:], zact], axis=0)

    em1, ep1 = up1(a_even), down1a(a_even)
    om1, op1 = up1(a_odd), down1a(a_odd)
    taps2 = ([em1, om1, a_even, a_odd, ep1],      # dh = 0: h1 = 2*ho2-2 .. 2*ho2+2
             [om1, a_even, a_odd, ep1, op1])      # dh = 1: h1 = 2*ho2-1 .. 2*ho2+3

    pooled2 = None
    for dh in (0, 1):
        patch2 = jnp.concatenate(taps2[dh], axis=1)           # (R, 1280)
        for dw in (0, 1):
            acc = jnp.dot(patch2, w2_ref[dw],
                          preferred_element_type=jnp.float32)
            pooled2 = acc if pooled2 is None else jnp.maximum(pooled2, acc)
    o_ref[...] = jnp.maximum(pooled2 + b2_ref[...], 0.0)


# ---------------------------------------------------------------------------
# Wrapper
# ---------------------------------------------------------------------------
def _pick_batch_tile(batch):
    b8 = _round_up(max(batch, 1), 8)
    cap = 128                       # ~<=17 MiB live VMEM per step (fits v7x too)
    if b8 <= cap:
        if b8 >= 32:                # give the v7x megacore >=2 parallel steps
            return _round_up((b8 + 1) // 2, 8)
        return b8
    return cap


def cnn_forward(x_nchw, params):
    """Forward pass of the PyTorch CNN. x_nchw: (B,1,28,28) f32 -> (B,10) f32."""
    B = x_nchw.shape[0]
    bt = _pick_batch_tile(B)
    Bpad = _round_up(B, bt)
    R = bt * 8

    # input prep: spatial zero-pad (p=2) and split rows into 4 phase planes
    x = x_nchw[:, 0]                                            # (B, 28, 28)
    xp = jnp.pad(x, ((0, Bpad - B), (2, 2), (2, 2)))            # (Bpad, 32, 32)
    xph = xp.reshape(Bpad, 8, 4, 32)                            # [b, m, p, w]
    xph = jnp.transpose(xph, (2, 0, 1, 3)).reshape(4, Bpad * 8, 32)
    xph = xph.astype(jnp.bfloat16)

    # Toeplitz weights / tiled biases (tiny)
    w1s = jnp.stack([_conv1_toeplitz(params["w1"], 0),
                     _conv1_toeplitz(params["w1"], 1)])         # (2, 160, 256)
    w2s = jnp.stack([_conv2_toeplitz(params["w2"], 0),
                     _conv2_toeplitz(params["w2"], 1)])         # (2, 1280, 256)
    b1t = jnp.pad(jnp.tile(params["b1"], 14), (0, 32)).reshape(1, 256).astype(jnp.float32)
    b2t = jnp.pad(jnp.tile(params["b2"], 7), (0, 32)).reshape(1, 256).astype(jnp.float32)

    a2 = pl.pallas_call(
        _fused_cnn_kernel,
        out_shape=jax.ShapeDtypeStruct((Bpad * 8, 256), jnp.float32),
        grid_spec=pltpu.PrefetchScalarGridSpec(
            num_scalar_prefetch=0,
            grid=(Bpad // bt,),
            in_specs=[
                pl.BlockSpec((4, R, 32), lambda i: (0, i, 0)),
                pl.BlockSpec((2, 160, 256), lambda i: (0, 0, 0)),
                pl.BlockSpec((1, 256), lambda i: (0, 0)),
                pl.BlockSpec((2, 1280, 256), lambda i: (0, 0, 0)),
                pl.BlockSpec((1, 256), lambda i: (0, 0)),
            ],
            out_specs=pl.BlockSpec((R, 256), lambda i: (i, 0)),
        ),
        compiler_params=pltpu.CompilerParams(
            dimension_semantics=("parallel",),
            vmem_limit_bytes=48 * 1024 * 1024,
        ),
    )(xph, w1s, b1t, w2s, b2t)

    # tiny Linear(32*7*7 -> 10) head: stays in XLA (per perf review, item 7)
    a2 = a2.reshape(Bpad, 8, 8, 32)[:B, :7, :7, :]              # (B, h2, w2, co)
    feat = jnp.transpose(a2, (0, 3, 1, 2)).reshape(B, 32 * 7 * 7)   # NCHW flatten
    return feat @ params["w_out"].T + params["b_out"]


# ---------------------------------------------------------------------------
# Pure-JAX reference (f32) and deterministic init (PyTorch param layouts)
# ---------------------------------------------------------------------------
def cnn_reference(x_nchw, params):
    def conv_block(x, w, b):
        y = jax.lax.conv_general_dilated(
            x, w, window_strides=(1, 1), padding=((2, 2), (2, 2)),
            dimension_numbers=("NCHW", "OIHW", "NCHW"))
        y = jax.nn.relu(y + b.reshape(1, -1, 1, 1))
        Bc, C, H, W = y.shape
        return y.reshape(Bc, C, H // 2, 2, W // 2, 2).max(axis=(3, 5))

    x = conv_block(x_nchw, params["w1"], params["b1"])
    x = conv_block(x, params["w2"], params["b2"])
    x = x.reshape(x.shape[0], -1)
    return x @ params["w_out"].T + params["b_out"]


def init_params(key):
    k = jax.random.split(key, 6)
    return dict(
        w1=0.10 * jax.random.normal(k[0], (16, 1, 5, 5), jnp.float32),
        b1=0.01 * jax.random.normal(k[1], (16,), jnp.float32),
        w2=0.05 * jax.random.normal(k[2], (32, 16, 5, 5), jnp.float32),
        b2=0.01 * jax.random.normal(k[3], (32,), jnp.float32),
        w_out=0.02 * jax.random.normal(k[4], (10, 32 * 7 * 7), jnp.float32),
        b_out=0.01 * jax.random.normal(k[5], (10,), jnp.float32),
    )


if __name__ == "__main__":
    key = jax.random.PRNGKey(0)
    pkey, xkey = jax.random.split(key)
    params = init_params(pkey)

    # Linear(32*7*7, 10) implies 28x28 spatial input (MNIST-like), NCHW.
    x = jax.random.normal(xkey, (2, 1, 28, 28), jnp.float32)

    fwd = jax.jit(lambda inp: cnn_forward(inp, params))
    out = fwd(x)
    jax.block_until_ready(out)
    assert out.shape == (2, 10) and out.dtype == jnp.float32

    ref = cnn_reference(x, params)
    max_err = float(jnp.max(jnp.abs(out - ref)))
    assert jnp.allclose(out, ref, atol=5e-2, rtol=5e-2), max_err
    print("KERNEL_OK")
</pallas_src>

<mosaic_0001>
module attributes {stable_mosaic.version = 11 : i64} {
  func.func @_fused_cnn_kernel(%arg0: i32, %arg1: memref<4x64x32xbf16, #tpu.memory_space<vmem>>, %arg2: memref<2x160x256xbf16, #tpu.memory_space<vmem>>, %arg3: memref<1x256xf32, #tpu.memory_space<vmem>>, %arg4: memref<2x1280x256xbf16, #tpu.memory_space<vmem>>, %arg5: memref<1x256xf32, #tpu.memory_space<vmem>>, %arg6: memref<64x256xf32, #tpu.memory_space<vmem>>) attributes {dimension_semantics = [#tpu.dimension_semantics<parallel>], iteration_bounds = array<i64: 1>, scalar_prefetch = 0 : i64, scratch_operands = 0 : i64, tpu.core_type = #tpu.core_type<tc>, window_params = [{transform_indices = @transform_0, window_bounds = array<i64: 4, 64, 32>}, {pipeline_mode = #tpu.pipeline_mode<synchronous>, transform_indices = @transform_1, window_bounds = array<i64: 2, 160, 256>}, {pipeline_mode = #tpu.pipeline_mode<synchronous>, transform_indices = @transform_2, window_bounds = array<i64: 1, 256>}, {pipeline_mode = #tpu.pipeline_mode<synchronous>, transform_indices = @transform_3, window_bounds = array<i64: 2, 1280, 256>}, {pipeline_mode = #tpu.pipeline_mode<synchronous>, transform_indices = @transform_4, window_bounds = array<i64: 1, 256>}, {transform_indices = @transform_5, window_bounds = array<i64: 64, 256>}]} {
    %c0 = arith.constant 0 : index
    %c0_0 = arith.constant 0 : index
    %c0_1 = arith.constant 0 : index
    %0 = vector.load %arg1[%c0, %c0_0, %c0_1] : memref<4x64x32xbf16, #tpu.memory_space<vmem>>, vector<1x64x32xbf16>
    %1 = vector.shape_cast %0 : vector<1x64x32xbf16> to vector<64x32xbf16>
    %c1 = arith.constant 1 : index
    %c0_2 = arith.constant 0 : index
    %c0_3 = arith.constant 0 : index
    %2 = vector.load %arg1[%c1, %c0_2, %c0_3] : memref<4x64x32xbf16, #tpu.memory_space<vmem>>, vector<1x64x32xbf16>
    %3 = vector.shape_cast %2 : vector<1x64x32xbf16> to vector<64x32xbf16>
    %c2 = arith.constant 2 : index
    %c0_4 = arith.constant 0 : index
    %c0_5 = arith.constant 0 : index
    %4 = vector.load %arg1[%c2, %c0_4, %c0_5] : memref<4x64x32xbf16, #tpu.memory_space<vmem>>, vector<1x64x32xbf16>
    %5 = vector.shape_cast %4 : vector<1x64x32xbf16> to vector<64x32xbf16>
    %c3 = arith.constant 3 : index
    %c0_6 = arith.constant 0 : index
    %c0_7 = arith.constant 0 : index
    %6 = vector.load %arg1[%c3, %c0_6, %c0_7] : memref<4x64x32xbf16, #tpu.memory_space<vmem>>, vector<1x64x32xbf16>
    %7 = vector.shape_cast %6 : vector<1x64x32xbf16> to vector<64x32xbf16>
    %cst = arith.constant 0.000000e+00 : bf16
    %8 = vector.broadcast %cst : bf16 to vector<1x32xbf16>
    %9 = vector.extract_strided_slice %1 {offsets = [1, 0], sizes = [63, 32], strides = [1, 1]} : vector<64x32xbf16> to vector<63x32xbf16>
    %10 = tpu.concatenate %9, %8 in 0 : vector<63x32xbf16>, vector<1x32xbf16> -> vector<64x32xbf16>
    %11 = vector.extract_strided_slice %3 {offsets = [1, 0], sizes = [63, 32], strides = [1, 1]} : vector<64x32xbf16> to vector<63x32xbf16>
    %12 = tpu.concatenate %11, %8 in 0 : vector<63x32xbf16>, vector<1x32xbf16> -> vector<64x32xbf16>
    %13 = vector.extract_strided_slice %5 {offsets = [1, 0], sizes = [63, 32], strides = [1, 1]} : vector<64x32xbf16> to vector<63x32xbf16>
    %14 = tpu.concatenate %13, %8 in 0 : vector<63x32xbf16>, vector<1x32xbf16> -> vector<64x32xbf16>
    %15 = vector.extract_strided_slice %7 {offsets = [1, 0], sizes = [63, 32], strides = [1, 1]} : vector<64x32xbf16> to vector<63x32xbf16>
    %16 = tpu.concatenate %15, %8 in 0 : vector<63x32xbf16>, vector<1x32xbf16> -> vector<64x32xbf16>
    %17 = tpu.concatenate %1, %3, %5, %7, %10 in 1 : vector<64x32xbf16>, vector<64x32xbf16>, vector<64x32xbf16>, vector<64x32xbf16>, vector<64x32xbf16> -> vector<64x160xbf16>
    %c0_8 = arith.constant 0 : index
    %c0_9 = arith.constant 0 : index
    %c0_10 = arith.constant 0 : index
    %18 = vector.load %arg2[%c0_8, %c0_9, %c0_10] : memref<2x160x256xbf16, #tpu.memory_space<vmem>>, vector<1x160x256xbf16>
    %19 = vector.shape_cast %18 : vector<1x160x256xbf16> to vector<160x256xbf16>
    %cst_11 = arith.constant dense<0.000000e+00> : vector<64x256xf32>
    %20 = tpu.matmul %17, %19, %cst_11 {dimension_numbers = #tpu.dot_dimension_numbers<[1], [0], [0], [1], [0, 0, 1, 1], [], []>} : vector<64x160xbf16>, vector<160x256xbf16>, vector<64x256xf32> -> vector<64x256xf32>
    %c1_12 = arith.constant 1 : index
    %c0_13 = arith.constant 0 : index
    %c0_14 = arith.constant 0 : index
    %21 = vector.load %arg2[%c1_12, %c0_13, %c0_14] : memref<2x160x256xbf16, #tpu.memory_space<vmem>>, vector<1x160x256xbf16>
    %22 = vector.shape_cast %21 : vector<1x160x256xbf16> to vector<160x256xbf16>
    %cst_15 = arith.constant dense<0.000000e+00> : vector<64x256xf32>
    %23 = tpu.matmul %17, %22, %cst_15 {dimension_numbers = #tpu.dot_dimension_numbers<[1], [0], [0], [1], [0, 0, 1, 1], [], []>} : vector<64x160xbf16>, vector<160x256xbf16>, vector<64x256xf32> -> vector<64x256xf32>
    %24 = arith.maximumf %20, %23 : vector<64x256xf32>
    %25 = tpu.concatenate %3, %5, %7, %10, %12 in 1 : vector<64x32xbf16>, vector<64x32xbf16>, vector<64x32xbf16>, vector<64x32xbf16>, vector<64x32xbf16> -> vector<64x160xbf16>
    %c0_16 = arith.constant 0 : index
    %c0_17 = arith.constant 0 : index
    %c0_18 = arith.constant 0 : index
    %26 = vector.load %arg2[%c0_16, %c0_17, %c0_18] : memref<2x160x256xbf16, #tpu.memory_space<vmem>>, vector<1x160x256xbf16>
    %27 = vector.shape_cast %26 : vector<1x160x256xbf16> to vector<160x256xbf16>
    %cst_19 = arith.constant dense<0.000000e+00> : vector<64x256xf32>
    %28 = tpu.matmul %25, %27, %cst_19 {dimension_numbers = #tpu.dot_dimension_numbers<[1], [0], [0], [1], [0, 0, 1, 1], [], []>} : vector<64x160xbf16>, vector<160x256xbf16>, vector<64x256xf32> -> vector<64x256xf32>
    %29 = arith.maximumf %24, %28 : vector<64x256xf32>
    %c1_20 = arith.constant 1 : index
    %c0_21 = arith.constant 0 : index
    %c0_22 = arith.constant 0 : index
    %30 = vector.load %arg2[%c1_20, %c0_21, %c0_22] : memref<2x160x256xbf16, #tpu.memory_space<vmem>>, vector<1x160x256xbf16>
    %31 = vector.shape_cast %30 : vector<1x160x256xbf16> to vector<160x256xbf16>
    %cst_23 = arith.constant dense<0.000000e+00> : vector<64x256xf32>
    %32 = tpu.matmul %25, %31, %cst_23 {dimension_numbers = #tpu.dot_dimension_numbers<[1], [0], [0], [1], [0, 0, 1, 1], [], []>} : vector<64x160xbf16>, vector<160x256xbf16>, vector<64x256xf32> -> vector<64x256xf32>
    %33 = arith.maximumf %29, %32 : vector<64x256xf32>
    %c0_24 = arith.constant 0 : index
    %c0_25 = arith.constant 0 : index
    %34 = vector.load %arg3[%c0_24, %c0_25] : memref<1x256xf32, #tpu.memory_space<vmem>>, vector<1x256xf32>
    %35 = vector.broadcast %34 : vector<1x256xf32> to vector<64x256xf32>
    %36 = arith.addf %33, %35 : vector<64x256xf32>
    %cst_26 = arith.constant 0.000000e+00 : f32
    %37 = vector.broadcast %cst_26 : f32 to vector<64x256xf32>
    %38 = arith.maximumf %36, %37 : vector<64x256xf32>
    %39 = tpu.concatenate %5, %7, %10, %12, %14 in 1 : vector<64x32xbf16>, vector<64x32xbf16>, vector<64x32xbf16>, vector<64x32xbf16>, vector<64x32xbf16> -> vector<64x160xbf16>
    %c0_27 = arith.constant 0 : index
    %c0_28 = arith.constant 0 : index
    %c0_29 = arith.constant 0 : index
    %40 = vector.load %arg2[%c0_27, %c0_28, %c0_29] : memref<2x160x256xbf16, #tpu.memory_space<vmem>>, vector<1x160x256xbf16>
    %41 = vector.shape_cast %40 : vector<1x160x256xbf16> to vector<160x256xbf16>
    %cst_30 = arith.constant dense<0.000000e+00> : vector<64x256xf32>
    %42 = tpu.matmul %39, %41, %cst_30 {dimension_numbers = #tpu.dot_dimension_numbers<[1], [0], [0], [1], [0, 0, 1, 1], [], []>} : vector<64x160xbf16>, vector<160x256xbf16>, vector<64x256xf32> -> vector<64x256xf32>
    %c1_31 = arith.constant 1 : index
    %c0_32 = arith.constant 0 : index
    %c0_33 = arith.constant 0 : index
    %43 = vector.load %arg2[%c1_31, %c0_32, %c0_33] : memref<2x160x256xbf16, #tpu.memory_space<vmem>>, vector<1x160x256xbf16>
    %44 = vector.shape_cast %43 : vector<1x160x256xbf16> to vector<160x256xbf16>
    %cst_34 = arith.constant dense<0.000000e+00> : vector<64x256xf32>
    %45 = tpu.matmul %39, %44, %cst_34 {dimension_numbers = #tpu.dot_dimension_numbers<[1], [0], [0], [1], [0, 0, 1, 1], [], []>} : vector<64x160xbf16>, vector<160x256xbf16>, vector<64x256xf32> -> vector<64x256xf32>
    %46 = arith.maximumf %42, %45 : vector<64x256xf32>
    %47 = tpu.concatenate %7, %10, %12, %14, %16 in 1 : vector<64x32xbf16>, vector<64x32xbf16>, vector<64x32xbf16>, vector<64x32xbf16>, vector<64x32xbf16> -> vector<64x160xbf16>
    %c0_35 = arith.constant 0 : index
    %c0_36 = arith.constant 0 : index
    %c0_37 = arith.constant 0 : index
    %48 = vector.load %arg2[%c0_35, %c0_36, %c0_37] : memref<2x160x256xbf16, #tpu.memory_space<vmem>>, vector<1x160x256xbf16>
    %49 = vector.shape_cast %48 : vector<1x160x256xbf16> to vector<160x256xbf16>
    %cst_38 = arith.constant dense<0.000000e+00> : vector<64x256xf32>
    %50 = tpu.matmul %47, %49, %cst_38 {dimension_numbers = #tpu.dot_dimension_numbers<[1], [0], [0], [1], [0, 0, 1, 1], [], []>} : vector<64x160xbf16>, vector<160x256xbf16>, vector<64x256xf32> -> vector<64x256xf32>
    %51 = arith.maximumf %46, %50 : vector<64x256xf32>
    %c1_39 = arith.constant 1 : index
    %c0_40 = arith.constant 0 : index
    %c0_41 = arith.constant 0 : index
    %52 = vector.load %arg2[%c1_39, %c0_40, %c0_41] : memref<2x160x256xbf16, #tpu.memory_space<vmem>>, vector<1x160x256xbf16>
    %53 = vector.shape_cast %52 : vector<1x160x256xbf16> to vector<160x256xbf16>
    %cst_42 = arith.constant dense<0.000000e+00> : vector<64x256xf32>
    %54 = tpu.matmul %47, %53, %cst_42 {dimension_numbers = #tpu.dot_dimension_numbers<[1], [0], [0], [1], [0, 0, 1, 1], [], []>} : vector<64x160xbf16>, vector<160x256xbf16>, vector<64x256xf32> -> vector<64x256xf32>
    %55 = arith.maximumf %51, %54 : vector<64x256xf32>
    %c0_43 = arith.constant 0 : index
    %c0_44 = arith.constant 0 : index
    %56 = vector.load %arg3[%c0_43, %c0_44] : memref<1x256xf32, #tpu.memory_space<vmem>>, vector<1x256xf32>
    %57 = vector.broadcast %56 : vector<1x256xf32> to vector<64x256xf32>
    %58 = arith.addf %55, %57 : vector<64x256xf32>
    %cst_45 = arith.constant 0.000000e+00 : f32
    %59 = vector.broadcast %cst_45 : f32 to vector<64x256xf32>
    %60 = arith.maximumf %58, %59 : vector<64x256xf32>
    %61 = tpu.iota {dimensions = array<i32: 0>} : vector<64x256xi32>
    %c7_i32 = arith.constant 7 : i32
    %62 = vector.broadcast %c7_i32 : i32 to vector<64x256xi32>
    %63 = arith.andi %61, %62 : vector<64x256xi32>
    %c7_i32_46 = arith.constant 7 : i32
    %64 = vector.broadcast %c7_i32_46 : i32 to vector<64x256xi32>
    %65 = arith.cmpi slt, %63, %64 : vector<64x256xi32>
    %cst_47 = arith.constant 0.000000e+00 : f32
    %66 = vector.broadcast %cst_47 : f32 to vector<64x256xf32>
    %67 = arith.select %65, %38, %66 : vector<64x256xi1>, vector<64x256xf32>
    %68 = arith.truncf %67 : vector<64x256xf32> to vector<64x256xbf16>
    %cst_48 = arith.constant 0.000000e+00 : f32
    %69 = vector.broadcast %cst_48 : f32 to vector<64x256xf32>
    %70 = arith.select %65, %60, %69 : vector<64x256xi1>, vector<64x256xf32>
    %71 = arith.truncf %70 : vector<64x256xf32> to vector<64x256xbf16>
    %cst_49 = arith.constant 0.000000e+00 : bf16
    %72 = vector.broadcast %cst_49 : bf16 to vector<1x256xbf16>
    %73 = vector.extract_strided_slice %68 {offsets = [0, 0], sizes = [63, 256], strides = [1, 1]} : vector<64x256xbf16> to vector<63x256xbf16>
    %74 = tpu.concatenate %72, %73 in 0 : vector<1x256xbf16>, vector<63x256xbf16> -> vector<64x256xbf16>
    %75 = vector.extract_strided_slice %68 {offsets = [1, 0], sizes = [63, 256], strides = [1, 1]} : vector<64x256xbf16> to vector<63x256xbf16>
    %76 = tpu.concatenate %75, %72 in 0 : vector<63x256xbf16>, vector<1x256xbf16> -> vector<64x256xbf16>
    %77 = vector.extract_strided_slice %71 {offsets = [0, 0], sizes = [63, 256], strides = [1, 1]} : vector<64x256xbf16> to vector<63x256xbf16>
    %78 = tpu.concatenate %72, %77 in 0 : vector<1x256xbf16>, vector<63x256xbf16> -> vector<64x256xbf16>
    %79 = vector.extract_strided_slice %71 {offsets = [1, 0], sizes = [63, 256], strides = [1, 1]} : vector<64x256xbf16> to vector<63x256xbf16>
    %80 = tpu.concatenate %79, %72 in 0 : vector<63x256xbf16>, vector<1x256xbf16> -> vector<64x256xbf16>
    %81 = tpu.concatenate %74, %78, %68, %71, %76 in 1 : vector<64x256xbf16>, vector<64x256xbf16>, vector<64x256xbf16>, vector<64x256xbf16>, vector<64x256xbf16> -> vector<64x1280xbf16>
    %c0_50 = arith.constant 0 : index
    %c0_51 = arith.constant 0 : index
    %c0_52 = arith.constant 0 : index
    %82 = vector.load %arg4[%c0_50, %c0_51, %c0_52] : memref<2x1280x256xbf16, #tpu.memory_space<vmem>>, vector<1x1280x256xbf16>
    %83 = vector.shape_cast %82 : vector<1x1280x256xbf16> to vector<1280x256xbf16>
    %cst_53 = arith.constant dense<0.000000e+00> : vector<64x256xf32>
    %84 = tpu.matmul %81, %83, %cst_53 {dimension_numbers = #tpu.dot_dimension_numbers<[1], [0], [0], [1], [0, 0, 1, 1], [], []>} : vector<64x1280xbf16>, vector<1280x256xbf16>, vector<64x256xf32> -> vector<64x256xf32>
    %c1_54 = arith.constant 1 : index
    %c0_55 = arith.constant 0 : index
    %c0_56 = arith.constant 0 : index
    %85 = vector.load %arg4[%c1_54, %c0_55, %c0_56] : memref<2x1280x256xbf16, #tpu.memory_space<vmem>>, vector<1x1280x256xbf16>
    %86 = vector.shape_cast %85 : vector<1x1280x256xbf16> to vector<1280x256xbf16>
    %cst_57 = arith.constant dense<0.000000e+00> : vector<64x256xf32>
    %87 = tpu.matmul %81, %86, %cst_57 {dimension_numbers = #tpu.dot_dimension_numbers<[1], [0], [0], [1], [0, 0, 1, 1], [], []>} : vector<64x1280xbf16>, vector<1280x256xbf16>, vector<64x256xf32> -> vector<64x256xf32>
    %88 = arith.maximumf %84, %87 : vector<64x256xf32>
    %89 = tpu.concatenate %78, %68, %71, %76, %80 in 1 : vector<64x256xbf16>, vector<64x256xbf16>, vector<64x256xbf16>, vector<64x256xbf16>, vector<64x256xbf16> -> vector<64x1280xbf16>
    %c0_58 = arith.constant 0 : index
    %c0_59 = arith.constant 0 : index
    %c0_60 = arith.constant 0 : index
    %90 = vector.load %arg4[%c0_58, %c0_59, %c0_60] : memref<2x1280x256xbf16, #tpu.memory_space<vmem>>, vector<1x1280x256xbf16>
    %91 = vector.shape_cast %90 : vector<1x1280x256xbf16> to vector<1280x256xbf16>
    %cst_61 = arith.constant dense<0.000000e+00> : vector<64x256xf32>
    %92 = tpu.matmul %89, %91, %cst_61 {dimension_numbers = #tpu.dot_dimension_numbers<[1], [0], [0], [1], [0, 0, 1, 1], [], []>} : vector<64x1280xbf16>, vector<1280x256xbf16>, vector<64x256xf32> -> vector<64x256xf32>
    %93 = arith.maximumf %88, %92 : vector<64x256xf32>
    %c1_62 = arith.constant 1 : index
    %c0_63 = arith.constant 0 : index
    %c0_64 = arith.constant 0 : index
    %94 = vector.load %arg4[%c1_62, %c0_63, %c0_64] : memref<2x1280x256xbf16, #tpu.memory_space<vmem>>, vector<1x1280x256xbf16>
    %95 = vector.shape_cast %94 : vector<1x1280x256xbf16> to vector<1280x256xbf16>
    %cst_65 = arith.constant dense<0.000000e+00> : vector<64x256xf32>
    %96 = tpu.matmul %89, %95, %cst_65 {dimension_numbers = #tpu.dot_dimension_numbers<[1], [0], [0], [1], [0, 0, 1, 1], [], []>} : vector<64x1280xbf16>, vector<1280x256xbf16>, vector<64x256xf32> -> vector<64x256xf32>
    %97 = arith.maximumf %93, %96 : vector<64x256xf32>
    %c0_66 = arith.constant 0 : index
    %c0_67 = arith.constant 0 : index
    %98 = vector.load %arg5[%c0_66, %c0_67] : memref<1x256xf32, #tpu.memory_space<vmem>>, vector<1x256xf32>
    %99 = vector.broadcast %98 : vector<1x256xf32> to vector<64x256xf32>
    %100 = arith.addf %97, %99 : vector<64x256xf32>
    %cst_68 = arith.constant 0.000000e+00 : f32
    %101 = vector.broadcast %cst_68 : f32 to vector<64x256xf32>
    %102 = arith.maximumf %100, %101 : vector<64x256xf32>
    %c0_69 = arith.constant 0 : index
    %c0_70 = arith.constant 0 : index
    %103 = vector.load %arg6[%c0_69, %c0_70] : memref<64x256xf32, #tpu.memory_space<vmem>>, vector<64x256xf32>
    tpu.vector_store %arg6[%c0_69, %c0_70], %102 {strides = array<i32>} : memref<64x256xf32, #tpu.memory_space<vmem>>, vector<64x256xf32>,
    return
  }
  func.func @transform_0(%arg0: i32) -> (i32, i32, i32) {
    %c0_i32 = arith.constant 0 : i32
    %c0_i32_0 = arith.constant 0 : i32
    %c0_i32_1 = arith.constant 0 : i32
    return %c0_i32, %arg0, %c0_i32_0 : i32, i32, i32
  }
  func.func @transform_1(%arg0: i32) -> (i32, i32, i32) {
    %c0_i32 = arith.constant 0 : i32
    %c0_i32_0 = arith.constant 0 : i32
    %c0_i32_1 = arith.constant 0 : i32
    %c0_i32_2 = arith.constant 0 : i32
    return %c0_i32, %c0_i32_0, %c0_i32_1 : i32, i32, i32
  }
  func.func @transform_2(%arg0: i32) -> (i32, i32) {
    %c0_i32 = arith.constant 0 : i32
    %c0_i32_0 = arith.constant 0 : i32
    %c0_i32_1 = arith.constant 0 : i32
    return %c0_i32, %c0_i32_0 : i32, i32
  }
  func.func @transform_3(%arg0: i32) -> (i32, i32, i32) {
    %c0_i32 = arith.constant 0 : i32
    %c0_i32_0 = arith.constant 0 : i32
    %c0_i32_1 = arith.constant 0 : i32
    %c0_i32_2 = arith.constant 0 : i32
    return %c0_i32, %c0_i32_0, %c0_i32_1 : i32, i32, i32
  }
  func.func @transform_4(%arg0: i32) -> (i32, i32) {
    %c0_i32 = arith.constant 0 : i32
    %c0_i32_0 = arith.constant 0 : i32
    %c0_i32_1 = arith.constant 0 : i32
    return %c0_i32, %c0_i32_0 : i32, i32
  }
  func.func @transform_5(%arg0: i32) -> (i32, i32) {
    %c0_i32 = arith.constant 0 : i32
    %c0_i32_0 = arith.constant 0 : i32
    return %arg0, %c0_i32 : i32, i32
  }
}

</mosaic_0001>

<bundles_post_ra>
// kernel: tile.10
= control target key start
LH: loop header
LB: loop body
LE: loop exit
PB: predicated region body
PF: predicated region fallthrough
CT: control target
= control target key end

     0   :  { %s28_s0 = inlined_call_operand.vmem [shape: f32[16], index: 0, kind: input, shape index: {}]   ;;  %s29_s1 = inlined_call_operand.vmem [shape: f32[14,16], index: 1, kind: output, shape index: {}]  }
   0x1   :  { %v4_v0 = vld [vmem:[%s28_s0] ss:$0 sm:$0xff] }
   0x2   :  { %5 = vst [vmem:[%s29_s1] sm:$0xff] %v4_v0  ;;  %8 = vst [vmem:[%s29_s1 + $0x8] sm:$0xff] %v4_v0 }

// kernel: tile.11
= control target key start
LH: loop header
LB: loop body
LE: loop exit
PB: predicated region body
PF: predicated region fallthrough
CT: control target
= control target key end

     0   :  { %s19_s8 = smov 3  ;;  %s75_s9 = smov 112   ;;  %vm4_vm0 = vcmask 130048   ;;  %vm10_vm1 = vcmask 1048448   ;;  %vm16_vm2 = vcmask 917248   ;;  %vm23_vm3 = vcmask 786048   ;;  %s119_s0 = inlined_call_operand.vmem [shape: f32[14,16], index: 0, kind: input, shape index: {}]   ;;  %s120_s1 = inlined_call_operand.vmem [shape: f32[224], index: 1, kind: output, shape index: {}]  }
   0x1   :  { %v61_v0 = vld [vmem:[%s119_s0 + $0x7] sm:$0x1]   ;;  %v63_v1 = vld [vmem:[%s119_s0 + $0x5] ss:$8 sm:%s19_s8]   ;;  %s76_s12 = smov 80   ;;  %s26_s15 = smov 3 }
   0x2   :  { %8 = vrot.lane.b32.xlu0 %v61_v0, %s75_s9  ;;  %21 = vrot.lane.b32.xlu1 %v63_v1, %s76_s12  ;;  %v62_v2 = vld [vmem:[%s119_s0 + $0x6] sm:$0x1]   ;;  %s33_s18 = smov 3  ;;  %s40_s19 = smov 3  ;;  %vm30_vm4 = vcmask 654848   ;;  %vm37_vm5 = vcmask 523648  }
   0x3   :  { %v64_v3 = vld [vmem:[%s119_s0 + $0x4] ss:$8 sm:%s26_s15]   ;;  %s77_s20 = smov 96   ;;  %s78_s21 = smov 64   ;;  %v65_v4 = vld [vmem:[%s119_s0 + $0x3] ss:$8 sm:%s33_s18]  }
   0x4   :  { %s2_s24 = smov 3  ;;  %v66_v5 = vld [vmem:[%s119_s0 + $0x2] ss:$8 sm:%s40_s19]   ;;  %s47_s27 = smov 3  ;;  %vm44_vm6 = vcmask 392448   ;;  %vm51_vm7 = vcmask 261248  }
   0x5   :  { %v3_v6 = vld [vmem:[%s119_s0] ss:$8 sm:%s2_s24]   ;;  %s79_s30 = smov 48   ;;  %s80_s2 = smov 32   ;;  %v67_v7 = vld [vmem:[%s119_s0 + $0x1] ss:$8 sm:%s47_s27]  }
   0x6   :  { %14 = vrot.lane.b32.xlu0 %v62_v2, %s77_s20  ;;  %28 = vrot.lane.b32.xlu1 %v64_v3, %s78_s21  ;;  %5 = vst.msk [vmem:[#allocation0] sm:$0x3] %vm4_vm0, %v3_v6   ;;  %s81_s0 = smov 16  }
   0xa   :  { %35 = vrot.lane.b32.xlu0 %v65_v4, %s79_s30  ;;  %42 = vrot.lane.b32.xlu1 %v66_v5, %s80_s2 }
   0xe   :  { %49 = vrot.lane.b32.xlu0 %v67_v7, %s81_s0 }
  0x74   :  { %v9_v8 = vpop.permute.xlu0 %8   ;;  %v22_v9 = vpop.permute.xlu1 %21  }
  0x75   :  { %11 = vst.msk [vmem:[#allocation0] sm:$0x1] %vm10_vm1, %v9_v8  }
  0x78   :  { %v15_v10 = vpop.permute.xlu0 %14   ;;  %v29_v11 = vpop.permute.xlu1 %28  }
  0x79   :  { %17 = vst.msk [vmem:[#allocation0] sm:$0x1] %vm16_vm2, %v15_v10  }
  0x7a   :  { %24 = vst.msk [vmem:[#allocation0] sm:$0x3] %vm23_vm3, %v22_v9  }
  0x7b   :  { %31 = vst.msk [vmem:[#allocation0] sm:$0x3] %vm30_vm4, %v29_v11  }
  0x7c   :  { %v36_v12 = vpop.permute.xlu0 %35   ;;  %v43_v13 = vpop.permute.xlu1 %42  }
  0x7d   :  { %38 = vst.msk [vmem:[#allocation0] sm:$0x3] %vm37_vm5, %v36_v12  }
  0x7e   :  { %45 = vst.msk [vmem:[#allocation0] sm:$0x3] %vm44_vm6, %v43_v13  }
  0x80   :  { %v50_v14 = vpop.permute.xlu0 %49  }
  0x81   :  { %52 = vst.msk [vmem:[#allocation0] sm:$0x3] %vm51_vm7, %v50_v14  }
  0x88   :  { %v57_v15 = vld [vmem:[#allocation0] sm:$0x3] }
  0x89   :  { %60 = vst [vmem:[%s120_s1] sm:$0x3] %v57_v15 }

// kernel: tile.14
= control target key start
LH: loop header
LB: loop body
LE: loop exit
PB: predicated region body
PF: predicated region fallthrough
CT: control target
= control target key end

     0   :  { %s22_s0 = inlined_call_operand.vmem [shape: f32[32], index: 0, kind: input, shape index: {}]   ;;  %s23_s1 = inlined_call_operand.vmem [shape: f32[7,32], index: 1, kind: output, shape index: {}]  }
   0x1   :  { %v4_v0 = vld [vmem:[%s22_s0] ss:$0 sm:$0xff] }
   0x2   :  { %5 = vst [vmem:[%s23_s1] sm:$0xff] %v4_v0 }

// kernel: tile.15
= control target key start
LH: loop header
LB: loop body
LE: loop exit
PB: predicated region body
PF: predicated region fallthrough
CT: control target
= control target key end

     0   :  { %s13_s8 = smov 3  ;;  %s40_s9 = smov 96   ;;  %vm4_vm0 = vcmask 261120   ;;  %vm10_vm1 = vcmask 1048320   ;;  %vm17_vm2 = vcmask 785920   ;;  %vm24_vm3 = vcmask 523520   ;;  %s68_s0 = inlined_call_operand.vmem [shape: f32[7,32], index: 0, kind: input, shape index: {}]   ;;  %s69_s1 = inlined_call_operand.vmem [shape: f32[224], index: 1, kind: output, shape index: {}]  }
   0x1   :  { %v34_v0 = vld [vmem:[%s68_s0 + $0x3] sm:$0x1]   ;;  %s20_s10 = smov 3  ;;  %v35_v1 = vld [vmem:[%s68_s0 + $0x2] ss:$4 sm:%s13_s8]   ;;  %s2_s15 = smov 3 }
   0x2   :  { %8 = vrot.lane.b32.xlu0 %v34_v0, %s40_s9  ;;  %v36_v2 = vld [vmem:[%s68_s0 + $0x1] ss:$4 sm:%s20_s10]   ;;  %s41_s16 = smov 32  }
   0x3   :  { %22 = vrot.lane.b32.xlu1 %v36_v2, %s41_s16  ;;  %v3_v3 = vld [vmem:[%s68_s0] ss:$4 sm:%s2_s15]   ;;  %s42_s0 = smov 64  }
   0x4   :  { %5 = vst.msk [vmem:[#allocation0] sm:$0x3] %vm4_vm0, %v3_v3  }
   0x6   :  { %15 = vrot.lane.b32.xlu0 %v35_v1, %s42_s0 }
  0x74   :  { %v9_v4 = vpop.permute.xlu0 %8  }
  0x75   :  { %11 = vst.msk [vmem:[#allocation0] sm:$0x1] %vm10_vm1, %v9_v4   ;;  %v23_v5 = vpop.permute.xlu1 %22  }
  0x78   :  { %v16_v6 = vpop.permute.xlu0 %15  }
  0x79   :  { %18 = vst.msk [vmem:[#allocation0] sm:$0x3] %vm17_vm2, %v16_v6  }
  0x7a   :  { %25 = vst.msk [vmem:[#allocation0] sm:$0x3] %vm24_vm3, %v23_v5  }
  0x81   :  { %v30_v7 = vld [vmem:[#allocation0] sm:$0x3] }
  0x82   :  { %33 = vst [vmem:[%s69_s1] sm:$0x3] %v30_v7 }

// kernel: _lambda_.1
= control target key start
LH: loop header
LB: loop body
LE: loop exit
PB: predicated region body
PF: predicated region fallthrough
CT: control target
= control target key end

     0   :  { %s6995_s22 = smov 32   ;;  %s6996_s25 = smov 96   ;;  %vm76_vm0 = vsmask.f32 7424  ;;  %vm295_vm1 = vcmask 261120   ;;  %vm109_vm2 = vcmask 1047552   ;;  %s11436_s0 = inlined_call_operand.vmem [shape: bf16[4,64,32], index: 0, kind: input, shape index: {}]   ;;  %s11437_s1 = inlined_call_operand.vmem [shape: bf16[2,160,256], index: 1, kind: input, shape index: {}]   ;;  %s11438_s3 = inlined_call_operand.vmem [shape: bf16[2,1280,256], index: 3, kind: input, shape index: {}]   ;;  %s11439_s2 = inlined_call_operand.vmem [shape: f32[1,256], index: 2, kind: input, shape index: {}]   ;;  %s11440_s4 = inlined_call_operand.vmem [shape: f32[1,256], index: 4, kind: input, shape index: {}]   ;;  %s11441_s5 = inlined_call_operand.vmem [shape: f32[64,256], index: 5, kind: output, shape index: {}]  }
   0x1   :  { %v7031_v0 = vld [vmem:[%s11436_s0 + $0x20] sm:$0xff]   ;;  %v7050_v3 = vld [vmem:[%s11436_s0 + $0x28] sm:$0xff]   ;;  %s6997_s28 = smov 64   ;;  %v7071_v6 = vld [vmem:[%s11436_s0 + $0x30] sm:$0xff]   ;;  %v11516_v61 = vmov 0  ;;  %vm304_vm4 = vcmask 523264  }
   0x2   :  { %11511 = vst [vmem:[#allocation2_spill] sm:$0xff] %v7031_v0  ;;  %v7036_v1 = vld [vmem:[%s11436_s0 + $0x40] sm:$0xff]   ;;  %271 = vrot.lane.b32.xlu0 %v7031_v0, %s6995_s22  ;;  %11513 = vst [vmem:[#allocation4_spill] sm:$0xff] %v7050_v3  ;;  %v7057_v4 = vld [vmem:[%s11436_s0 + $0x48] sm:$0xff]   ;;  %v135_v59 = vshll.u32 %v7031_v0, 16  ;;  %vm313_vm5 = vcmask 785408  }
   0x3   :  { %11512 = vst [vmem:[#allocation3_spill] sm:$0xff] %v7036_v1  ;;  %v7043_v2 = vld [vmem:[%s11436_s0 + $0x60] sm:$0xff]   ;;  %v7064_v5 = vld [vmem:[%s11436_s0 + $0x68] sm:$0xff]   ;;  %11514 = vst [vmem:[#allocation5_spill] sm:$0xff] %v7071_v6  ;;  %vm1603_vm10 = vsmask.f32 256 }
   0x4   :  { %287 = vrot.lane.b32.xlu1 %v7043_v2, %s6996_s25  ;;  %v7076_v7 = vld [vmem:[%s11436_s0 + $0x50] sm:$0xff]   ;;  %v7083_v8 = vld [vmem:[%s11436_s0] sm:$0xff]   ;;  %v7088_v9 = vld [vmem:[%s11436_s0 + $0x8] sm:$0xff]   ;;  %vm1674_vm11 = vcmask 1040384  }
   0x5   :  { %v7095_v10 = vld [vmem:[%s11436_s0 + $0x70] sm:$0xff]   ;;  %v7100_v11 = vld [vmem:[%s11436_s0 + $0x38] sm:$0xff]   ;;  %v78_v12 = vshrl.u32 %v7083_v8, 16  ;;  %v80_v13 = vshll.u32 %v7083_v8, 16  ;;  %v85_v14 = vshll.u32 %v7088_v9, 16  ;;  %v89_v31 = vshrl.u32 %v7088_v9, 16  ;;  %vm7323_vm3 = vmand %vm109_vm2, %vm76_vm0 }
   0x6   :  { %279 = vrot.lane.b32.xlu0 %v7036_v1, %s6997_s28  ;;  %11515 = vst [vmem:[#allocation6_spill] sm:$0xff] %v7100_v11  ;;  %v7110_v15 = vld [vmem:[%s11436_s0 + $0x58] sm:$0xff]   ;;  %v7132_v22 = vld [vmem:[%s11436_s0 + $0x10] sm:$0xff]   ;;  %v7151_v25 = vld [vmem:[%s11437_s1 + $0x64] ss:$8 sps:$4 sm:$0xff]   ;;  %v11517_v61 = vsel %vm7323_vm3, 4294967295, %v11516_v61 }
   0x7   :  { %v82_v16 = vrot.slane %v80_v13, 1  ;;  %v7115_v17 = vld [vmem:[%s11437_s1 + $0x74] ss:$8 sps:$4 sm:$0xff]   ;;  %v87_v19 = vrot.slane %v85_v14, 1  ;;  %v7138_v23 = vld [vmem:[%s11437_s1 + $0x70] ss:$8 sps:$4 sm:$0xff]   ;;  %vm8187_vm15 = vmand %vm1674_vm11, %vm1603_vm10 }
   0x8   :  { %273 = vrot.lane.b32.xlu1 %v7050_v3, %s6995_s22  ;;  %v7122_v18 = vld [vmem:[%s11436_s0 + $0x78] sm:$0xff]   ;;  %458 = vmatprep.subr.bf16.mxu0 %v7115_v17  ;;  %v7158_v26 = vld [vmem:[%s11437_s1 + $0x104] ss:$8 sps:$4 sm:$0xff]   ;;  %v7163_v27 = vld [vmem:[%s11437_s1 + $0x60] ss:$8 sps:$4 sm:$0xff]   ;;  %v93_v33 = vshll.u32 %v7132_v22, 16 }
   0x9   :  { %v7127_v20 = vld [vmem:[%s11437_s1 + $0x114] ss:$8 sps:$4 sm:$0xff]   ;;  %v83_v21 = vor.u32 %v82_v16, %v78_v12  ;;  %v7143_v24 = vld [vmem:[%s11437_s1 + $0x110] ss:$8 sps:$4 sm:$0xff]   ;;  %459 = vmatpush1.bf16.msra.mxu0 %v7138_v23  ;;  %v7174_v29 = vld [vmem:[%s11437_s1 + $0x100] ss:$8 sps:$4 sm:$0xff]   ;;  %v91_v39 = vor.u32 %v89_v31, %v87_v19 }
   0xa   :  { %281 = vrot.lane.b32.xlu0 %v7057_v4, %s6997_s28  ;;  %652 = vmatprep.subr.bf16.mxu1 %v7127_v20  ;;  %v7180_v30 = vld [vmem:[%s11437_s1 + $0x54] ss:$8 sps:$4 sm:$0xff]   ;;  %v7200_v34 = vld [vmem:[%s11437_s1 + $0x50] ss:$8 sps:$4 sm:$0xff]   ;;  %v7213_v36 = vld [vmem:[%s11437_s1 + $0x44] ss:$8 sps:$4 sm:$0xff]  }
   0xb   :  { %653 = vmatpush1.bf16.msra.mxu1 %v7143_v24  ;;  %v7168_v28 = vsel %vm76_vm0, %v83_v21, %v87_v19  ;;  %460 = vmatprep.subr.bf16.mxu0 %v7151_v25  ;;  %v7190_v32 = vld [vmem:[%s11437_s1 + $0xf4] ss:$8 sps:$4 sm:$0xff]   ;;  %v7205_v35 = vld [vmem:[%s11437_s1 + $0xf0] ss:$8 sps:$4 sm:$0xff]   ;;  %v7224_v38 = vld [vmem:[%s11437_s1 + $0xe4] ss:$8 sps:$4 sm:$0xff]  }
   0xc   :  { %289 = vrot.lane.b32.xlu1 %v7064_v5, %s6996_s25  ;;  %654 = vmatprep.subr.bf16.mxu1 %v7158_v26  ;;  %v7218_v37 = vld [vmem:[%s11436_s0 + $0x18] sm:$0xff]   ;;  %v95_v40 = vrot.slane %v93_v33, 1  ;;  %v7233_v41 = vld [vmem:[%s11437_s1 + $0x40] ss:$8 sps:$4 sm:$0xff]   ;;  %v97_v44 = vshrl.u32 %v7132_v22, 16  ;;  %11518 = vst [vmem:[#allocation7_spill] sm:$0xff] %v11517_v61 }
   0xd   :  { %5367 = vmatprep.mubr.msk.bf16.mxu0 %vm295_vm1, %v7168_v28  ;;  %5411 = vmatprep.mubr.msk.bf16.mxu1 %vm295_vm1, %v7168_v28  ;;  %v7238_v42 = vld [vmem:[%s11437_s1 + $0xe0] ss:$8 sps:$4 sm:$0xff]   ;;  %v7246_v43 = vld [vmem:[%s11437_s1 + $0x34] ss:$8 sps:$4 sm:$0xff]   ;;  %v101_v45 = vshll.u32 %v7218_v37, 16  ;;  %v105_v54 = vshrl.u32 %v7218_v37, 16 }
   0xe   :  { %275 = vrot.lane.b32.xlu0 %v7071_v6, %s6995_s22  ;;  %461 = vmatpush1.bf16.msra.mxu0 %v7163_v27  ;;  %v7254_v46 = vld [vmem:[%s11437_s1 + $0xd4] ss:$8 sps:$4 sm:$0xff]   ;;  %v7261_v47 = vld [vmem:[%s11437_s1 + $0x30] ss:$8 sps:$4 sm:$0xff]   ;;  %v7264_v48 = vsel %vm76_vm0, %v91_v39, %v95_v40  ;;  %v7279_v50 = vld [vmem:[%s11437_s1 + $0x24] ss:$8 sps:$4 sm:$0xff]   ;;  %v99_v51 = vor.u32 %v97_v44, %v95_v40 }
   0xf   :  { %655 = vmatpush1.bf16.msra.mxu1 %v7174_v29  ;;  %462 = vmatprep.subr.bf16.mxu0 %v7180_v30  ;;  %v7271_v49 = vld [vmem:[%s11437_s1 + $0xd0] ss:$8 sps:$4 sm:$0xff]   ;;  %v103_v52 = vrot.slane %v101_v45, 1  ;;  %v7285_v53 = vld [vmem:[%s11437_s1 + $0xc4] ss:$8 sps:$4 sm:$0xff]   ;;  %v133_v14 = vshrl.u32 %v7031_v0, 16 }
  0x10   :  { %283 = vrot.lane.b32.xlu1 %v7076_v7, %s6997_s28  ;;  %656 = vmatprep.subr.bf16.mxu1 %v7190_v32  ;;  %v7295_v55 = vld [vmem:[%s11437_s1 + $0x20] ss:$8 sps:$4 sm:$0xff]   ;;  %v7308_v57 = vld [vmem:[%s11437_s1 + $0x14] ss:$8 sps:$4 sm:$0xff]   ;;  %v7330_v62 = vld [vmem:[%s11437_s1 + $0x10] ss:$8 sps:$4 sm:$0xff]  }
  0x11   :  { %v7300_v56 = vld [vmem:[%s11437_s1 + $0xc0] ss:$8 sps:$4 sm:$0xff]   ;;  %v7311_v58 = vsel %vm76_vm0, %v99_v51, %v103_v52  ;;  %v7318_v60 = vld [vmem:[%s11437_s1 + $0xb4] ss:$8 sps:$4 sm:$0xff]   ;;  %v107_v63 = vor.u32 %v105_v54, %v103_v52  ;;  %v7337_v12 = vld [vmem:[%s11437_s1 + $0xb0] ss:$8 sps:$4 sm:$0xff]  }
  0x12   :  { %291 = vrot.lane.b32.xlu0 %v7095_v10, %s6996_s25  ;;  %463 = vmatpush1.bf16.msra.mxu0 %v7200_v34  ;;  %v7345_v13 = vld [vmem:[%s11437_s1 + $0x4] ss:$8 sps:$4 sm:$0xff]   ;;  %v137_v16 = vrot.slane %v135_v59, 1  ;;  %v140_v19 = vshll.u32 %v7050_v3, 16  ;;  %v7366_v33 = vld [vmem:[%s11437_s1] ss:$8 sps:$4 sm:$0xff]  }
  0x13   :  { %657 = vmatpush1.bf16.msra.mxu1 %v7205_v35  ;;  %464 = vmatprep.subr.bf16.mxu0 %v7213_v36  ;;  %v7353_v21 = vld [vmem:[%s11437_s1 + $0xa4] ss:$8 sps:$4 sm:$0xff]   ;;  %v7359_v31 = vsel %vm7323_vm3, %v107_v63, 0  ;;  %v7371_v39 = vld [vmem:[%s11437_s1 + $0xa0] ss:$8 sps:$4 sm:$0xff]   ;;  %v144_v52 = vshrl.u32 %v7050_v3, 16 }
  0x14   :  { %277 = vrot.lane.b32.xlu1 %v7100_v11, %s6995_s22  ;;  %658 = vmatprep.subr.bf16.mxu1 %v7224_v38  ;;  %v7379_v40 = vld [vmem:[%s11437_s1 + $0x94] ss:$8 sps:$4 sm:$0xff]   ;;  %v138_v44 = vor.u32 %v137_v16, %v133_v14  ;;  %v142_v45 = vrot.slane %v140_v19, 1  ;;  %v148_v54 = vshll.u32 %v7071_v6, 16  ;;  %v7396_v59 = vld [vmem:[%s11437_s1 + $0x90] ss:$8 sps:$4 sm:$0xff]  }
  0x15   :  { %v7385_v51 = vld [vmem:[%s11437_s1 + $0x134] ss:$8 sps:$4 sm:$0xff]   ;;  %v7401_v63 = vld [vmem:[%s11437_s1 + $0x130] ss:$8 sps:$4 sm:$0xff]   ;;  %v7409_v14 = vld [vmem:[%s11437_s1 + $0x84] ss:$8 sps:$4 sm:$0xff]  }
  0x16   :  { %285 = vrot.lane.b32.xlu0 %v7110_v15, %s6997_s28  ;;  %465 = vmatpush1.bf16.msra.mxu0 %v7233_v41  ;;  %11519 = vst [vmem:[#allocation8_spill] sm:$0xff] %v7409_v14  ;;  %v7412_v16 = vsel %vm76_vm0, %v138_v44, %v142_v45  ;;  %v7418_v19 = vld [vmem:[%s11437_s1 + $0x124] ss:$8 sps:$4 sm:$0xff]   ;;  %v150_v3 = vrot.slane %v148_v54, 1  ;;  %v7427_v44 = vld [vmem:[%s11437_s1 + $0x80] ss:$8 sps:$4 sm:$0xff]  }
  0x17   :  { %659 = vmatpush1.bf16.msra.mxu1 %v7238_v42  ;;  %466 = vmatprep.subr.bf16.mxu0 %v7246_v43  ;;  %v7432_v0 = vld [vmem:[%s11437_s1 + $0x120] ss:$8 sps:$4 sm:$0xff]  }
  0x18   :  { %293 = vrot.lane.b32.xlu1 %v7122_v18, %s6996_s25  ;;  %660 = vmatprep.subr.bf16.mxu1 %v7254_v46  ;;  %11520 = vst [vmem:[#allocation9_spill] sm:$0xff] %v7432_v0 }
  0x1a   :  { %741 = vrot.lane.b32.xlu0 %v7036_v1, %s6995_s22  ;;  %467 = vmatpush1.bf16.msra.mxu0 %v7261_v47 }
  0x1b   :  { %661 = vmatpush1.bf16.msra.mxu1 %v7271_v49  ;;  %468 = vmatprep.subr.bf16.mxu0 %v7279_v50 }
  0x1c   :  { %749 = vrot.lane.b32.xlu1 %v7043_v2, %s6997_s28  ;;  %662 = vmatprep.subr.bf16.mxu1 %v7285_v53 }
  0x1e   :  { %758 = vrot.lane.b32.xlu0 %v7168_v28, %s6996_s25  ;;  %469 = vmatpush1.bf16.msra.mxu0 %v7295_v55 }
  0x1f   :  { %663 = vmatpush1.bf16.msra.mxu1 %v7300_v56  ;;  %470 = vmatprep.subr.bf16.mxu0 %v7308_v57 }
  0x20   :  { %743 = vrot.lane.b32.xlu1 %v7057_v4, %s6995_s22  ;;  %664 = vmatprep.subr.bf16.mxu1 %v7318_v60 }
  0x22   :  { %751 = vrot.lane.b32.xlu0 %v7064_v5, %s6997_s28  ;;  %471 = vmatpush1.bf16.msra.mxu0 %v7330_v62 }
  0x23   :  { %665 = vmatpush1.bf16.msra.mxu1 %v7337_v12  ;;  %472 = vmatprep.subr.bf16.mxu0 %v7345_v13 }
  0x24   :  { %760 = vrot.lane.b32.xlu1 %v7264_v48, %s6996_s25  ;;  %666 = vmatprep.subr.bf16.mxu1 %v7353_v21 }
  0x26   :  { %745 = vrot.lane.b32.xlu0 %v7076_v7, %s6995_s22  ;;  %473 = vmatpush1.bf16.msra.mxu0 %v7366_v33 }
  0x27   :  { %667 = vmatpush1.bf16.msra.mxu1 %v7371_v39  ;;  %486 = vmatprep.subr.bf16.mxu0 %v7379_v40 }
  0x28   :  { %753 = vrot.lane.b32.xlu1 %v7095_v10, %s6997_s28  ;;  %680 = vmatprep.subr.bf16.mxu1 %v7385_v51 }
  0x2a   :  { %762 = vrot.lane.b32.xlu0 %v7311_v58, %s6996_s25  ;;  %487 = vmatpush2.bf16.msra.mxu0 %v7396_v59 }
  0x2b   :  { %681 = vmatpush2.bf16.msra.mxu1 %v7401_v63  ;;  %488 = vmatprep.subr.bf16.mxu0 %v7409_v14 }
  0x2c   :  { %747 = vrot.lane.b32.xlu1 %v7110_v15, %s6995_s22  ;;  %682 = vmatprep.subr.bf16.mxu1 %v7418_v19 }
  0x2e   :  { %755 = vrot.lane.b32.xlu0 %v7122_v18, %s6997_s28  ;;  %489 = vmatpush2.bf16.msra.mxu0 %v7427_v44 }
  0x2f   :  { %683 = vmatpush2.bf16.msra.mxu1 %v7432_v0  ;;  %806 = vmatprep.subr.bf16.mxu0 %v7115_v17  ;;  %v188_v0 = vshll.u32 %v7036_v1, 16 }
  0x30   :  { %764 = vrot.lane.b32.xlu1 %v7359_v31, %s6996_s25  ;;  %895 = vmatprep.subr.bf16.mxu1 %v7127_v20 }
  0x32   :  { %1028 = vrot.lane.b32.xlu0 %v7043_v2, %s6995_s22  ;;  %v146_v2 = vor.u32 %v144_v52, %v142_v45  ;;  %v152_v45 = vshrl.u32 %v7071_v6, 16  ;;  %v156_v52 = vshll.u32 %v7100_v11, 16 }
  0x34   :  { %1036 = vrot.lane.b32.xlu1 %v7168_v28, %s6997_s28  ;;  %v7443_v54 = vsel %vm76_vm0, %v146_v2, %v150_v3  ;;  %v154_v6 = vor.u32 %v152_v45, %v150_v3  ;;  %v158_v14 = vrot.slane %v156_v52, 1  ;;  %v186_v45 = vshrl.u32 %v7036_v1, 16 }
  0x35   :  { %v190_v52 = vrot.slane %v188_v0, 1  ;;  %v201_v0 = vshll.u32 %v7076_v7, 16 }
  0x36   :  { %1045 = vrot.lane.b32.xlu0 %v7412_v16, %s6996_s25  ;;  %v7457_v2 = vsel %vm76_vm0, %v154_v6, %v158_v14 }
  0x37   :  { %v203_v1 = vrot.slane %v201_v0, 1 }
  0x38   :  { %1030 = vrot.lane.b32.xlu1 %v7064_v5, %s6995_s22  ;;  %v160_v5 = vshrl.u32 %v7100_v11, 16  ;;  %v193_v11 = vshll.u32 %v7057_v4, 16 }
  0x3a   :  { %1038 = vrot.lane.b32.xlu0 %v7264_v48, %s6997_s28  ;;  %v162_v3 = vor.u32 %v160_v5, %v158_v14  ;;  %v195_v14 = vrot.slane %v193_v11, 1  ;;  %v197_v5 = vshrl.u32 %v7057_v4, 16  ;;  %v205_v11 = vshrl.u32 %v7076_v7, 16 }
  0x3c   :  { %1047 = vrot.lane.b32.xlu1 %v7443_v54, %s6996_s25  ;;  %v7470_v6 = vsel %vm7323_vm3, %v162_v3, 0  ;;  %v199_v3 = vor.u32 %v197_v5, %v195_v14 }
  0x3e   :  { %1032 = vrot.lane.b32.xlu0 %v7095_v10, %s6995_s22  ;;  %v191_v10 = vor.u32 %v190_v52, %v186_v45  ;;  %v209_v45 = vshll.u32 %v7110_v15, 16  ;;  %v207_v52 = vor.u32 %v205_v11, %v203_v1 }
  0x40   :  { %1040 = vrot.lane.b32.xlu1 %v7311_v58, %s6997_s28 }
  0x42   :  { %1049 = vrot.lane.b32.xlu0 %v7457_v2, %s6996_s25 }
  0x44   :  { %1034 = vrot.lane.b32.xlu1 %v7122_v18, %s6995_s22  ;;  %v7481_v18 = vsel %vm76_vm0, %v191_v10, %v195_v14  ;;  %v211_v10 = vrot.slane %v209_v45, 1  ;;  %v213_v14 = vshrl.u32 %v7110_v15, 16 }
  0x46   :  { %1042 = vrot.lane.b32.xlu0 %v7359_v31, %s6997_s28  ;;  %v7502_v5 = vsel %vm76_vm0, %v207_v52, %v211_v10  ;;  %v215_v0 = vor.u32 %v213_v14, %v211_v10 }
  0x48   :  { %1051 = vrot.lane.b32.xlu1 %v7470_v6, %s6996_s25 }
  0x4a   :  { %1255 = vrot.lane.b32.xlu0 %v7168_v28, %s6995_s22  ;;  %v7492_v28 = vsel %vm76_vm0, %v199_v3, %v203_v1  ;;  %v7512_v1 = vsel %vm7323_vm3, %v215_v0, 0 }
  0x4c   :  { %1263 = vrot.lane.b32.xlu1 %v7412_v16, %s6997_s28 }
  0x4e   :  { %1272 = vrot.lane.b32.xlu0 %v7481_v18, %s6996_s25 }
  0x50   :  { %1257 = vrot.lane.b32.xlu1 %v7264_v48, %s6995_s22 }
  0x52   :  { %1265 = vrot.lane.b32.xlu0 %v7443_v54, %s6997_s28 }
  0x54   :  { %1274 = vrot.lane.b32.xlu1 %v7492_v28, %s6996_s25 }
  0x56   :  { %1259 = vrot.lane.b32.xlu0 %v7311_v58, %s6995_s22 }
  0x58   :  { %1267 = vrot.lane.b32.xlu1 %v7457_v2, %s6997_s28 }
  0x5a   :  { %1276 = vrot.lane.b32.xlu0 %v7502_v5, %s6996_s25 }
  0x5c   :  { %1261 = vrot.lane.b32.xlu1 %v7359_v31, %s6995_s22 }
  0x5e   :  { %1269 = vrot.lane.b32.xlu0 %v7470_v6, %s6997_s28 }
  0x60   :  { %1278 = vrot.lane.b32.xlu1 %v7512_v1, %s6996_s25 }
  0x74   :  { %v272_v15 = vpop.permute.xlu0 %271 }
  0x75   :  { %v297_v11 = vsel %vm295_vm1, %v7083_v8, %v272_v15 }
  0x76   :  { %v288_v3 = vpop.permute.xlu1 %287 }
  0x78   :  { %v280_v45 = vpop.permute.xlu0 %279 }
  0x79   :  { %v306_v52 = vsel %vm304_vm4, %v297_v11, %v280_v45 }
  0x7a   :  { %v315_v10 = vsel %vm313_vm5, %v306_v52, %v288_v3  ;;  %v274_v14 = vpop.permute.xlu1 %273 }
  0x7b   :  { %491 = vmatmul.mubr.bf16.vlgmr.msra.gmra.mxu0 %v315_v10  ;;  %685 = vmatmul.mubr.bf16.vlgmr.msra.gmra.mxu1 %v315_v10  ;;  %v299_v0 = vsel %vm295_vm1, %v7088_v9, %v274_v14 }
  0x7c   :  { %807 = vmatpush1.bf16.msra.mxu0 %v7138_v23  ;;  %896 = vmatpush1.bf16.msra.mxu1 %v7143_v24  ;;  %v282_v61 = vpop.permute.xlu0 %281 }
  0x7d   :  { %808 = vmatprep.subr.bf16.mxu0 %v7151_v25  ;;  %897 = vmatprep.subr.bf16.mxu1 %v7158_v26  ;;  %v308_v8 = vsel %vm304_vm4, %v299_v0, %v282_v61 }
  0x7e   :  { %v290_v15 = vpop.permute.xlu1 %289  ;;  %5368 = vmatprep.mubr.msk.bf16.mxu0 %vm295_vm1, %v7264_v48  ;;  %5412 = vmatprep.mubr.msk.bf16.mxu1 %vm295_vm1, %v7264_v48 }
  0x7f   :  { %v318_v9 = vsel %vm313_vm5, %v308_v8, %v290_v15  ;;  %v11521_v8 = vld [vmem:[#allocation2_spill] sm:$0xff] }
  0x80   :  { %809 = vmatpush1.bf16.msra.mxu0 %v7163_v27  ;;  %898 = vmatpush1.bf16.msra.mxu1 %v7174_v29  ;;  %v276_v3 = vpop.permute.xlu0 %275 }
  0x81   :  { %810 = vmatprep.subr.bf16.mxu0 %v7180_v30  ;;  %899 = vmatprep.subr.bf16.mxu1 %v7190_v32  ;;  %v301_v61 = vsel %vm295_vm1, %v7132_v22, %v276_v3 }
  0x82   :  { %v284_v11 = vpop.permute.xlu1 %283 }
  0x83   :  { %501 = vmatmul.mubr.bf16.gmra.mxu0 %v318_v9  ;;  %695 = vmatmul.mubr.bf16.gmra.mxu1 %v318_v9  ;;  %v310_v48 = vsel %vm304_vm4, %v301_v61, %v284_v11 }
  0x84   :  { %811 = vmatpush1.bf16.msra.mxu0 %v7200_v34  ;;  %900 = vmatpush1.bf16.msra.mxu1 %v7205_v35  ;;  %v292_v45 = vpop.permute.xlu0 %291 }
  0x85   :  { %812 = vmatprep.subr.bf16.mxu0 %v7213_v36  ;;  %901 = vmatprep.subr.bf16.mxu1 %v7224_v38  ;;  %v321_v52 = vsel %vm313_vm5, %v310_v48, %v292_v45  ;;  %v11523_v45 = vld [vmem:[#allocation9_spill] sm:$0xff] }
  0x86   :  { %5369 = vmatprep.mubr.msk.bf16.mxu0 %vm295_vm1, %v7311_v58  ;;  %5413 = vmatprep.mubr.msk.bf16.mxu1 %vm295_vm1, %v7311_v58  ;;  %v278_v22 = vpop.permute.xlu1 %277 }
  0x87   :  { %v303_v10 = vsel %vm295_vm1, %v7218_v37, %v278_v22 }
  0x88   :  { %813 = vmatpush1.bf16.msra.mxu0 %v7233_v41  ;;  %902 = vmatpush1.bf16.msra.mxu1 %v7238_v42  ;;  %v286_v14 = vpop.permute.xlu0 %285 }
  0x89   :  { %814 = vmatprep.subr.bf16.mxu0 %v7246_v43  ;;  %903 = vmatprep.subr.bf16.mxu1 %v7254_v46  ;;  %v312_v58 = vsel %vm304_vm4, %v303_v10, %v286_v14 }
  0x8a   :  { %v294_v0 = vpop.permute.xlu1 %293 }
  0x8b   :  { %511 = vmatmul.mubr.bf16.gmra.mxu0 %v321_v52  ;;  %705 = vmatmul.mubr.bf16.gmra.mxu1 %v321_v52  ;;  %v324_v37 = vsel %vm313_vm5, %v312_v58, %v294_v0  ;;  %v11524_v52 = vld [vmem:[#allocation4_spill] sm:$0xff] }
  0x8c   :  { %815 = vmatpush1.bf16.msra.mxu0 %v7261_v47  ;;  %904 = vmatpush1.bf16.msra.mxu1 %v7271_v49 }
  0x8d   :  { %816 = vmatprep.subr.bf16.mxu0 %v7279_v50  ;;  %905 = vmatprep.subr.bf16.mxu1 %v7285_v53 }
  0x8e   :  { %5370 = vmatprep.mubr.msk.bf16.mxu0 %vm295_vm1, %v7359_v31  ;;  %5414 = vmatprep.mubr.msk.bf16.mxu1 %vm295_vm1, %v7359_v31  ;;  %v742_v31 = vpop.permute.xlu0 %741  ;;  %v750_v9 = vpop.permute.xlu1 %749 }
  0x8f   :  { %v767_v15 = vsel %vm295_vm1, %v11521_v8, %v742_v31  ;;  %v11525_v8 = vld [vmem:[#allocation5_spill] sm:$0xff] }
  0x90   :  { %817 = vmatpush1.bf16.msra.mxu0 %v7295_v55  ;;  %906 = vmatpush1.bf16.msra.mxu1 %v7300_v56  ;;  %v775_v3 = vsel %vm304_vm4, %v767_v15, %v750_v9 }
  0x91   :  { %818 = vmatprep.subr.bf16.mxu0 %v7308_v57  ;;  %907 = vmatprep.subr.bf16.mxu1 %v7318_v60 }
  0x92   :  { %v759_v61 = vpop.permute.xlu0 %758  ;;  %v744_v11 = vpop.permute.xlu1 %743 }
  0x93   :  { %521 = vmatmul.mubr.bf16.gmra.mxu0 %v324_v37  ;;  %715 = vmatmul.mubr.bf16.gmra.mxu1 %v324_v37  ;;  %v783_v48 = vsel %vm313_vm5, %v775_v3, %v759_v61  ;;  %v769_v10 = vsel %vm295_vm1, %v11524_v52, %v744_v11  ;;  %v11526_v11 = vld [vmem:[#allocation6_spill] sm:$0xff] }
  0x94   :  { %819 = vmatpush1.bf16.msra.mxu0 %v7330_v62  ;;  %908 = vmatpush1.bf16.msra.mxu1 %v7337_v12 }
  0x95   :  { %820 = vmatprep.subr.bf16.mxu0 %v7345_v13  ;;  %909 = vmatprep.subr.bf16.mxu1 %v7353_v21 }
  0x96   :  { %5415 = vmatprep.mubr.msk.bf16.mxu0 %vm295_vm1, %v7412_v16  ;;  %5419 = vmatprep.mubr.msk.bf16.mxu1 %vm295_vm1, %v7412_v16  ;;  %v11522_v16 = vld [vmem:[#allocation8_spill] sm:$0xff]  ;;  %v752_v22 = vpop.permute.xlu0 %751  ;;  %v761_v58 = vpop.permute.xlu1 %760 }
  0x97   :  { %v777_v14 = vsel %vm304_vm4, %v769_v10, %v752_v22 }
  0x98   :  { %821 = vmatpush1.bf16.msra.mxu0 %v7366_v33  ;;  %910 = vmatpush1.bf16.msra.mxu1 %v7371_v39  ;;  %v786_v37 = vsel %vm313_vm5, %v777_v14, %v761_v58  ;;  %v11527_v14 = vld [vmem:[#allocation3_spill] sm:$0xff] }
  0x99   :  { %834 = vmatprep.subr.bf16.mxu0 %v7379_v40  ;;  %923 = vmatprep.subr.bf16.mxu1 %v7385_v51 }
  0x9a   :  { %v746_v0 = vpop.permute.xlu0 %745  ;;  %v754_v31 = vpop.permute.xlu1 %753 }
  0x9b   :  { %v771_v15 = vsel %vm295_vm1, %v11525_v8, %v746_v0 }
  0x9c   :  { %835 = vmatpush2.bf16.msra.mxu0 %v7396_v59  ;;  %924 = vmatpush2.bf16.msra.mxu1 %v7401_v63 }
  0x9d   :  { %836 = vmatprep.subr.bf16.mxu0 %v11522_v16  ;;  %925 = vmatprep.subr.bf16.mxu1 %v7418_v19 }
  0x9e   :  { %v763_v9 = vpop.permute.xlu0 %762  ;;  %v748_v3 = vpop.permute.xlu1 %747 }
  0xa0   :  { %837 = vmatpush2.bf16.msra.mxu0 %v7427_v44  ;;  %926 = vmatpush2.bf16.msra.mxu1 %v11523_v45 }
  0xa1   :  { %1093 = vmatprep.subr.bf16.mxu0 %v7115_v17  ;;  %1166 = vmatprep.subr.bf16.mxu1 %v7127_v20 }
  0xa2   :  { %v756_v22 = vpop.permute.xlu0 %755  ;;  %v765_v52 = vpop.permute.xlu1 %764 }
  0xa3   :  { %839 = vmatmul.mubr.bf16.vlgmr.msra.gmra.mxu0 %v783_v48  ;;  %928 = vmatmul.mubr.bf16.vlgmr.msra.gmra.mxu1 %v783_v48  ;;  %v773_v48 = vsel %vm295_vm1, %v11526_v11, %v748_v3 }
  0xa4   :  { %1094 = vmatpush1.bf16.msra.mxu0 %v7138_v23  ;;  %1167 = vmatpush1.bf16.msra.mxu1 %v7143_v24 }
  0xa5   :  { %1095 = vmatprep.subr.bf16.mxu0 %v7151_v25  ;;  %1168 = vmatprep.subr.bf16.mxu1 %v7158_v26 }
  0xa6   :  { %5416 = vmatprep.mubr.msk.bf16.mxu0 %vm295_vm1, %v7443_v54  ;;  %5420 = vmatprep.mubr.msk.bf16.mxu1 %vm295_vm1, %v7443_v54  ;;  %v779_v54 = vsel %vm304_vm4, %v771_v15, %v754_v31  ;;  %v1037_v0 = vpop.permute.xlu1 %1036 }
  0xa7   :  { %v789_v61 = vsel %vm313_vm5, %v779_v54, %v763_v9 }
  0xa8   :  { %1096 = vmatpush1.bf16.msra.mxu0 %v7163_v27  ;;  %1169 = vmatpush1.bf16.msra.mxu1 %v7174_v29 }
  0xa9   :  { %1097 = vmatprep.subr.bf16.mxu0 %v7180_v30  ;;  %1170 = vmatprep.subr.bf16.mxu1 %v7190_v32 }
  0xaa   :  { %v1031_v31 = vpop.permute.xlu1 %1030 }
  0xab   :  { %849 = vmatmul.mubr.bf16.gmra.mxu0 %v786_v37  ;;  %938 = vmatmul.mubr.bf16.gmra.mxu1 %v786_v37  ;;  %v1056_v54 = vsel %vm295_vm1, %v7057_v4, %v1031_v31  ;;  %v6199_v31 = vld [vmem:[%s11438_s3 + $0x40] ss:$8 sps:$4 sm:$0xff]  }
  0xac   :  { %1098 = vmatpush1.bf16.msra.mxu0 %v7200_v34  ;;  %1171 = vmatpush1.bf16.msra.mxu1 %v7205_v35 }
  0xad   :  { %1099 = vmatprep.subr.bf16.mxu0 %v7213_v36  ;;  %1172 = vmatprep.subr.bf16.mxu1 %v7224_v38 }
  0xae   :  { %5417 = vmatprep.mubr.msk.bf16.mxu0 %vm295_vm1, %v7457_v2  ;;  %5421 = vmatprep.mubr.msk.bf16.mxu1 %vm295_vm1, %v7457_v2  ;;  %v781_v2 = vsel %vm304_vm4, %v773_v48, %v756_v22  ;;  %v1048_v3 = vpop.permute.xlu1 %1047 }
  0xaf   :  { %v792_v10 = vsel %vm313_vm5, %v781_v2, %v765_v52  ;;  %v6198_v2 = vld [vmem:[%s11438_s3 + $0x54] ss:$8 sps:$4 sm:$0xff]  }
  0xb0   :  { %1100 = vmatpush1.bf16.msra.mxu0 %v7233_v41  ;;  %1173 = vmatpush1.bf16.msra.mxu1 %v7238_v42 }
  0xb1   :  { %1101 = vmatprep.subr.bf16.mxu0 %v7246_v43  ;;  %1174 = vmatprep.subr.bf16.mxu1 %v7254_v46 }
  0xb3   :  { %859 = vmatmul.mubr.bf16.gmra.mxu0 %v789_v61  ;;  %948 = vmatmul.mubr.bf16.gmra.mxu1 %v789_v61 }
  0xb4   :  { %1102 = vmatpush1.bf16.msra.mxu0 %v7261_v47  ;;  %1175 = vmatpush1.bf16.msra.mxu1 %v7271_v49 }
  0xb5   :  { %1103 = vmatprep.subr.bf16.mxu0 %v7279_v50  ;;  %1176 = vmatprep.subr.bf16.mxu1 %v7285_v53 }
  0xb6   :  { %5418 = vmatprep.mubr.msk.bf16.mxu0 %vm295_vm1, %v7470_v6  ;;  %5422 = vmatprep.mubr.msk.bf16.mxu1 %vm295_vm1, %v7470_v6  ;;  %v1029_v6 = vpop.permute.xlu0 %1028 }
  0xb7   :  { %v1054_v58 = vsel %vm295_vm1, %v11527_v14, %v1029_v6 }
  0xb8   :  { %1104 = vmatpush1.bf16.msra.mxu0 %v7295_v55  ;;  %1177 = vmatpush1.bf16.msra.mxu1 %v7300_v56  ;;  %v1062_v37 = vsel %vm304_vm4, %v1054_v58, %v1037_v0  ;;  %v6196_v0 = vld [vmem:[%s11438_s3 + $0x50] ss:$8 sps:$4 sm:$0xff]  }
  0xb9   :  { %1105 = vmatprep.subr.bf16.mxu0 %v7308_v57  ;;  %1178 = vmatprep.subr.bf16.mxu1 %v7318_v60 }
  0xbb   :  { %869 = vmatmul.mubr.bf16.gmra.mxu0 %v792_v10  ;;  %958 = vmatmul.mubr.bf16.gmra.mxu1 %v792_v10 }
  0xbc   :  { %1106 = vmatpush1.bf16.msra.mxu0 %v7330_v62  ;;  %1179 = vmatpush1.bf16.msra.mxu1 %v7337_v12 }
  0xbd   :  { %1107 = vmatprep.subr.bf16.mxu0 %v7345_v13  ;;  %1180 = vmatprep.subr.bf16.mxu1 %v7353_v21 }
  0xbe   :  { %5423 = vmatprep.mubr.msk.bf16.mxu0 %vm295_vm1, %v7481_v18  ;;  %5427 = vmatprep.mubr.msk.bf16.mxu1 %vm295_vm1, %v7481_v18  ;;  %v1046_v18 = vpop.permute.xlu0 %1045 }
  0xbf   :  { %v1070_v8 = vsel %vm313_vm5, %v1062_v37, %v1046_v18  ;;  %v6201_v37 = vld [vmem:[%s11438_s3 + $0x44] ss:$8 sps:$4 sm:$0xff]  }
  0xc0   :  { %1108 = vmatpush1.bf16.msra.mxu0 %v7366_v33  ;;  %1181 = vmatpush1.bf16.msra.mxu1 %v7371_v39 }
  0xc1   :  { %1121 = vmatprep.subr.bf16.mxu0 %v7379_v40  ;;  %1194 = vmatprep.subr.bf16.mxu1 %v7385_v51 }
  0xc2   :  { %v1039_v15 = vpop.permute.xlu0 %1038 }
  0xc3   :  { %v1064_v9 = vsel %vm304_vm4, %v1056_v54, %v1039_v15 }
  0xc4   :  { %1122 = vmatpush2.bf16.msra.mxu0 %v7396_v59  ;;  %1195 = vmatpush2.bf16.msra.mxu1 %v7401_v63 }
  0xc5   :  { %1123 = vmatprep.subr.bf16.mxu0 %v11522_v16  ;;  %1196 = vmatprep.subr.bf16.mxu1 %v7418_v19 }
  0xc6   :  { %v1033_v4 = vpop.permute.xlu0 %1032 }
  0xc8   :  { %1124 = vmatpush2.bf16.msra.mxu0 %v7427_v44  ;;  %1197 = vmatpush2.bf16.msra.mxu1 %v11523_v45 }
  0xc9   :  { %1320 = vmatprep.subr.bf16.mxu0 %v7115_v17  ;;  %1409 = vmatprep.subr.bf16.mxu1 %v7127_v20  ;;  %v1073_v17 = vsel %vm313_vm5, %v1064_v9, %v1048_v3  ;;  %v1041_v20 = vpop.permute.xlu1 %1040  ;;  %v6204_v9 = vld [vmem:[%s11438_s3 + $0x34] ss:$8 sps:$4 sm:$0xff]  }
  0xcb   :  { %1126 = vmatmul.mubr.bf16.vlgmr.msra.gmra.mxu0 %v1070_v8  ;;  %1199 = vmatmul.mubr.bf16.vlgmr.msra.gmra.mxu1 %v1070_v8 }
  0xcc   :  { %1321 = vmatpush1.bf16.msra.mxu0 %v7138_v23  ;;  %1410 = vmatpush1.bf16.msra.mxu1 %v7143_v24  ;;  %v1058_v23 = vsel %vm295_vm1, %v7076_v7, %v1033_v4  ;;  %v6202_v4 = vld [vmem:[%s11438_s3 + $0x30] ss:$8 sps:$4 sm:$0xff]  }
  0xcd   :  { %1322 = vmatprep.subr.bf16.mxu0 %v7151_v25  ;;  %1411 = vmatprep.subr.bf16.mxu1 %v7158_v26  ;;  %v1066_v24 = vsel %vm304_vm4, %v1058_v23, %v1041_v20  ;;  %v1050_v25 = vpop.permute.xlu0 %1049  ;;  %v1035_v7 = vpop.permute.xlu1 %1034  ;;  %v6670_v26 = vld [vmem:[%s11436_s0 + $0x60] sm:$0xff]  }
  0xce   :  { %5424 = vmatprep.mubr.msk.bf16.mxu0 %vm295_vm1, %v7492_v28  ;;  %5428 = vmatprep.mubr.msk.bf16.mxu1 %vm295_vm1, %v7492_v28  ;;  %v6207_v20 = vld [vmem:[%s11438_s3 + $0x24] ss:$8 sps:$4 sm:$0xff]  }
  0xd0   :  { %1323 = vmatpush1.bf16.msra.mxu0 %v7163_v27  ;;  %1412 = vmatpush1.bf16.msra.mxu1 %v7174_v29  ;;  %v241_v27 = vshll.u32 %v6670_v26, 16  ;;  %v1076_v29 = vsel %vm313_vm5, %v1066_v24, %v1050_v25 }
  0xd1   :  { %1324 = vmatprep.subr.bf16.mxu0 %v7180_v30  ;;  %1413 = vmatprep.subr.bf16.mxu1 %v7190_v32  ;;  %v6671_v30 = vld [vmem:[%s11436_s0 + $0x58] sm:$0xff]  }
  0xd2   :  { %v1060_v32 = vsel %vm295_vm1, %v6671_v30, %v1035_v7  ;;  %v6210_v30 = vld [vmem:[%s11438_s3 + $0x14] ss:$8 sps:$4 sm:$0xff]  }
  0xd3   :  { %1136 = vmatmul.mubr.bf16.gmra.mxu0 %v1073_v17  ;;  %1209 = vmatmul.mubr.bf16.gmra.mxu1 %v1073_v17 }
  0xd4   :  { %1325 = vmatpush1.bf16.msra.mxu0 %v7200_v34  ;;  %1414 = vmatpush1.bf16.msra.mxu1 %v7205_v35  ;;  %v1043_v34 = vpop.permute.xlu0 %1042  ;;  %v239_v35 = vshrl.u32 %v6670_v26, 16 }
  0xd5   :  { %1326 = vmatprep.subr.bf16.mxu0 %v7213_v36  ;;  %1415 = vmatprep.subr.bf16.mxu1 %v7224_v38  ;;  %v243_v36 = vrot.slane %v241_v27, 1  ;;  %v6672_v38 = vld [vmem:[%s11436_s0 + $0x68] sm:$0xff]  }
  0xd6   :  { %5425 = vmatprep.mubr.msk.bf16.mxu0 %vm295_vm1, %v7502_v5  ;;  %5429 = vmatprep.mubr.msk.bf16.mxu1 %vm295_vm1, %v7502_v5 }
  0xd8   :  { %1327 = vmatpush1.bf16.msra.mxu0 %v7233_v41  ;;  %1416 = vmatpush1.bf16.msra.mxu1 %v7238_v42  ;;  %v246_v41 = vshll.u32 %v6672_v38, 16  ;;  %v1068_v42 = vsel %vm304_vm4, %v1060_v32, %v1043_v34  ;;  %v6208_v32 = vld [vmem:[%s11438_s3 + $0x10] ss:$8 sps:$4 sm:$0xff]  }
  0xd9   :  { %1328 = vmatprep.subr.bf16.mxu0 %v7246_v43  ;;  %1417 = vmatprep.subr.bf16.mxu1 %v7254_v46  ;;  %v1052_v43 = vpop.permute.xlu1 %1051  ;;  %v244_v46 = vor.u32 %v243_v36, %v239_v35  ;;  %v6213_v35 = vld [vmem:[%s11438_s3 + $0x4] ss:$8 sps:$4 sm:$0xff]   ;;  %v6211_v36 = vld [vmem:[%s11438_s3] ss:$8 sps:$4 sm:$0xff]  }
  0xda   :  { %v248_v28 = vrot.slane %v246_v41, 1  ;;  %v6214_v41 = vld [vmem:[%s11438_s3 + $0xf0] ss:$8 sps:$4 sm:$0xff]  }
  0xdb   :  { %1146 = vmatmul.mubr.bf16.gmra.mxu0 %v1076_v29  ;;  %1219 = vmatmul.mubr.bf16.gmra.mxu1 %v1076_v29  ;;  %v6205_v29 = vld [vmem:[%s11438_s3 + $0x20] ss:$8 sps:$4 sm:$0xff]  }
  0xdc   :  { %1329 = vmatpush1.bf16.msra.mxu0 %v7261_v47  ;;  %1418 = vmatpush1.bf16.msra.mxu1 %v7271_v49  ;;  %v1079_v47 = vsel %vm313_vm5, %v1068_v42, %v1052_v43  ;;  %v249_v49 = vsel %vm76_vm0, %v244_v46, %v248_v28  ;;  %v6250_v42 = vld [vmem:[%s11438_s3 + $0x170] ss:$8 sps:$4 sm:$0xff]   ;;  %v6252_v43 = vld [vmem:[%s11438_s3 + $0x174] ss:$8 sps:$4 sm:$0xff]   ;;  %v6219_v46 = vld [vmem:[%s11438_s3 + $0xe4] ss:$8 sps:$4 sm:$0xff]  }
  0xdd   :  { %1330 = vmatprep.subr.bf16.mxu0 %v7279_v50  ;;  %1419 = vmatprep.subr.bf16.mxu1 %v7285_v53  ;;  %v1256_v50 = vpop.permute.xlu0 %1255  ;;  %v250_v53 = vshrl.u32 %v6672_v38, 16 }
  0xde   :  { %5426 = vmatprep.mubr.msk.bf16.mxu0 %vm295_vm1, %v7512_v1  ;;  %5430 = vmatprep.mubr.msk.bf16.mxu1 %vm295_vm1, %v7512_v1 }
  0xe0   :  { %1331 = vmatpush1.bf16.msra.mxu0 %v7295_v55  ;;  %1420 = vmatpush1.bf16.msra.mxu1 %v7300_v56  ;;  %v6673_v55 = vld [vmem:[%s11436_s0 + $0x70] sm:$0xff]  }
  0xe1   :  { %1332 = vmatprep.subr.bf16.mxu0 %v7308_v57  ;;  %1421 = vmatprep.subr.bf16.mxu1 %v7318_v60  ;;  %v254_v56 = vshll.u32 %v6673_v55, 16  ;;  %v1264_v57 = vpop.permute.xlu1 %1263  ;;  %v1281_v60 = vsel %vm295_vm1, %v6670_v26, %v1256_v50  ;;  %v6222_v50 = vld [vmem:[%s11438_s3 + $0xd4] ss:$8 sps:$4 sm:$0xff]  }
  0xe3   :  { %1156 = vmatmul.mubr.bf16.gmra.mxu0 %v1079_v47  ;;  %1229 = vmatmul.mubr.bf16.gmra.mxu1 %v1079_v47  ;;  %v6256_v47 = vld [vmem:[%s11438_s3 + $0x160] ss:$8 sps:$4 sm:$0xff]  }
  0xe4   :  { %1333 = vmatpush1.bf16.msra.mxu0 %v7330_v62  ;;  %1422 = vmatpush1.bf16.msra.mxu1 %v7337_v12  ;;  %v6192_v62 = vld [vmem:[%s11438_s3 + $0x74] ss:$8 sps:$4 sm:$0xff]   ;;  %v1273_v12 = vpop.permute.xlu0 %1272 }
  0xe5   :  { %1334 = vmatprep.subr.bf16.mxu0 %v7345_v13  ;;  %1423 = vmatprep.subr.bf16.mxu1 %v7353_v21  ;;  %v252_v13 = vor.u32 %v250_v53, %v248_v28  ;;  %v256_v21 = vrot.slane %v254_v56, 1  ;;  %v6217_v28 = vld [vmem:[%s11438_s3 + $0xe0] ss:$8 sps:$4 sm:$0xff]   ;;  %v6220_v53 = vld [vmem:[%s11438_s3 + $0xd0] ss:$8 sps:$4 sm:$0xff]  }
  0xe6   :  { %5431 = vmatprep.mubr.msk.bf16.mxu0 %vm295_vm1, %v249_v49  ;;  %5435 = vmatprep.mubr.msk.bf16.mxu1 %vm295_vm1, %v249_v49  ;;  %v6258_v49 = vld [vmem:[%s11438_s3 + $0x164] ss:$8 sps:$4 sm:$0xff]   ;;  %v6264_v56 = vld [vmem:[%s11438_s3 + $0x154] ss:$8 sps:$4 sm:$0xff]  }
  0xe8   :  { %1335 = vmatpush1.bf16.msra.mxu0 %v7366_v33  ;;  %1424 = vmatpush1.bf16.msra.mxu1 %v7371_v39  ;;  %v1289_v33 = vsel %vm304_vm4, %v1281_v60, %v1264_v57  ;;  %v1258_v39 = vpop.permute.xlu1 %1257  ;;  %v6225_v57 = vld [vmem:[%s11438_s3 + $0xc4] ss:$8 sps:$4 sm:$0xff]   ;;  %v6223_v60 = vld [vmem:[%s11438_s3 + $0xc0] ss:$8 sps:$4 sm:$0xff]  }
  0xe9   :  { %1348 = vmatprep.subr.bf16.mxu0 %v7379_v40  ;;  %1437 = vmatprep.subr.bf16.mxu1 %v7385_v51  ;;  %v6190_v40 = vld [vmem:[%s11438_s3 + $0x70] ss:$8 sps:$4 sm:$0xff]   ;;  %v1266_v51 = vpop.permute.xlu0 %1265  ;;  %v1297_v1 = vsel %vm313_vm5, %v1289_v33, %v1273_v12  ;;  %v6270_v12 = vld [vmem:[%s11438_s3 + $0x144] ss:$8 sps:$4 sm:$0xff]  }
  0xea   :  { %v6274_v33 = vld [vmem:[%s11438_s3 + $0x130] ss:$8 sps:$4 sm:$0xff]  }
  0xec   :  { %1349 = vmatpush2.bf16.msra.mxu0 %v7396_v59  ;;  %1438 = vmatpush2.bf16.msra.mxu1 %v7401_v63  ;;  %v257_v59 = vsel %vm76_vm0, %v252_v13, %v256_v21  ;;  %v258_v63 = vshrl.u32 %v6673_v55, 16  ;;  %v1275_v11 = vpop.permute.xlu1 %1274  ;;  %v6228_v13 = vld [vmem:[%s11438_s3 + $0xb4] ss:$8 sps:$4 sm:$0xff]  }
  0xed   :  { %1350 = vmatprep.subr.bf16.mxu0 %v11522_v16  ;;  %1439 = vmatprep.subr.bf16.mxu1 %v7418_v19  ;;  %v6674_v19 = vld [vmem:[%s11436_s0 + $0x78] sm:$0xff]   ;;  %v1283_v16 = vsel %vm295_vm1, %v6672_v38, %v1258_v39  ;;  %v1260_v52 = vpop.permute.xlu0 %1259 }
  0xee   :  { %v262_v5 = vshll.u32 %v6674_v19, 16  ;;  %v1291_v61 = vsel %vm304_vm4, %v1283_v16, %v1266_v51  ;;  %v260_v48 = vor.u32 %v258_v63, %v256_v21  ;;  %v266_v58 = vshrl.u32 %v6674_v19, 16  ;;  %v6216_v38 = vld [vmem:[%s11438_s3 + $0xf4] ss:$8 sps:$4 sm:$0xff]   ;;  %v6226_v21 = vld [vmem:[%s11438_s3 + $0xb0] ss:$8 sps:$4 sm:$0xff]  }
  0xef   :  { %v1300_v10 = vsel %vm313_vm5, %v1291_v61, %v1275_v11  ;;  %v1285_v18 = vsel %vm295_vm1, %v6673_v55, %v1260_v52  ;;  %v6262_v55 = vld [vmem:[%s11438_s3 + $0x150] ss:$8 sps:$4 sm:$0xff]   ;;  %v6276_v39 = vld [vmem:[%s11438_s3 + $0x134] ss:$8 sps:$4 sm:$0xff]   ;;  %v6229_v51 = vld [vmem:[%s11438_s3 + $0xa0] ss:$8 sps:$4 sm:$0xff]  }
  0xf0   :  { %1351 = vmatpush2.bf16.msra.mxu0 %v7427_v44  ;;  %1440 = vmatpush2.bf16.msra.mxu1 %v11523_v45  ;;  %v6195_v44 = vld [vmem:[%s11438_s3 + $0x64] ss:$8 sps:$4 sm:$0xff]   ;;  %v6193_v45 = vld [vmem:[%s11438_s3 + $0x60] ss:$8 sps:$4 sm:$0xff]   ;;  %v264_v22 = vrot.slane %v262_v5, 1  ;;  %v1268_v6 = vpop.permute.xlu1 %1267 }
  0xf1   :  { %2774 = vmatprep.subr.bf16.mxu0 %v6192_v62  ;;  %v1293_v8 = vsel %vm304_vm4, %v1285_v18, %v1268_v6  ;;  %v1277_v15 = vpop.permute.xlu0 %1276  ;;  %2847 = vmatprep.subr.bf16.mxu1 %v6252_v43  ;;  %v6268_v62 = vld [vmem:[%s11438_s3 + $0x140] ss:$8 sps:$4 sm:$0xff]   ;;  %v6282_v63 = vld [vmem:[%s11438_s3 + $0x124] ss:$8 sps:$4 sm:$0xff]   ;;  %v6232_v5 = vld [vmem:[%s11438_s3 + $0x90] ss:$8 sps:$4 sm:$0xff]  }
  0xf2   :  { %v265_v14 = vsel %vm76_vm0, %v260_v48, %v264_v22  ;;  %v268_v54 = vor.u32 %v266_v58, %v264_v22  ;;  %v1303_v17 = vsel %vm313_vm5, %v1293_v8, %v1277_v15  ;;  %v6237_v16 = vld [vmem:[%s11438_s3 + $0x84] ss:$8 sps:$4 sm:$0xff]   ;;  %v6292_v61 = vld [vmem:[%s11438_s3 + $0x100] ss:$8 sps:$4 sm:$0xff]   ;;  %v6240_v48 = vld [vmem:[%s11438_s3 + $0x274] ss:$8 sps:$4 sm:$0xff]  }
  0xf3   :  { %1353 = vmatmul.mubr.bf16.vlgmr.msra.gmra.mxu0 %v1297_v1  ;;  %1442 = vmatmul.mubr.bf16.vlgmr.msra.gmra.mxu1 %v1297_v1  ;;  %v6288_v1 = vld [vmem:[%s11438_s3 + $0x114] ss:$8 sps:$4 sm:$0xff]   ;;  %v6294_v11 = vld [vmem:[%s11438_s3 + $0x104] ss:$8 sps:$4 sm:$0xff]   ;;  %v6298_v22 = vld [vmem:[%s11438_s3 + $0x1f0] ss:$8 sps:$4 sm:$0xff]  }
  0xf4   :  { %5432 = vmatprep.mubr.msk.bf16.mxu0 %vm295_vm1, %v257_v59  ;;  %5436 = vmatprep.mubr.msk.bf16.mxu1 %vm295_vm1, %v257_v59  ;;  %v1262_v3 = vpop.permute.xlu1 %1261  ;;  %v270_v24 = vsel %vm7323_vm3, %v268_v54, 0  ;;  %v6280_v59 = vld [vmem:[%s11438_s3 + $0x120] ss:$8 sps:$4 sm:$0xff]   ;;  %v6312_v58 = vld [vmem:[%s11438_s3 + $0x1d4] ss:$8 sps:$4 sm:$0xff]  }
  0xf5   :  { %2775 = vmatpush1.bf16.msra.mxu0 %v6190_v40  ;;  %v1287_v25 = vsel %vm295_vm1, %v6674_v19, %v1262_v3  ;;  %v1270_v7 = vpop.permute.xlu0 %1269  ;;  %2848 = vmatpush1.bf16.msra.mxu1 %v6250_v42  ;;  %v6231_v40 = vld [vmem:[%s11438_s3 + $0xa4] ss:$8 sps:$4 sm:$0xff]   ;;  %v6234_v19 = vld [vmem:[%s11438_s3 + $0x94] ss:$8 sps:$4 sm:$0xff]   ;;  %v6304_v52 = vld [vmem:[%s11438_s3 + $0x1e0] ss:$8 sps:$4 sm:$0xff]  }
  0xf6   :  { %2776 = vmatprep.subr.bf16.mxu0 %v6195_v44  ;;  %v1295_v26 = vsel %vm304_vm4, %v1287_v25, %v1270_v7  ;;  %2849 = vmatprep.subr.bf16.mxu1 %v6258_v49  ;;  %v6286_v44 = vld [vmem:[%s11438_s3 + $0x110] ss:$8 sps:$4 sm:$0xff]   ;;  %v6318_v15 = vld [vmem:[%s11438_s3 + $0x1c4] ss:$8 sps:$4 sm:$0xff]   ;;  %v6316_v54 = vld [vmem:[%s11438_s3 + $0x1c0] ss:$8 sps:$4 sm:$0xff]  }
  0xf7   :  { %v6340_v49 = vld [vmem:[%s11438_s3 + $0x180] ss:$8 sps:$4 sm:$0xff]  }
  0xf8   :  { %v1279_v27 = vpop.permute.xlu1 %1278 }
  0xf9   :  { %2777 = vmatpush1.bf16.msra.mxu0 %v6193_v45  ;;  %v1306_v34 = vsel %vm313_vm5, %v1295_v26, %v1279_v27  ;;  %2850 = vmatpush1.bf16.msra.mxu1 %v6256_v47  ;;  %v6235_v45 = vld [vmem:[%s11438_s3 + $0x80] ss:$8 sps:$4 sm:$0xff]   ;;  %v6342_v47 = vld [vmem:[%s11438_s3 + $0x184] ss:$8 sps:$4 sm:$0xff]  }
  0xfa   :  { %2778 = vmatprep.subr.bf16.mxu0 %v6198_v2  ;;  %2851 = vmatprep.subr.bf16.mxu1 %v6264_v56  ;;  %v6300_v2 = vld [vmem:[%s11438_s3 + $0x1f4] ss:$8 sps:$4 sm:$0xff]  }
  0xfb   :  { %1363 = vmatmul.mubr.bf16.gmra.mxu0 %v1300_v10  ;;  %1452 = vmatmul.mubr.bf16.gmra.mxu1 %v1300_v10  ;;  %v6306_v10 = vld [vmem:[%s11438_s3 + $0x1e4] ss:$8 sps:$4 sm:$0xff]  }
  0xfc   :  { %5433 = vmatprep.mubr.msk.bf16.mxu0 %vm295_vm1, %v265_v14  ;;  %5437 = vmatprep.mubr.msk.bf16.mxu1 %vm295_vm1, %v265_v14 }
  0xfd   :  { %2779 = vmatpush1.bf16.msra.mxu0 %v6196_v0  ;;  %2852 = vmatpush1.bf16.msra.mxu1 %v6262_v55  ;;  %v6310_v0 = vld [vmem:[%s11438_s3 + $0x1d0] ss:$8 sps:$4 sm:$0xff]   ;;  %v6348_v55 = vld [vmem:[%s11438_s3 + $0x374] ss:$8 sps:$4 sm:$0xff]  }
  0xfe   :  { %2780 = vmatprep.subr.bf16.mxu0 %v6201_v37  ;;  %2853 = vmatprep.subr.bf16.mxu1 %v6270_v12 }
 0x101   :  { %2781 = vmatpush1.bf16.msra.mxu0 %v6199_v31  ;;  %2854 = vmatpush1.bf16.msra.mxu1 %v6268_v62 }
 0x102   :  { %2782 = vmatprep.subr.bf16.mxu0 %v6204_v9  ;;  %2855 = vmatprep.subr.bf16.mxu1 %v6276_v39 }
 0x103   :  { %1373 = vmatmul.mubr.bf16.gmra.mxu0 %v1303_v17  ;;  %1462 = vmatmul.mubr.bf16.gmra.mxu1 %v1303_v17 }
 0x104   :  { %5434 = vmatprep.mubr.msk.bf16.mxu0 %vm295_vm1, %v270_v24  ;;  %5438 = vmatprep.mubr.msk.bf16.mxu1 %vm295_vm1, %v270_v24  ;;  %v6322_v24 = vld [vmem:[%s11438_s3 + $0x1b0] ss:$8 sps:$4 sm:$0xff]  }
 0x105   :  { %2783 = vmatpush1.bf16.msra.mxu0 %v6202_v4  ;;  %2856 = vmatpush1.bf16.msra.mxu1 %v6274_v33 }
 0x106   :  { %2784 = vmatprep.subr.bf16.mxu0 %v6207_v20  ;;  %2857 = vmatprep.subr.bf16.mxu1 %v6282_v63  ;;  %v6324_v20 = vld [vmem:[%s11438_s3 + $0x1b4] ss:$8 sps:$4 sm:$0xff]  }
 0x109   :  { %2785 = vmatpush1.bf16.msra.mxu0 %v6205_v29  ;;  %2858 = vmatpush1.bf16.msra.mxu1 %v6280_v59  ;;  %v6330_v29 = vld [vmem:[%s11438_s3 + $0x1a4] ss:$8 sps:$4 sm:$0xff]  }
 0x10a   :  { %2786 = vmatprep.subr.bf16.mxu0 %v6210_v30  ;;  %2859 = vmatprep.subr.bf16.mxu1 %v6288_v1  ;;  %v6328_v30 = vld [vmem:[%s11438_s3 + $0x1a0] ss:$8 sps:$4 sm:$0xff]  }
 0x10b   :  { %1383 = vmatmul.mubr.bf16.gmra.mxu0 %v1306_v34  ;;  %1472 = vmatmul.mubr.bf16.gmra.mxu1 %v1306_v34 }
 0x10d   :  { %2787 = vmatpush1.bf16.msra.mxu0 %v6208_v32  ;;  %2860 = vmatpush1.bf16.msra.mxu1 %v6286_v44 }
 0x10e   :  { %2788 = vmatprep.subr.bf16.mxu0 %v6213_v35  ;;  %2861 = vmatprep.subr.bf16.mxu1 %v6294_v11 }
 0x111   :  { %2789 = vmatpush1.bf16.msra.mxu0 %v6211_v36  ;;  %2862 = vmatpush1.bf16.msra.mxu1 %v6292_v61 }
 0x112   :  { %2790 = vmatprep.subr.bf16.mxu0 %v6216_v38  ;;  %2863 = vmatprep.subr.bf16.mxu1 %v6300_v2  ;;  %v6336_v38 = vld [vmem:[%s11438_s3 + $0x194] ss:$8 sps:$4 sm:$0xff]  }
 0x115   :  { %2791 = vmatpush2.bf16.msra.mxu0 %v6214_v41  ;;  %2864 = vmatpush2.bf16.msra.mxu1 %v6298_v22  ;;  %v6334_v41 = vld [vmem:[%s11438_s3 + $0x190] ss:$8 sps:$4 sm:$0xff]  }
 0x116   :  { %2792 = vmatprep.subr.bf16.mxu0 %v6219_v46  ;;  %2865 = vmatprep.subr.bf16.mxu1 %v6306_v10 }
 0x119   :  { %2793 = vmatpush2.bf16.msra.mxu0 %v6217_v28  ;;  %2866 = vmatpush2.bf16.msra.mxu1 %v6304_v52 }
 0x11a   :  { %2794 = vmatprep.subr.bf16.mxu0 %v6222_v50  ;;  %2867 = vmatprep.subr.bf16.mxu1 %v6312_v58 }
 0x11d   :  { %2795 = vmatpush2.bf16.msra.mxu0 %v6220_v53  ;;  %2868 = vmatpush2.bf16.msra.mxu1 %v6310_v0 }
 0x11e   :  { %2796 = vmatprep.subr.bf16.mxu0 %v6225_v57  ;;  %2869 = vmatprep.subr.bf16.mxu1 %v6318_v15 }
 0x121   :  { %2797 = vmatpush2.bf16.msra.mxu0 %v6223_v60  ;;  %2870 = vmatpush2.bf16.msra.mxu1 %v6316_v54  ;;  %v986_v60 = vlaneseq }
 0x122   :  { %2798 = vmatprep.subr.bf16.mxu0 %v6228_v13  ;;  %2871 = vmatprep.subr.bf16.mxu1 %v6324_v20 }
 0x123   :  { %v8021_v13 = vshrl.u32 %v986_v60, 7 }
 0x125   :  { %2799 = vmatpush2.bf16.msra.mxu0 %v6226_v21  ;;  %2872 = vmatpush2.bf16.msra.mxu1 %v6322_v24  ;;  %11529 = vst [vmem:[#allocation2_spill] sm:$0xff] %v8021_v13  ;;  %v11454_v39 = vsub.s32 0, %v8021_v13  ;;  %v1532_v59 = vadd.s32 8, %v8021_v13  ;;  %v1539_v61 = vand.u32 7, %v8021_v13  ;;  %v8053_v58 = vadd.s32 32, %v8021_v13 }
 0x126   :  { %2800 = vmatprep.subr.bf16.mxu0 %v6231_v40  ;;  %2873 = vmatprep.subr.bf16.mxu1 %v6330_v29  ;;  %v984_v40 = vld [vmem:[%s11439_s2] sm:$0x3]  ;;  %v8056_v0 = vadd.s32 40, %v8021_v13  ;;  %v8061_v54 = vadd.s32 48, %v8021_v13 }
 0x127   :  { %v1540_v2 = vand.u32 7, %v1532_v59  ;;  %vm8063_vm6 = vcmp.lt.s32.totalorder %v1539_v61, 7 }
 0x128   :  { %v1544_v59 = vand.u32 7, %v8056_v0 }
 0x129   :  { %2801 = vmatpush2.bf16.msra.mxu0 %v6229_v51  ;;  %2874 = vmatpush2.bf16.msra.mxu1 %v6328_v30  ;;  %v11453_v51 = vsub.s32 1, %v8021_v13  ;;  %v8068_v30 = vadd.s32 56, %v8021_v13  ;;  %vm8073_vm7 = vcmp.lt.s32.totalorder %v1540_v2, 7 }
 0x12a   :  { %2802 = vmatprep.subr.bf16.mxu0 %v6234_v19  ;;  %2875 = vmatprep.subr.bf16.mxu1 %v6336_v38  ;;  %vm8154_vm13 = vcmp.lt.s32.totalorder %v1544_v59, 7  ;;  %vm8401_vm2 = vmpackc.low %vm8073_vm7, %vm8063_vm6 }
 0x12b   :  { %v8049_v22 = vrot.slane %v984_v40, %v11453_v51 }
 0x12d   :  { %2803 = vmatpush2.bf16.msra.mxu0 %v6232_v5  ;;  %2876 = vmatpush2.bf16.msra.mxu1 %v6334_v41  ;;  %v1533_v5 = vadd.s32 16, %v8021_v13 }
 0x12e   :  { %2804 = vmatprep.subr.bf16.mxu0 %v6237_v16  ;;  %2877 = vmatprep.subr.bf16.mxu1 %v6342_v47 }
 0x131   :  { %2805 = vmatpush2.bf16.msra.mxu0 %v6235_v45  ;;  %2878 = vmatpush2.bf16.msra.mxu1 %v6340_v49  ;;  %v8042_v45 = vrot.slane %v984_v40, %v11454_v39  ;;  %v1543_v40 = vand.u32 7, %v8053_v58 }
 0x132   :  { %2920 = vmatprep.subr.bf16.mxu0 %v6240_v48  ;;  %2993 = vmatprep.subr.bf16.mxu1 %v6348_v55 }
 0x133   :  { %vm8138_vm12 = vcmp.lt.s32.totalorder %v1543_v40, 7 }
 0x134   :  { %vm8628_vm5 = vmpackc.low %vm8154_vm13, %vm8138_vm12 }
 0x13b   :  { %v7926_v6 = vpop.f32.mrf.mxu0  ;;  %v7928_v14 = vpop.f32.mrf.mxu1 }
 0x13c   :  { %v725_v44 = vmax.f32 %v7926_v6, %v7928_v14  ;;  %v1541_v6 = vand.u32 7, %v1533_v5  ;;  %v1534_v14 = vadd.s32 24, %v8021_v13 }
 0x13d   :  { %v7936_v37 = vpop.f32.mrf.mxu0  ;;  %v7938_v18 = vpop.f32.mrf.mxu1 }
 0x13e   :  { %v726_v11 = vmax.f32 %v7936_v37, %v7938_v18  ;;  %v1542_v60 = vand.u32 7, %v1534_v14  ;;  %vm8082_vm8 = vcmp.lt.s32.totalorder %v1541_v6, 7 }
 0x13f   :  { %v7940_v31 = vpop.f32.mrf.mxu0  ;;  %v7942_v8 = vpop.f32.mrf.mxu1 }
 0x140   :  { %v727_v37 = vmax.f32 %v7940_v31, %v7942_v8  ;;  %vm8113_vm9 = vcmp.lt.s32.totalorder %v1542_v60, 7 }
 0x141   :  { %v7950_v9 = vpop.f32.mrf.mxu0  ;;  %v7952_v3 = vpop.f32.mrf.mxu1  ;;  %vm8561_vm4 = vmpackc.low %vm8113_vm9, %vm8082_vm8 }
 0x142   :  { %v728_v38 = vmax.f32 %v7950_v9, %v7952_v3 }
 0x143   :  { %v7954_v4 = vpop.f32.mrf.mxu0  ;;  %v7956_v17 = vpop.f32.mrf.mxu1 }
 0x145   :  { %v7964_v25 = vpop.f32.mrf.mxu0  ;;  %v7966_v7 = vpop.f32.mrf.mxu1 }
 0x146   :  { %v730_v61 = vmax.f32 %v7964_v25, %v7966_v7 }
 0x147   :  { %v7968_v26 = vpop.f32.mrf.mxu0  ;;  %v7970_v27 = vpop.f32.mrf.mxu1 }
 0x149   :  { %v7978_v32 = vpop.f32.mrf.mxu0  ;;  %v7980_v34 = vpop.f32.mrf.mxu1 }
 0x14a   :  { %v732_v6 = vmax.f32 %v7978_v32, %v7980_v34 }
 0x14b   :  { %v7982_v35 = vpop.f32.mrf.mxu0  ;;  %v7984_v36 = vpop.f32.mrf.mxu1 }
 0x14d   :  { %v7992_v42 = vpop.f32.mrf.mxu0  ;;  %v7994_v43 = vpop.f32.mrf.mxu1 }
 0x14f   :  { %v7996_v46 = vpop.f32.mrf.mxu0  ;;  %v7998_v28 = vpop.f32.mrf.mxu1 }
 0x150   :  { %v735_v25 = vmax.f32 %v7996_v46, %v7998_v28  ;;  %v6343_v28 = vld [vmem:[%s11438_s3 + $0x440] ss:$8 sps:$4 sm:$0xff]  }
 0x151   :  { %v8006_v50 = vpop.f32.mrf.mxu0  ;;  %v8008_v53 = vpop.f32.mrf.mxu1 }
 0x153   :  { %v8013_v56 = vpop.f32.mrf.mxu0  ;;  %v8015_v57 = vpop.f32.mrf.mxu1 }
 0x155   :  { %v8017_v62 = vpop.f32.mrf.mxu0  ;;  %v8019_v12 = vpop.f32.mrf.mxu1 }
 0x157   :  { %v8023_v21 = vpop.f32.mrf.mxu0  ;;  %v8025_v33 = vpop.f32.mrf.mxu1 }
 0x159   :  { %v8033_v63 = vpop.f32.mrf.mxu0  ;;  %v8035_v19 = vpop.f32.mrf.mxu1 }
 0x163   :  { %v840_v1 = vpop.f32.mrf.mxu0  ;;  %v929_v16 = vpop.f32.mrf.mxu1 }
 0x164   :  { %v879_v48 = vmax.f32 %v725_v44, %v840_v1  ;;  %v1545_v1 = vand.u32 7, %v8061_v54 }
 0x165   :  { %v842_v52 = vpop.f32.mrf.mxu0  ;;  %v931_v10 = vpop.f32.mrf.mxu1 }
 0x166   :  { %v968_v18 = vmax.f32 %v879_v48, %v929_v16  ;;  %v880_v15 = vmax.f32 %v726_v11, %v842_v52  ;;  %v729_v16 = vmax.f32 %v7954_v4, %v7956_v17  ;;  %v1546_v52 = vand.u32 7, %v8068_v30 }
 0x167   :  { %v844_v24 = vpop.f32.mrf.mxu0  ;;  %v933_v29 = vpop.f32.mrf.mxu1  ;;  %v733_v4 = vmax.f32 %v7982_v35, %v7984_v36  ;;  %v734_v17 = vmax.f32 %v7992_v42, %v7994_v43  ;;  %v737_v35 = vmax.f32 %v8013_v56, %v8015_v57  ;;  %vm8176_vm14 = vcmp.lt.s32.totalorder %v1545_v1, 7 }
 0x168   :  { %v996_v41 = vadd.f32 %v8042_v45, %v968_v18  ;;  %v969_v31 = vmax.f32 %v880_v15, %v931_v10  ;;  %v881_v8 = vmax.f32 %v727_v37, %v844_v24  ;;  %v731_v10 = vmax.f32 %v7968_v26, %v7970_v27 }
 0x169   :  { %v846_v49 = vpop.f32.mrf.mxu0  ;;  %v935_v55 = vpop.f32.mrf.mxu1  ;;  %v736_v15 = vmax.f32 %v8006_v50, %v8008_v53  ;;  %vm8223_vm1 = vcmp.lt.s32.totalorder %v1546_v52, 7 }
 0x16a   :  { %v8080_v5 = vadd.f32 %v8049_v22, %v969_v31  ;;  %v970_v44 = vmax.f32 %v881_v8, %v933_v29  ;;  %v882_v9 = vmax.f32 %v728_v38, %v846_v49  ;;  %v1012_v11 = vmax.f32 %v996_v41, 0.0 }
 0x16b   :  { %v850_v48 = vpop.f32.mrf.mxu0  ;;  %v939_v2 = vpop.f32.mrf.mxu1  ;;  %v738_v31 = vmax.f32 %v8017_v62, %v8019_v12  ;;  %v6243_v62 = vld [vmem:[%s11438_s3 + $0x264] ss:$8 sps:$4 sm:$0xff]  }
 0x16c   :  { %v998_v14 = vadd.f32 %v8042_v45, %v970_v44  ;;  %v971_v58 = vmax.f32 %v882_v9, %v935_v55  ;;  %v883_v7 = vmax.f32 %v729_v16, %v850_v48  ;;  %v1013_v26 = vmax.f32 %v8080_v5, 0.0  ;;  %v6271_v5 = vld [vmem:[%s11438_s3 + $0x200] ss:$8 sps:$4 sm:$0xff]  }
 0x16d   :  { %v852_v37 = vpop.f32.mrf.mxu0  ;;  %v941_v18 = vpop.f32.mrf.mxu1  ;;  %v1555_v36 = vsel %vm8063_vm6, %v1012_v11, 0.0 }
 0x16e   :  { %v1014_v27 = vmax.f32 %v998_v14, 0.0  ;;  %v8105_v32 = vadd.f32 %v8049_v22, %v971_v58  ;;  %v884_v34 = vmax.f32 %v730_v61, %v852_v37  ;;  %v972_v42 = vmax.f32 %v883_v7, %v939_v2 }
 0x16f   :  { %v854_v43 = vpop.f32.mrf.mxu0  ;;  %v943_v46 = vpop.f32.mrf.mxu1  ;;  %v1556_v9 = vsel %vm8063_vm6, %v1013_v26, 0.0 }
 0x170   :  { %v1557_v24 = vsel %vm8073_vm7, %v1014_v27, 0.0  ;;  %v8119_v29 = vpack.c.bf16 %v1014_v27, %v1012_v11  ;;  %v11455_v38 = vmax.f32 %v8105_v32, 0.0  ;;  %v973_v41 = vmax.f32 %v884_v34, %v941_v18 }
 0x171   :  { %v8124_v8 = vpack.c.bf16 %v1557_v24, %v1555_v36  ;;  %v1000_v49 = vadd.f32 %v8042_v45, %v972_v42  ;;  %v885_v55 = vmax.f32 %v731_v10, %v854_v43  ;;  %v856_v60 = vpop.f32.mrf.mxu0  ;;  %v945_v44 = vpop.f32.mrf.mxu1  ;;  %v6977_v36 = vld [vmem:[%s11438_s3 + $0x904] ss:$8 sps:$4 sm:$0xff]  }
 0x172   :  { %v1558_v16 = vsel %vm8073_vm7, %v11455_v38, 0.0  ;;  %v1001_v61 = vadd.f32 %v8049_v22, %v973_v41  ;;  %v886_v11 = vmax.f32 %v732_v6, %v856_v60 }
 0x173   :  { %v1605_v48 = vshrl.u32 %v8124_v8, 16  ;;  %v1608_v2 = vshll.u32 %v8124_v8, 16  ;;  %v1572_v10 = vpack.c.bf16 %v1558_v16, %v1556_v9  ;;  %v1016_v14 = vmax.f32 %v1000_v49, 0.0  ;;  %v860_v58 = vpop.f32.mrf.mxu0  ;;  %v949_v7 = vpop.f32.mrf.mxu1 }
 0x174   :  { %v1017_v37 = vmax.f32 %v1001_v61, 0.0  ;;  %v974_v18 = vmax.f32 %v885_v55, %v943_v46  ;;  %v975_v27 = vmax.f32 %v886_v11, %v945_v44  ;;  %v887_v34 = vmax.f32 %v733_v4, %v860_v58 }
 0x175   :  { %v1678_v42 = vrot.slane %v1608_v2, 1  ;;  %v1559_v6 = vsel %vm8082_vm8, %v1016_v14, 0.0  ;;  %v862_v43 = vpop.f32.mrf.mxu0  ;;  %v951_v24 = vpop.f32.mrf.mxu1  ;;  %v1612_v41 = vshrl.u32 %v1572_v10, 16  ;;  %v1615_v49 = vshll.u32 %v1572_v10, 16 }
 0x176   :  { %v1560_v60 = vsel %vm8082_vm8, %v1017_v37, 0.0  ;;  %v1002_v46 = vadd.f32 %v8042_v45, %v974_v18  ;;  %v1003_v40 = vadd.f32 %v8049_v22, %v975_v27  ;;  %v976_v4 = vmax.f32 %v887_v34, %v949_v7 }
 0x177   :  { %v8150_v55 = vor.u32 %v1678_v42, %v1605_v48  ;;  %v888_v44 = vmax.f32 %v734_v17, %v862_v43  ;;  %v864_v9 = vpop.f32.mrf.mxu0  ;;  %v953_v16 = vpop.f32.mrf.mxu1  ;;  %v8158_v11 = vrot.slane %v1612_v41, 7  ;;  %v1682_v10 = vrot.slane %v1615_v49, 1 }
 0x178   :  { %v1018_v58 = vmax.f32 %v1002_v46, 0.0  ;;  %v1019_v51 = vmax.f32 %v1003_v40, 0.0  ;;  %v1004_v18 = vadd.f32 %v8042_v45, %v976_v4  ;;  %v889_v27 = vmax.f32 %v735_v25, %v864_v9  ;;  %v6364_v25 = vld [vmem:[%s11438_s3 + $0x340] ss:$8 sps:$4 sm:$0xff]  }
 0x179   :  { %v977_v7 = vmax.f32 %v888_v44, %v951_v24  ;;  %v866_v34 = vpop.f32.mrf.mxu0  ;;  %v955_v42 = vpop.f32.mrf.mxu1  ;;  %v1617_v17 = vor.u32 %v1615_v49, %v8158_v11  ;;  %v8162_v43 = vrot.slane %v1605_v48, 7  ;;  %v8164_v0 = vor.u32 %v1682_v10, %v1612_v41 }
 0x17a   :  { %v1561_v59 = vsel %vm8113_vm9, %v1018_v58, 0.0  ;;  %v8168_v39 = vpack.c.bf16 %v1018_v58, %v1016_v14  ;;  %v1562_v46 = vsel %vm8113_vm9, %v1019_v51, 0.0  ;;  %v8172_v40 = vpack.c.bf16 %v1019_v51, %v1017_v37 }
 0x17b   :  { %v8180_v48 = vpack.c.bf16 %v1561_v59, %v1559_v6  ;;  %v8182_v24 = vpack.c.bf16 %v1562_v46, %v1560_v60  ;;  %v1020_v41 = vmax.f32 %v1004_v18, 0.0  ;;  %v1005_v49 = vadd.f32 %v8049_v22, %v977_v7  ;;  %v870_v14 = vpop.f32.mrf.mxu0  ;;  %v959_v4 = vpop.f32.mrf.mxu1 }
 0x17c   :  { %v978_v54 = vmax.f32 %v889_v27, %v953_v16  ;;  %v890_v1 = vmax.f32 %v736_v15, %v866_v34  ;;  %v891_v37 = vmax.f32 %v737_v35, %v870_v14  ;;  %v8199_v6 = vsel %vm8187_vm15, 0, %v1617_v17  ;;  %v6367_v27 = vld [vmem:[%s11438_s3 + $0x400] ss:$8 sps:$4 sm:$0xff]  }
 0x17d   :  { %11546 = vst [vmem:[#allocation8_spill] sm:$0xff] %v8199_v6  ;;  %v739_v60 = vmax.f32 %v8023_v21, %v8025_v33  ;;  %v740_v44 = vmax.f32 %v8033_v63, %v8035_v19  ;;  %v1619_v9 = vshrl.u32 %v8180_v48, 16  ;;  %v1627_v16 = vshrl.u32 %v8182_v24, 16  ;;  %2806 = vmatprep.mubr.bf16.mxu0 %v8199_v6  ;;  %v872_v50 = vpop.f32.mrf.mxu0  ;;  %v961_v53 = vpop.f32.mrf.mxu1  ;;  %v6238_v63 = vld [vmem:[%s11438_s3 + $0x270] ss:$8 sps:$4 sm:$0xff]  }
 0x17e   :  { %v1622_v56 = vshll.u32 %v8180_v48, 16  ;;  %v1006_v57 = vadd.f32 %v8042_v45, %v978_v54  ;;  %v979_v15 = vmax.f32 %v890_v1, %v955_v42  ;;  %v980_v35 = vmax.f32 %v891_v37, %v959_v4  ;;  %v6241_v1 = vld [vmem:[%s11438_s3 + $0x260] ss:$8 sps:$4 sm:$0xff]   ;;  %v6261_v48 = vld [vmem:[%s11438_s3 + $0x224] ss:$8 sps:$4 sm:$0xff]  }
 0x17f   :  { %v1563_v21 = vsel %vm8138_vm12, %v1020_v41, 0.0  ;;  %v1021_v33 = vmax.f32 %v1005_v49, 0.0  ;;  %v892_v19 = vmax.f32 %v738_v31, %v872_v50  ;;  %v1610_v10 = vor.u32 %v1608_v2, %v8162_v43  ;;  %v874_v58 = vpop.f32.mrf.mxu0  ;;  %v963_v18 = vpop.f32.mrf.mxu1 }
 0x180   :  { %v1022_v7 = vmax.f32 %v1006_v57, 0.0  ;;  %v1007_v34 = vadd.f32 %v8049_v22, %v979_v15  ;;  %v1008_v42 = vadd.f32 %v8042_v45, %v980_v35  ;;  %v8234_v12 = vrot.slane %v1627_v16, 7  ;;  %v6246_v15 = vld [vmem:[%s11438_s3 + $0x254] ss:$8 sps:$4 sm:$0xff]  }
 0x181   :  { %v8238_v30 = vsel %vm8187_vm15, 0, %v1610_v10  ;;  %v981_v52 = vmax.f32 %v892_v19, %v961_v53  ;;  %v893_v31 = vmax.f32 %v739_v60, %v874_v58  ;;  %v876_v8 = vpop.f32.mrf.mxu0  ;;  %v1630_v2 = vshll.u32 %v8182_v24, 16  ;;  %v965_v60 = vpop.f32.mrf.mxu1 }
 0x182   :  { %11549 = vst [vmem:[#allocation9_spill] sm:$0xff] %v8238_v30  ;;  %v1565_v17 = vsel %vm8154_vm13, %v1022_v7, 0.0  ;;  %v8243_v59 = vpack.c.bf16 %v1022_v7, %v1020_v41  ;;  %v1023_v46 = vmax.f32 %v1007_v34, 0.0  ;;  %v1024_v49 = vmax.f32 %v1008_v42, 0.0  ;;  %2807 = vmatmul.mubr.bf16.vlgmr.msra.gmra.mxu0 %v8238_v30  ;;  %v6301_v30 = vld [vmem:[%s11438_s3 + $0x2b0] ss:$8 sps:$4 sm:$0xff]  }
 0x183   :  { %v8246_v14 = vpack.c.bf16 %v1565_v17, %v1563_v21  ;;  %2921 = vmatpush1.bf16.msra.mxu0 %v6238_v63  ;;  %v1009_v4 = vadd.f32 %v8049_v22, %v981_v52  ;;  %v982_v54 = vmax.f32 %v893_v31, %v963_v18  ;;  %v894_v37 = vmax.f32 %v740_v44, %v876_v8  ;;  %v6249_v17 = vld [vmem:[%s11438_s3 + $0x244] ss:$8 sps:$4 sm:$0xff]  }
 0x184   :  { %v1564_v41 = vsel %vm8138_vm12, %v1021_v33, 0.0  ;;  %v1566_v50 = vsel %vm8154_vm13, %v1023_v46, 0.0  ;;  %v8256_v53 = vpack.c.bf16 %v1023_v46, %v1021_v33  ;;  %2922 = vmatprep.subr.bf16.mxu0 %v6243_v62  ;;  %v1632_v57 = vor.u32 %v1630_v2, %v8234_v12 }
 0x185   :  { %v1680_v35 = vrot.slane %v1622_v56, 1  ;;  %v1635_v21 = vshrl.u32 %v8246_v14, 16  ;;  %v1576_v44 = vpack.c.bf16 %v1566_v50, %v1564_v41  ;;  %v1567_v63 = vsel %vm8176_vm14, %v1024_v49, 0.0 }
 0x186   :  { %v1010_v19 = vadd.f32 %v8042_v45, %v982_v54  ;;  %v983_v10 = vmax.f32 %v894_v37, %v965_v60  ;;  %v8268_v33 = vsel %vm1603_vm10, %v8158_v11, %v1632_v57  ;;  %v8272_v58 = vrot.slane %v1619_v9, 7  ;;  %v6244_v11 = vld [vmem:[%s11438_s3 + $0x250] ss:$8 sps:$4 sm:$0xff]  }
 0x187   :  { %11550 = vst [vmem:[#allocation4_spill] sm:$0xff] %v8268_v33  ;;  %v1638_v18 = vshll.u32 %v8246_v14, 16  ;;  %v1643_v7 = vshrl.u32 %v1576_v44, 16  ;;  %v1025_v34 = vmax.f32 %v1009_v4, 0.0  ;;  %2923 = vmatpush1.bf16.msra.mxu0 %v6241_v1  ;;  %2816 = vmatprep.mubr.bf16.mxu0 %v8268_v33  ;;  %v1646_v42 = vshll.u32 %v1576_v44, 16 }
 0x188   :  { %v1026_v62 = vmax.f32 %v1010_v19, 0.0  ;;  %v1011_v52 = vadd.f32 %v8049_v22, %v983_v10  ;;  %2924 = vmatprep.subr.bf16.mxu0 %v6246_v15  ;;  %v1624_v31 = vor.u32 %v1622_v56, %v8272_v58  ;;  %v1684_v8 = vrot.slane %v1630_v2, 1  ;;  %v6247_v44 = vld [vmem:[%s11438_s3 + $0x240] ss:$8 sps:$4 sm:$0xff]  }
 0x189   :  { %v8284_v46 = vrot.slane %v1643_v7, 7  ;;  %v8286_v14 = vrot.slane %v1635_v21, 7  ;;  %v8290_v4 = vsel %vm76_vm0, %v8150_v55, %v1680_v35  ;;  %v1690_v54 = vrot.slane %v1646_v42, 1 }
 0x18a   :  { %11551 = vst [vmem:[#allocation5_spill] sm:$0xff] %v8290_v4  ;;  %v1569_v1 = vsel %vm8223_vm1, %v1026_v62, 0.0  ;;  %v8294_v37 = vpack.c.bf16 %v1026_v62, %v1024_v49  ;;  %v1027_v56 = vmax.f32 %v1011_v52, 0.0  ;;  %v8298_v2 = vsel %vm1603_vm10, %v8162_v43, %v1624_v31 }
 0x18b   :  { %11552 = vst [vmem:[#allocation6_spill] sm:$0xff] %v8298_v2  ;;  %v1577_v60 = vpack.c.bf16 %v1569_v1, %v1567_v63  ;;  %2817 = vmatmul.mubr.bf16.gmra.mxu0 %v8298_v2  ;;  %v8301_v41 = vpop.f32.mrf.mxu0  ;;  %v8303_v50 = vpop.f32.mrf.mxu1  ;;  %v1648_v55 = vor.u32 %v1646_v42, %v8284_v46  ;;  %v8308_v57 = vsel %vm76_vm0, %v8164_v0, %v1684_v8  ;;  %v1568_v49 = vsel %vm8176_vm14, %v1025_v34, 0.0  ;;  %v6295_v2 = vld [vmem:[%s11438_s3 + $0x2c0] ss:$8 sps:$4 sm:$0xff]  }
 0x18c   :  { %11553 = vst [vmem:[#allocation3_spill] sm:$0xff] %v8308_v57  ;;  %v1570_v43 = vsel %vm8223_vm1, %v1027_v56, 0.0  ;;  %v8314_v15 = vpack.c.bf16 %v1027_v56, %v1025_v34  ;;  %2925 = vmatpush1.bf16.msra.mxu0 %v6244_v11  ;;  %v1689_v63 = vor.u32 %v1684_v8, %v1627_v16  ;;  %v6255_v34 = vld [vmem:[%s11438_s3 + $0x234] ss:$8 sps:$4 sm:$0xff]   ;;  %v1640_v52 = vor.u32 %v1638_v18, %v8286_v14 }
 0x18d   :  { %v1654_v19 = vshll.u32 %v1577_v60, 16  ;;  %v1578_v10 = vpack.c.bf16 %v1570_v43, %v1568_v49  ;;  %2926 = vmatprep.subr.bf16.mxu0 %v6249_v17  ;;  %v8323_v0 = vsel %vm1603_vm10, %v8234_v12, %v1648_v55  ;;  %v8328_v42 = vpop.f32.mrf.mxu0  ;;  %v8330_v62 = vpop.f32.mrf.mxu1  ;;  %v1651_v11 = vshrl.u32 %v1577_v60, 16  ;;  %v6253_v60 = vld [vmem:[%s11438_s3 + $0x230] ss:$8 sps:$4 sm:$0xff]  }
 0x18e   :  { %11554 = vst [vmem:[#allocation10_spill] sm:$0xff] %v8323_v0  ;;  %2826 = vmatprep.mubr.bf16.mxu0 %v8323_v0  ;;  %v8335_v24 = vsel %vm76_vm0, %v1689_v63, %v1690_v54  ;;  %v1686_v16 = vor.u32 %v1680_v35, %v1619_v9  ;;  %v1687_v12 = vrot.slane %v1638_v18, 1  ;;  %v1695_v56 = vor.u32 %v1690_v54, %v1643_v7 }
 0x18f   :  { %11555 = vst [vmem:[#allocation11_spill] sm:$0xff] %v8335_v24  ;;  %v1659_v31 = vshrl.u32 %v1578_v10, 16  ;;  %v8339_v8 = vpop.f32.mrf.mxu0  ;;  %v8341_v17 = vpop.f32.mrf.mxu1  ;;  %v1662_v1 = vshll.u32 %v1578_v10, 16  ;;  %v1693_v43 = vrot.slane %v1654_v19, 1  ;;  %v8358_v54 = vsel %vm1603_vm10, %v8272_v58, %v1640_v52  ;;  %v6259_v58 = vld [vmem:[%s11438_s3 + $0x220] ss:$8 sps:$4 sm:$0xff]  }
 0x190   :  { %2927 = vmatpush1.bf16.msra.mxu0 %v6247_v44  ;;  %v8347_v55 = vsel %vm76_vm0, %v1686_v16, %v1687_v12  ;;  %v1692_v49 = vor.u32 %v1687_v12, %v1635_v21  ;;  %11557 = vst [vmem:[#allocation13_spill] sm:$0xff] %v8358_v54  ;;  %v1653_v44 = vrot.slane %v1651_v11, 7 }
 0x191   :  { %11556 = vst [vmem:[#allocation12_spill] sm:$0xff] %v8347_v55  ;;  %2928 = vmatprep.subr.bf16.mxu0 %v6255_v34  ;;  %v8352_v9 = vpop.f32.mrf.mxu0  ;;  %v8354_v35 = vpop.f32.mrf.mxu1  ;;  %v1661_v18 = vrot.slane %v1659_v31, 7  ;;  %v1696_v7 = vrot.slane %v1662_v1, 1  ;;  %v8363_v21 = vor.u32 %v1693_v43, %v1651_v11  ;;  %v6267_v11 = vld [vmem:[%s11438_s3 + $0x214] ss:$8 sps:$4 sm:$0xff]  }
 0x192   :  { %v8361_v63 = vsel %vm76_vm0, %v1692_v49, %v1693_v43 }
 0x193   :  { %11558 = vst [vmem:[#allocation14_spill] sm:$0xff] %v8361_v63  ;;  %11559 = vst [vmem:[#allocation15_spill] sm:$0xff] %v8363_v21  ;;  %2827 = vmatmul.mubr.bf16.gmra.mxu0 %v8358_v54  ;;  %v8366_v10 = vpop.f32.mrf.mxu0  ;;  %v8368_v34 = vpop.f32.mrf.mxu1  ;;  %v1664_v16 = vor.u32 %v1662_v1, %v1661_v18  ;;  %v8371_v12 = vsel %vm76_vm0, %v1695_v56, %v1696_v7  ;;  %v8373_v38 = vor.u32 %v1696_v7, %v1659_v31  ;;  %v6289_v54 = vld [vmem:[%s11438_s3 + $0x2d0] ss:$8 sps:$4 sm:$0xff]   ;;  %v6309_v21 = vld [vmem:[%s11438_s3 + $0x2a4] ss:$8 sps:$4 sm:$0xff]  }
 0x194   :  { %11560 = vst [vmem:[#allocation16_spill] sm:$0xff] %v8371_v12  ;;  %2929 = vmatpush1.bf16.msra.mxu0 %v6253_v60  ;;  %v1656_v31 = vor.u32 %v1654_v19, %v1653_v44  ;;  %v6273_v19 = vld [vmem:[%s11438_s3 + $0x204] ss:$8 sps:$4 sm:$0xff]   ;;  %v11565_v7 = vmax.f32 %v8105_v32, 0.0  ;;  %v6307_v63 = vld [vmem:[%s11438_s3 + $0x2a0] ss:$8 sps:$4 sm:$0xff]  }
 0x195   :  { %11561 = vst [vmem:[#allocation17_spill] sm:$0xff] %v8373_v38  ;;  %2930 = vmatprep.subr.bf16.mxu0 %v6261_v48  ;;  %v8380_v52 = vsel %vm1603_vm10, %v8284_v46, %v1664_v16  ;;  %v8385_v1 = vpop.f32.mrf.mxu0  ;;  %v8387_v56 = vpop.f32.mrf.mxu1  ;;  %v6265_v46 = vld [vmem:[%s11438_s3 + $0x210] ss:$8 sps:$4 sm:$0xff]  }
 0x196   :  { %11562 = vst [vmem:[#allocation18_spill] sm:$0xff] %v8380_v52  ;;  %2836 = vmatprep.mubr.bf16.mxu0 %v8380_v52  ;;  %v8416_v44 = vpack.c.bf16 %v11565_v7, %v1013_v26  ;;  %v8420_v16 = vsel %vm1603_vm10, %v8286_v14, %v1656_v31  ;;  %v6279_v26 = vld [vmem:[%s11438_s3 + $0x2f4] ss:$8 sps:$4 sm:$0xff]   ;;  %v6277_v7 = vld [vmem:[%s11438_s3 + $0x2f0] ss:$8 sps:$4 sm:$0xff]  }
 0x197   :  { %v8390_v60 = vpop.f32.mrf.mxu0  ;;  %v8392_v49 = vpop.f32.mrf.mxu1  ;;  %11567 = vst [vmem:[#allocation20_spill] sm:$0xff] %v8420_v16 }
 0x198   :  { %2931 = vmatpush1.bf16.msra.mxu0 %v6259_v58  ;;  %11566 = vst [vmem:[#allocation19_spill] sm:$0xff] %v8416_v44 }
 0x199   :  { %2932 = vmatprep.subr.bf16.mxu0 %v6267_v11  ;;  %v8408_v48 = vpop.f32.mrf.mxu0  ;;  %v8410_v18 = vpop.f32.mrf.mxu1 }
 0x19b   :  { %2837 = vmatmul.mubr.bf16.gmra.mxu0 %v8420_v16  ;;  %v8423_v58 = vpop.f32.mrf.mxu0  ;;  %v8425_v11 = vpop.f32.mrf.mxu1  ;;  %v6283_v16 = vld [vmem:[%s11438_s3 + $0x2e0] ss:$8 sps:$4 sm:$0xff]  }
 0x19c   :  { %2933 = vmatpush1.bf16.msra.mxu0 %v6265_v46  ;;  %5601 = vmatprep.mubr.msk.bf16.mxu0 %vm8401_vm2, %v8416_v44 }
 0x19d   :  { %2934 = vmatprep.subr.bf16.mxu0 %v6273_v19  ;;  %v8436_v32 = vpop.f32.mrf.mxu0  ;;  %v8438_v14 = vpop.f32.mrf.mxu1  ;;  %v6285_v19 = vld [vmem:[%s11438_s3 + $0x2e4] ss:$8 sps:$4 sm:$0xff]  }
 0x19f   :  { %v8440_v31 = vpop.f32.mrf.mxu0  ;;  %v8442_v46 = vpop.f32.mrf.mxu1 }
 0x1a0   :  { %2935 = vmatpush1.bf16.msra.mxu0 %v6271_v5 }
 0x1a1   :  { %2936 = vmatprep.subr.bf16.mxu0 %v6279_v26  ;;  %v8450_v13 = vpop.f32.mrf.mxu0  ;;  %v8452_v44 = vpop.f32.mrf.mxu1  ;;  %v6291_v26 = vld [vmem:[%s11438_s3 + $0x2d4] ss:$8 sps:$4 sm:$0xff]  }
 0x1a3   :  { %v8457_v5 = vpop.f32.mrf.mxu0  ;;  %v8459_v52 = vpop.f32.mrf.mxu1 }
 0x1a4   :  { %2937 = vmatpush2.bf16.msra.mxu0 %v6277_v7 }
 0x1a5   :  { %2938 = vmatprep.subr.bf16.mxu0 %v6285_v19  ;;  %v8467_v7 = vpop.f32.mrf.mxu0  ;;  %v8469_v0 = vpop.f32.mrf.mxu1  ;;  %v6297_v19 = vld [vmem:[%s11438_s3 + $0x2c4] ss:$8 sps:$4 sm:$0xff]  }
 0x1a7   :  { %v8477_v33 = vpop.f32.mrf.mxu0 }
 0x1a8   :  { %2939 = vmatpush2.bf16.msra.mxu0 %v6283_v16  ;;  %v8479_v16 = vpop.f32.mrf.mxu1 }
 0x1a9   :  { %2940 = vmatprep.subr.bf16.mxu0 %v6291_v26  ;;  %v6303_v26 = vld [vmem:[%s11438_s3 + $0x2b4] ss:$8 sps:$4 sm:$0xff]   ;;  %v8487_v6 = vpop.f32.mrf.mxu0 }
 0x1ac   :  { %2941 = vmatpush2.bf16.msra.mxu0 %v6289_v54  ;;  %v8489_v54 = vpop.f32.mrf.mxu1 }
 0x1ad   :  { %2942 = vmatprep.subr.bf16.mxu0 %v6297_v19  ;;  %v1239_v19 = vmax.f32 %v8301_v41, %v8303_v50  ;;  %v1241_v41 = vmax.f32 %v8339_v8, %v8341_v17 }
 0x1b0   :  { %2943 = vmatpush2.bf16.msra.mxu0 %v6295_v2  ;;  %v1240_v2 = vmax.f32 %v8328_v42, %v8330_v62  ;;  %v6313_v62 = vld [vmem:[%s11438_s3 + $0x290] ss:$8 sps:$4 sm:$0xff]  }
 0x1b1   :  { %2944 = vmatprep.subr.bf16.mxu0 %v6303_v26  ;;  %v6315_v26 = vld [vmem:[%s11438_s3 + $0x294] ss:$8 sps:$4 sm:$0xff]  }
 0x1b3   :  { %v1354_v23 = vpop.f32.mrf.mxu0  ;;  %v1443_v38 = vpop.f32.mrf.mxu1 }
 0x1b4   :  { %2945 = vmatpush2.bf16.msra.mxu0 %v6301_v30  ;;  %v1393_v12 = vmax.f32 %v1239_v19, %v1354_v23  ;;  %v1242_v30 = vmax.f32 %v8352_v9, %v8354_v35 }
 0x1b5   :  { %2946 = vmatprep.subr.bf16.mxu0 %v6309_v21  ;;  %v1356_v55 = vpop.f32.mrf.mxu0  ;;  %v1445_v24 = vpop.f32.mrf.mxu1 }
 0x1b6   :  { %v1482_v50 = vmax.f32 %v1393_v12, %v1443_v38  ;;  %v1394_v4 = vmax.f32 %v1240_v2, %v1356_v55  ;;  %v6321_v38 = vld [vmem:[%s11438_s3 + $0x284] ss:$8 sps:$4 sm:$0xff]   ;;  %v1244_v12 = vmax.f32 %v8385_v1, %v8387_v56  ;;  %v1245_v2 = vmax.f32 %v8390_v60, %v8392_v49  ;;  %v6327_v49 = vld [vmem:[%s11438_s3 + $0x474] ss:$8 sps:$4 sm:$0xff]  }
 0x1b7   :  { %v1358_v57 = vpop.f32.mrf.mxu0  ;;  %v1447_v42 = vpop.f32.mrf.mxu1  ;;  %v1248_v1 = vmax.f32 %v8436_v32, %v8438_v14  ;;  %v1249_v56 = vmax.f32 %v8440_v31, %v8442_v46  ;;  %v1251_v32 = vmax.f32 %v8457_v5, %v8459_v52 }
 0x1b8   :  { %2947 = vmatpush2.bf16.msra.mxu0 %v6307_v63  ;;  %v1498_v23 = vadd.f32 %v1482_v50, %v8042_v45  ;;  %v1483_v21 = vmax.f32 %v1394_v4, %v1445_v24  ;;  %v1395_v19 = vmax.f32 %v1241_v41, %v1358_v57  ;;  %v1243_v63 = vmax.f32 %v8366_v10, %v8368_v34  ;;  %v6319_v50 = vld [vmem:[%s11438_s3 + $0x280] ss:$8 sps:$4 sm:$0xff]  }
 0x1b9   :  { %2948 = vmatprep.subr.bf16.mxu0 %v6315_v26  ;;  %v1360_v8 = vpop.f32.mrf.mxu0  ;;  %v1449_v17 = vpop.f32.mrf.mxu1  ;;  %v1246_v26 = vmax.f32 %v8408_v48, %v8410_v18  ;;  %v1247_v34 = vmax.f32 %v8423_v58, %v8425_v11  ;;  %v1250_v11 = vmax.f32 %v8450_v13, %v8452_v44 }
 0x1ba   :  { %v8516_v55 = vadd.f32 %v1483_v21, %v8049_v22  ;;  %v1484_v9 = vmax.f32 %v1395_v19, %v1447_v42  ;;  %v1396_v35 = vmax.f32 %v1242_v30, %v1360_v8  ;;  %v1514_v4 = vmax.f32 %v1498_v23, 0.0 }
 0x1bb   :  { %v1364_v57 = vpop.f32.mrf.mxu0  ;;  %v1453_v24 = vpop.f32.mrf.mxu1 }
 0x1bc   :  { %2949 = vmatpush2.bf16.msra.mxu0 %v6313_v62  ;;  %v1500_v41 = vadd.f32 %v1484_v9, %v8042_v45  ;;  %v1485_v10 = vmax.f32 %v1396_v35, %v1449_v17  ;;  %v1397_v60 = vmax.f32 %v1243_v63, %v1364_v57  ;;  %v11475_v42 = vmax.f32 %v8516_v55, 0.0  ;;  %v6325_v9 = vld [vmem:[%s11438_s3 + $0x470] ss:$8 sps:$4 sm:$0xff]  }
 0x1bd   :  { %2950 = vmatprep.subr.bf16.mxu0 %v6321_v38  ;;  %v1366_v48 = vpop.f32.mrf.mxu0  ;;  %v1455_v18 = vpop.f32.mrf.mxu1  ;;  %v1579_v14 = vsel %vm8063_vm6, %v1514_v4, 0.0 }
 0x1be   :  { %v1516_v30 = vmax.f32 %v1500_v41, 0.0  ;;  %v8541_v23 = vadd.f32 %v1485_v10, %v8049_v22  ;;  %v1398_v58 = vmax.f32 %v1244_v12, %v1366_v48  ;;  %v1486_v62 = vmax.f32 %v1397_v60, %v1453_v24 }
 0x1bf   :  { %v1368_v21 = vpop.f32.mrf.mxu0  ;;  %v1457_v19 = vpop.f32.mrf.mxu1  ;;  %v1580_v10 = vsel %vm8063_vm6, %v11475_v42, 0.0  ;;  %vm8712_vm6 = vmpackc.low %vm8223_vm1, %vm8176_vm14 }
 0x1c0   :  { %v1581_v38 = vsel %vm8073_vm7, %v1516_v30, 0.0  ;;  %v8551_v8 = vpack.c.bf16 %v1516_v30, %v1514_v4  ;;  %v11474_v17 = vmax.f32 %v8541_v23, 0.0  ;;  %2951 = vmatpush2.bf16.msra.mxu0 %v6319_v50  ;;  %v1399_v35 = vmax.f32 %v1245_v2, %v1368_v21  ;;  %v6333_v2 = vld [vmem:[%s11438_s3 + $0x464] ss:$8 sps:$4 sm:$0xff]  }
 0x1c1   :  { %v8567_v4 = vpack.c.bf16 %v1581_v38, %v1579_v14  ;;  %3066 = vmatprep.subr.bf16.mxu0 %v6327_v49  ;;  %v1502_v57 = vadd.f32 %v1486_v62, %v8042_v45  ;;  %v1487_v24 = vmax.f32 %v1398_v58, %v1455_v18  ;;  %v1370_v41 = vpop.f32.mrf.mxu0  ;;  %v1459_v50 = vpop.f32.mrf.mxu1 }
 0x1c2   :  { %11568 = vst [vmem:[#allocation21_spill] sm:$0xff] %v8551_v8  ;;  %v1582_v60 = vsel %vm8073_vm7, %v11474_v17, 0.0  ;;  %v1400_v49 = vmax.f32 %v1246_v26, %v1370_v41  ;;  %v1488_v48 = vmax.f32 %v1399_v35, %v1457_v19  ;;  %v6331_v26 = vld [vmem:[%s11438_s3 + $0x460] ss:$8 sps:$4 sm:$0xff]  }
 0x1c3   :  { %v11476_v30 = vshll.u32 %v8567_v4, 16  ;;  %v8584_v58 = vpack.c.bf16 %v1582_v60, %v1580_v10  ;;  %5604 = vmatmul.mubr.msk.bf16.vlgmr.msra.gmra.mxu0 %vm8401_vm2, %v8119_v29  ;;  %v1518_v20 = vmax.f32 %v1502_v57, 0.0  ;;  %v1374_v14 = vpop.f32.mrf.mxu0  ;;  %v1463_v62 = vpop.f32.mrf.mxu1  ;;  %v1503_v47 = vadd.f32 %v1487_v24, %v8049_v22 }
 0x1c4   :  { %5607 = vmatprep.mubr.msk.bf16.mxu0 %vm8561_vm4, %v8172_v40  ;;  %3067 = vmatpush1.bf16.msra.mxu0 %v6325_v9  ;;  %v1504_v21 = vadd.f32 %v1488_v48, %v8042_v45  ;;  %v1401_v19 = vmax.f32 %v1247_v34, %v1374_v14  ;;  %v1711_v38 = vshrl.u32 %v8567_v4, 16  ;;  %v1489_v41 = vmax.f32 %v1400_v49, %v1459_v50  ;;  %v6339_v9 = vld [vmem:[%s11438_s3 + $0x454] ss:$8 sps:$4 sm:$0xff]  }
 0x1c5   :  { %v1782_v35 = vrot.slane %v11476_v30, 1  ;;  %v11477_v57 = vshrl.u32 %v8584_v58, 16  ;;  %3068 = vmatprep.subr.bf16.mxu0 %v6333_v2  ;;  %v1376_v24 = vpop.f32.mrf.mxu0  ;;  %v1465_v10 = vpop.f32.mrf.mxu1  ;;  %v1583_v60 = vsel %vm8082_vm8, %v1518_v20, 0.0  ;;  %v1519_v42 = vmax.f32 %v1503_v47, 0.0 }
 0x1c6   :  { %v1520_v48 = vmax.f32 %v1504_v21, 0.0  ;;  %v1402_v34 = vmax.f32 %v1248_v1, %v1376_v24  ;;  %v1490_v14 = vmax.f32 %v1401_v19, %v1463_v62  ;;  %v1505_v18 = vadd.f32 %v1489_v41, %v8049_v22  ;;  %v6337_v1 = vld [vmem:[%s11438_s3 + $0x450] ss:$8 sps:$4 sm:$0xff]   ;;  %v6345_v41 = vld [vmem:[%s11438_s3 + $0x444] ss:$8 sps:$4 sm:$0xff]  }
 0x1c7   :  { %v8606_v17 = vor.u32 %v1782_v35, %v1711_v38  ;;  %v1378_v30 = vpop.f32.mrf.mxu0  ;;  %v1467_v2 = vpop.f32.mrf.mxu1  ;;  %v8611_v50 = vrot.slane %v11477_v57, 7  ;;  %v1721_v47 = vshll.u32 %v8584_v58, 16  ;;  %v1584_v46 = vsel %vm8082_vm8, %v1519_v42, 0.0  ;;  %v6973_v21 = vld [vmem:[%s11438_s3 + $0x924] ss:$8 sps:$4 sm:$0xff]  }
 0x1c8   :  { %v1585_v49 = vsel %vm8113_vm9, %v1520_v48, 0.0  ;;  %v8615_v12 = vpack.c.bf16 %v1520_v48, %v1518_v20  ;;  %3069 = vmatpush1.bf16.msra.mxu0 %v6331_v26  ;;  %v8621_v62 = vadd.f32 %v1490_v14, %v8042_v45  ;;  %v1521_v26 = vmax.f32 %v1505_v18, 0.0 }
 0x1c9   :  { %v8632_v20 = vpack.c.bf16 %v1585_v49, %v1583_v60  ;;  %3070 = vmatprep.subr.bf16.mxu0 %v6339_v9  ;;  %v1403_v19 = vmax.f32 %v1249_v56, %v1378_v30  ;;  %v1491_v35 = vmax.f32 %v1402_v34, %v1465_v10  ;;  %v1380_v24 = vpop.f32.mrf.mxu0  ;;  %v1469_v48 = vpop.f32.mrf.mxu1  ;;  %v1254_v14 = vmax.f32 %v8487_v6, %v8489_v54  ;;  %v6351_v34 = vld [vmem:[%s11438_s3 + $0x434] ss:$8 sps:$4 sm:$0xff]  }
 0x1ca   :  { %11571 = vst [vmem:[#allocation22_spill] sm:$0xff] %v8615_v12  ;;  %v1522_v57 = vmax.f32 %v8621_v62, 0.0  ;;  %v1404_v18 = vmax.f32 %v1250_v11, %v1380_v24  ;;  %v1723_v31 = vor.u32 %v1721_v47, %v8611_v50  ;;  %v1586_v56 = vsel %vm8113_vm9, %v1521_v26, 0.0 }
 0x1cb   :  { %v8653_v30 = vpack.c.bf16 %v1521_v26, %v1519_v42  ;;  %5610 = vmatmul.mubr.msk.bf16.gmra.mxu0 %vm8561_vm4, %v8168_v39  ;;  %v1384_v6 = vpop.f32.mrf.mxu0  ;;  %v1473_v54 = vpop.f32.mrf.mxu1  ;;  %v8658_v13 = vrot.slane %v1711_v38, 7  ;;  %v1725_v44 = vshrl.u32 %v8632_v20, 16  ;;  %v8661_v11 = vpack.c.bf16 %v1586_v56, %v1584_v46 }
 0x1cc   :  { %5613 = vmatprep.mubr.msk.bf16.mxu0 %vm8628_vm5, %v8256_v53  ;;  %3071 = vmatpush1.bf16.msra.mxu0 %v6337_v1  ;;  %v1507_v3 = vadd.f32 %v1491_v35, %v8049_v22  ;;  %v1492_v42 = vmax.f32 %v1403_v19, %v1467_v2  ;;  %v1728_v9 = vshll.u32 %v8632_v20, 16  ;;  %v1405_v38 = vmax.f32 %v1251_v32, %v1384_v6  ;;  %v6346_v32 = vld [vmem:[%s11438_s3 + $0x370] ss:$8 sps:$4 sm:$0xff]  }
 0x1cd   :  { %11574 = vst [vmem:[#allocation23_spill] sm:$0xff] %v8653_v30  ;;  %3072 = vmatprep.subr.bf16.mxu0 %v6345_v41  ;;  %v1493_v10 = vmax.f32 %v1404_v18, %v1469_v48  ;;  %v8676_v60 = vsel %vm8187_vm15, 0, %v1723_v31  ;;  %v1386_v49 = vpop.f32.mrf.mxu0  ;;  %v1475_v1 = vpop.f32.mrf.mxu1  ;;  %v1733_v2 = vshrl.u32 %v8661_v11, 16  ;;  %v1587_v62 = vsel %vm8138_vm12, %v1522_v57, 0.0  ;;  %v6349_v6 = vld [vmem:[%s11438_s3 + $0x430] ss:$8 sps:$4 sm:$0xff]  }
 0x1ce   :  { %v1523_v26 = vmax.f32 %v1507_v3, 0.0  ;;  %v1508_v52 = vadd.f32 %v1492_v42, %v8042_v45  ;;  %2879 = vmatprep.mubr.bf16.mxu1 %v8676_v60  ;;  %v11575_v19 = vmax.f32 %v8467_v7, %v8469_v0  ;;  %v1494_v41 = vmax.f32 %v1405_v38, %v1473_v54  ;;  %v6357_v42 = vld [vmem:[%s11438_s3 + $0x424] ss:$8 sps:$4 sm:$0xff]  }
 0x1cf   :  { %v1509_v5 = vadd.f32 %v1493_v10, %v8049_v22  ;;  %v11576_v24 = vshll.u32 %v8567_v4, 16  ;;  %v1388_v18 = vpop.f32.mrf.mxu0  ;;  %v1477_v31 = vpop.f32.mrf.mxu1  ;;  %v11577_v0 = vmax.f32 %v8477_v33, %v8479_v16  ;;  %v8706_v54 = vrot.slane %v1733_v2, 7 }
 0x1d0   :  { %v1406_v35 = vmax.f32 %v11575_v19, %v1386_v49  ;;  %v1588_v46 = vsel %vm8138_vm12, %v1523_v26, 0.0  ;;  %v1524_v56 = vmax.f32 %v1508_v52, 0.0  ;;  %3073 = vmatpush1.bf16.msra.mxu0 %v6343_v28  ;;  %v1510_v3 = vadd.f32 %v1494_v41, %v8042_v45  ;;  %v6354_v28 = vld [vmem:[%s11438_s3 + $0x364] ss:$8 sps:$4 sm:$0xff]  }
 0x1d1   :  { %v1716_v48 = vor.u32 %v11576_v24, %v8658_v13  ;;  %v1407_v7 = vmax.f32 %v11577_v0, %v1388_v18  ;;  %v1525_v4 = vmax.f32 %v1509_v5, 0.0  ;;  %3074 = vmatprep.subr.bf16.mxu0 %v6351_v34  ;;  %v1390_v38 = vpop.f32.mrf.mxu0  ;;  %v1479_v52 = vpop.f32.mrf.mxu1  ;;  %v8759_v41 = vrot.slane %v1725_v44, 7 }
 0x1d2   :  { %v1495_v16 = vmax.f32 %v1406_v35, %v1475_v1  ;;  %v1589_v10 = vsel %vm8154_vm13, %v1524_v56, 0.0  ;;  %v8729_v34 = vpack.c.bf16 %v1524_v56, %v1522_v57  ;;  %v1408_v51 = vmax.f32 %v1254_v14, %v1390_v38  ;;  %v6352_v57 = vld [vmem:[%s11438_s3 + $0x360] ss:$8 sps:$4 sm:$0xff]  }
 0x1d3   :  { %v8719_v33 = vsel %vm8187_vm15, 0, %v1716_v48  ;;  %v1496_v49 = vmax.f32 %v1407_v7, %v1477_v31  ;;  %v8732_v1 = vpack.c.bf16 %v1589_v10, %v1587_v62  ;;  %v1590_v5 = vsel %vm8154_vm13, %v1525_v4, 0.0  ;;  %5616 = vmatmul.mubr.msk.bf16.gmra.mxu0 %vm8628_vm5, %v8243_v59  ;;  %v6355_v62 = vld [vmem:[%s11438_s3 + $0x420] ss:$8 sps:$4 sm:$0xff]  }
 0x1d4   :  { %11580 = vst [vmem:[#allocation24_spill] sm:$0xff] %v8729_v34  ;;  %2880 = vmatmul.mubr.bf16.vlgmr.msra.gmra.mxu1 %v8719_v33  ;;  %v8736_v19 = vpack.c.bf16 %v1525_v4, %v1523_v26  ;;  %v1526_v35 = vmax.f32 %v1510_v3, 0.0  ;;  %v8744_v14 = vpack.c.bf16 %v1590_v5, %v1588_v46  ;;  %5619 = vmatprep.mubr.msk.bf16.mxu0 %vm8712_vm6, %v8314_v15  ;;  %v1784_v24 = vrot.slane %v1728_v9, 1 }
 0x1d5   :  { %2994 = vmatpush1.bf16.msra.mxu1 %v6346_v32  ;;  %3075 = vmatpush1.bf16.msra.mxu0 %v6349_v6  ;;  %v1511_v61 = vadd.f32 %v1495_v16, %v8049_v22  ;;  %v1512_v26 = vadd.f32 %v1496_v49, %v8042_v45  ;;  %v6360_v32 = vld [vmem:[%s11438_s3 + $0x354] ss:$8 sps:$4 sm:$0xff]   ;;  %v1736_v48 = vshll.u32 %v8661_v11, 16  ;;  %v1741_v18 = vshrl.u32 %v8732_v1, 16  ;;  %v6358_v16 = vld [vmem:[%s11438_s3 + $0x350] ss:$8 sps:$4 sm:$0xff]  }
 0x1d6   :  { %11581 = vst [vmem:[#allocation25_spill] sm:$0xff] %v8736_v19  ;;  %2995 = vmatprep.subr.bf16.mxu1 %v6354_v28  ;;  %3076 = vmatprep.subr.bf16.mxu0 %v6357_v42  ;;  %v1497_v31 = vmax.f32 %v1408_v51, %v1479_v52  ;;  %v6363_v45 = vld [vmem:[%s11438_s3 + $0x414] ss:$8 sps:$4 sm:$0xff]   ;;  %v1749_v46 = vshrl.u32 %v8744_v14, 16  ;;  %v1752_v56 = vshll.u32 %v8744_v14, 16  ;;  %v1591_v6 = vsel %vm8176_vm14, %v1526_v35, 0.0 }
 0x1d7   :  { %v1528_v0 = vmax.f32 %v1512_v26, 0.0  ;;  %v1527_v7 = vmax.f32 %v1511_v61, 0.0  ;;  %v1738_v3 = vor.u32 %v1736_v48, %v8706_v54  ;;  %v1730_v28 = vor.u32 %v1728_v9, %v8759_v41  ;;  %v6369_v61 = vld [vmem:[%s11438_s3 + $0x404] ss:$8 sps:$4 sm:$0xff]   ;;  %v6373_v11 = vld [vmem:[%s11438_s3 + $0x4f0] ss:$8 sps:$4 sm:$0xff]  }
 0x1d8   :  { %v1513_v4 = vadd.f32 %v1497_v31, %v8049_v22  ;;  %v6361_v22 = vld [vmem:[%s11438_s3 + $0x410] ss:$8 sps:$4 sm:$0xff]   ;;  %v8789_v10 = vrot.slane %v1749_v46, 7  ;;  %v8793_v51 = vrot.slane %v1741_v18, 7  ;;  %v1744_v9 = vshll.u32 %v8732_v1, 16 }
 0x1d9   :  { %2996 = vmatpush1.bf16.msra.mxu1 %v6352_v57  ;;  %v1593_v42 = vsel %vm8223_vm1, %v1528_v0, 0.0  ;;  %v8782_v38 = vpack.c.bf16 %v1528_v0, %v1526_v35  ;;  %3077 = vmatpush1.bf16.msra.mxu0 %v6355_v62  ;;  %v8800_v5 = vsel %vm1603_vm10, %v8611_v50, %v1738_v3  ;;  %v6366_v35 = vld [vmem:[%s11438_s3 + $0x344] ss:$8 sps:$4 sm:$0xff]   ;;  %v8808_v57 = vsel %vm1603_vm10, %v8658_v13, %v1730_v28  ;;  %v6375_v3 = vld [vmem:[%s11438_s3 + $0x4f4] ss:$8 sps:$4 sm:$0xff]  }
 0x1da   :  { %2997 = vmatprep.subr.bf16.mxu1 %v6360_v32  ;;  %v8796_v49 = vpack.c.bf16 %v1593_v42, %v1591_v6  ;;  %v1529_v52 = vmax.f32 %v1513_v4, 0.0  ;;  %3078 = vmatprep.subr.bf16.mxu0 %v6363_v45  ;;  %v1754_v62 = vor.u32 %v1752_v56, %v8789_v10  ;;  %v1786_v50 = vrot.slane %v1721_v47, 1  ;;  %v6372_v4 = vld [vmem:[%s11438_s3 + $0x334] ss:$8 sps:$4 sm:$0xff]   ;;  %v6379_v14 = vld [vmem:[%s11438_s3 + $0x4e0] ss:$8 sps:$4 sm:$0xff]  }
 0x1db   :  { %11582 = vst [vmem:[#allocation26_spill] sm:$0xff] %v8782_v38  ;;  %2889 = vmatprep.mubr.bf16.mxu1 %v8800_v5  ;;  %v1788_v26 = vrot.slane %v1736_v48, 1  ;;  %v1592_v32 = vsel %vm8176_vm14, %v1527_v7, 0.0  ;;  %5622 = vmatmul.mubr.msk.bf16.gmra.mxu0 %vm8712_vm6, %v8294_v37  ;;  %v1746_v48 = vor.u32 %v1744_v9, %v8793_v51 }
 0x1dc   :  { %v1594_v31 = vsel %vm8223_vm1, %v1529_v52, 0.0  ;;  %v8820_v45 = vpack.c.bf16 %v1529_v52, %v1527_v7  ;;  %2890 = vmatmul.mubr.bf16.gmra.mxu1 %v8808_v57  ;;  %v1760_v13 = vshll.u32 %v8796_v49, 16  ;;  %v8835_v47 = vsel %vm1603_vm10, %v8706_v54, %v1754_v62  ;;  %v11585_v7 = vld [vmem:[#allocation3_spill] sm:$0xff] }
 0x1dd   :  { %v1602_v6 = vpack.c.bf16 %v1594_v31, %v1592_v32  ;;  %2998 = vmatpush1.bf16.msra.mxu1 %v6358_v16  ;;  %3079 = vmatpush1.bf16.msra.mxu0 %v6361_v22  ;;  %11584 = vst [vmem:[#allocation28_spill] sm:$0xff] %v8835_v47  ;;  %v1757_v0 = vshrl.u32 %v8796_v49, 16  ;;  %v11586_v16 = vshrl.u32 %v8584_v58, 16  ;;  %v8850_v54 = vsel %vm76_vm0, %v8606_v17, %v1784_v24  ;;  %v6370_v58 = vld [vmem:[%s11438_s3 + $0x330] ss:$8 sps:$4 sm:$0xff]  }
 0x1de   :  { %11583 = vst [vmem:[#allocation27_spill] sm:$0xff] %v8820_v45  ;;  %3098 = vmatprep.mubr.bf16.mxu0 %v11585_v7  ;;  %2999 = vmatprep.subr.bf16.mxu1 %v6366_v35  ;;  %11587 = vst [vmem:[#allocation29_spill] sm:$0xff] %v8850_v54  ;;  %v1793_v42 = vor.u32 %v1788_v26, %v1733_v2  ;;  %v1790_v52 = vor.u32 %v1784_v24, %v1725_v44  ;;  %v1794_v17 = vrot.slane %v1752_v56, 1  ;;  %v6378_v44 = vld [vmem:[%s11438_s3 + $0x324] ss:$8 sps:$4 sm:$0xff]  }
 0x1df   :  { %v1787_v28 = vor.u32 %v1786_v50, %v11586_v16  ;;  %v1765_v22 = vshrl.u32 %v1602_v6, 16  ;;  %v1768_v49 = vshll.u32 %v1602_v6, 16  ;;  %3080 = vmatprep.subr.bf16.mxu0 %v6369_v61  ;;  %2899 = vmatprep.mubr.bf16.mxu1 %v8835_v47  ;;  %v1791_v62 = vrot.slane %v1744_v9, 1  ;;  %v6381_v24 = vld [vmem:[%s11438_s3 + $0x4e4] ss:$8 sps:$4 sm:$0xff]  }
 0x1e0   :  { %v1797_v50 = vrot.slane %v1760_v13, 1  ;;  %v8868_v20 = vsel %vm1603_vm10, %v8759_v41, %v1746_v48  ;;  %v1759_v56 = vrot.slane %v1757_v0, 7  ;;  %v8877_v9 = vsel %vm76_vm0, %v1793_v42, %v1794_v17  ;;  %v6384_v48 = vld [vmem:[%s11438_s3 + $0x314] ss:$8 sps:$4 sm:$0xff]   ;;  %v6390_v16 = vld [vmem:[%s11438_s3 + $0x304] ss:$8 sps:$4 sm:$0xff]  }
 0x1e1   :  { %v8861_v35 = vsel %vm76_vm0, %v1787_v28, %v1788_v26  ;;  %3000 = vmatpush1.bf16.msra.mxu1 %v6364_v25  ;;  %3081 = vmatpush1.bf16.msra.mxu0 %v6367_v27  ;;  %v1767_v2 = vrot.slane %v1765_v22, 7  ;;  %v1800_v61 = vrot.slane %v1768_v49, 1  ;;  %11589 = vst [vmem:[#allocation31_spill] sm:$0xff] %v8868_v20  ;;  %11590 = vst [vmem:[#allocation32_spill] sm:$0xff] %v8877_v9  ;;  %v6376_v27 = vld [vmem:[%s11438_s3 + $0x320] ss:$8 sps:$4 sm:$0xff]  }
 0x1e2   :  { %11588 = vst [vmem:[#allocation30_spill] sm:$0xff] %v8861_v35  ;;  %3001 = vmatprep.subr.bf16.mxu1 %v6372_v4  ;;  %3082 = vmatprep.subr.bf16.mxu0 %v6375_v3  ;;  %v8880_v26 = vsel %vm76_vm0, %v1790_v52, %v1791_v62  ;;  %v1799_v41 = vor.u32 %v1794_v17, %v1749_v46  ;;  %v6382_v4 = vld [vmem:[%s11438_s3 + $0x310] ss:$8 sps:$4 sm:$0xff]   ;;  %v11598_v42 = vmax.f32 %v8516_v55, 0.0  ;;  %v6388_v52 = vld [vmem:[%s11438_s3 + $0x300] ss:$8 sps:$4 sm:$0xff]  }
 0x1e3   :  { %11591 = vst [vmem:[#allocation33_spill] sm:$0xff] %v8880_v26  ;;  %v1770_v32 = vor.u32 %v1768_v49, %v1767_v2  ;;  %v1796_v31 = vor.u32 %v1791_v62, %v1741_v18  ;;  %v8886_v6 = vor.u32 %v1800_v61, %v1765_v22  ;;  %v8889_v25 = vor.u32 %v1797_v50, %v1757_v0  ;;  %v6387_v0 = vld [vmem:[%s11438_s3 + $0x4d4] ss:$8 sps:$4 sm:$0xff]   ;;  %v6385_v3 = vld [vmem:[%s11438_s3 + $0x4d0] ss:$8 sps:$4 sm:$0xff]  }
 0x1e4   :  { %2900 = vmatmul.mubr.bf16.gmra.mxu1 %v8868_v20  ;;  %v8902_v18 = vsel %vm76_vm0, %v1799_v41, %v1800_v61  ;;  %v11599_v22 = vmax.f32 %v8541_v23, 0.0  ;;  %v6396_v55 = vld [vmem:[%s11438_s3 + $0x3f4] ss:$8 sps:$4 sm:$0xff]   ;;  %v6397_v17 = vld [vmem:[%s11438_s3 + $0x4b0] ss:$8 sps:$4 sm:$0xff]  }
 0x1e5   :  { %11592 = vst [vmem:[#allocation34_spill] sm:$0xff] %v8886_v6  ;;  %11593 = vst [vmem:[#allocation35_spill] sm:$0xff] %v8889_v25  ;;  %3002 = vmatpush1.bf16.msra.mxu1 %v6370_v58  ;;  %3083 = vmatpush2.bf16.msra.mxu0 %v6373_v11  ;;  %v8899_v1 = vsel %vm1603_vm10, %v8789_v10, %v1770_v32  ;;  %v8905_v46 = vsel %vm76_vm0, %v1796_v31, %v1797_v50  ;;  %v6399_v23 = vld [vmem:[%s11438_s3 + $0x4b4] ss:$8 sps:$4 sm:$0xff]   ;;  %v6394_v58 = vld [vmem:[%s11438_s3 + $0x3f0] ss:$8 sps:$4 sm:$0xff]  }
 0x1e6   :  { %11594 = vst [vmem:[#allocation36_spill] sm:$0xff] %v8899_v1  ;;  %11595 = vst [vmem:[#allocation37_spill] sm:$0xff] %v8902_v18  ;;  %3003 = vmatprep.subr.bf16.mxu1 %v6378_v44  ;;  %3084 = vmatprep.subr.bf16.mxu0 %v6381_v24  ;;  %v1762_v10 = vor.u32 %v1760_v13, %v1759_v56  ;;  %v6393_v13 = vld [vmem:[%s11438_s3 + $0x4c4] ss:$8 sps:$4 sm:$0xff]   ;;  %v8934_v49 = vpack.c.bf16 %v11599_v22, %v11598_v42  ;;  %v6400_v2 = vld [vmem:[%s11438_s3 + $0x3e0] ss:$8 sps:$4 sm:$0xff]  }
 0x1e7   :  { %11596 = vst [vmem:[#allocation38_spill] sm:$0xff] %v8905_v46  ;;  %2909 = vmatprep.mubr.bf16.mxu1 %v8899_v1  ;;  %v6402_v62 = vld [vmem:[%s11438_s3 + $0x3e4] ss:$8 sps:$4 sm:$0xff]   ;;  %v6403_v61 = vld [vmem:[%s11438_s3 + $0x4a0] ss:$8 sps:$4 sm:$0xff]  }
 0x1e8   :  { %v8925_v28 = vsel %vm1603_vm10, %v8793_v51, %v1762_v10  ;;  %11600 = vst [vmem:[#allocation40_spill] sm:$0xff] %v8934_v49  ;;  %v6391_v51 = vld [vmem:[%s11438_s3 + $0x4c0] ss:$8 sps:$4 sm:$0xff]   ;;  %v6405_v11 = vld [vmem:[%s11438_s3 + $0x4a4] ss:$8 sps:$4 sm:$0xff]  }
 0x1e9   :  { %3004 = vmatpush1.bf16.msra.mxu1 %v6376_v27  ;;  %3085 = vmatpush2.bf16.msra.mxu0 %v6379_v14  ;;  %11597 = vst [vmem:[#allocation39_spill] sm:$0xff] %v8925_v28  ;;  %v6408_v50 = vld [vmem:[%s11438_s3 + $0x3d4] ss:$8 sps:$4 sm:$0xff]   ;;  %v6406_v24 = vld [vmem:[%s11438_s3 + $0x3d0] ss:$8 sps:$4 sm:$0xff]  }
 0x1ea   :  { %3005 = vmatprep.subr.bf16.mxu1 %v6384_v48  ;;  %3086 = vmatprep.subr.bf16.mxu0 %v6387_v0  ;;  %v6411_v44 = vld [vmem:[%s11438_s3 + $0x494] ss:$8 sps:$4 sm:$0xff]   ;;  %v6409_v56 = vld [vmem:[%s11438_s3 + $0x490] ss:$8 sps:$4 sm:$0xff]   ;;  %v6414_v32 = vld [vmem:[%s11438_s3 + $0x3c4] ss:$8 sps:$4 sm:$0xff]  }
 0x1eb   :  { %v6417_v41 = vld [vmem:[%s11438_s3 + $0x484] ss:$8 sps:$4 sm:$0xff]   ;;  %v6412_v31 = vld [vmem:[%s11438_s3 + $0x3c0] ss:$8 sps:$4 sm:$0xff]   ;;  %v6420_v14 = vld [vmem:[%s11438_s3 + $0x3b4] ss:$8 sps:$4 sm:$0xff]  }
 0x1ec   :  { %2910 = vmatmul.mubr.bf16.gmra.mxu1 %v8925_v28  ;;  %v6415_v27 = vld [vmem:[%s11438_s3 + $0x480] ss:$8 sps:$4 sm:$0xff]   ;;  %v6423_v48 = vld [vmem:[%s11438_s3 + $0x674] ss:$8 sps:$4 sm:$0xff]   ;;  %v6418_v0 = vld [vmem:[%s11438_s3 + $0x3b0] ss:$8 sps:$4 sm:$0xff]  }
 0x1ed   :  { %3006 = vmatpush1.bf16.msra.mxu1 %v6382_v4  ;;  %3087 = vmatpush2.bf16.msra.mxu0 %v6385_v3  ;;  %v6421_v10 = vld [vmem:[%s11438_s3 + $0x670] ss:$8 sps:$4 sm:$0xff]   ;;  %v6426_v4 = vld [vmem:[%s11438_s3 + $0x3a4] ss:$8 sps:$4 sm:$0xff]   ;;  %v6424_v42 = vld [vmem:[%s11438_s3 + $0x3a0] ss:$8 sps:$4 sm:$0xff]  }
 0x1ee   :  { %5625 = vmatprep.mubr.msk.bf16.mxu1 %vm8401_vm2, %v8934_v49  ;;  %3007 = vmatprep.subr.bf16.mxu1 %v6390_v16  ;;  %v6429_v3 = vld [vmem:[%s11438_s3 + $0x664] ss:$8 sps:$4 sm:$0xff]   ;;  %v11601_v16 = vld [vmem:[#allocation5_spill] sm:$0xff]  ;;  %v6427_v22 = vld [vmem:[%s11438_s3 + $0x660] ss:$8 sps:$4 sm:$0xff]  }
 0x1ef   :  { %3088 = vmatprep.subr.bf16.mxu0 %v6393_v13  ;;  %v11602_v13 = vld [vmem:[#allocation11_spill] sm:$0xff]  ;;  %v6616_v6 = vld [vmem:[%s11438_s3 + $0x790] ss:$8 sps:$4 sm:$0xff]  }
 0x1f0   :  { %v6621_v46 = vld [vmem:[%s11438_s3 + $0x784] ss:$8 sps:$4 sm:$0xff]   ;;  %v6682_v26 = vld [vmem:[%s11438_s3 + $0x40] ss:$8 sps:$4 sm:$0xff]  }
 0x1f1   :  { %3008 = vmatpush1.bf16.msra.mxu1 %v6388_v52  ;;  %3089 = vmatpush2.bf16.msra.mxu0 %v6391_v51  ;;  %v6432_v52 = vld [vmem:[%s11438_s3 + $0x394] ss:$8 sps:$4 sm:$0xff]  }
 0x1f2   :  { %3009 = vmatprep.subr.bf16.mxu1 %v6396_v55  ;;  %3090 = vmatprep.subr.bf16.mxu0 %v6399_v23  ;;  %v6435_v51 = vld [vmem:[%s11438_s3 + $0x654] ss:$8 sps:$4 sm:$0xff]   ;;  %v6430_v55 = vld [vmem:[%s11438_s3 + $0x390] ss:$8 sps:$4 sm:$0xff]  }
 0x1f3   :  { %v6433_v23 = vld [vmem:[%s11438_s3 + $0x650] ss:$8 sps:$4 sm:$0xff]  }
 0x1f5   :  { %3010 = vmatpush2.bf16.msra.mxu1 %v6394_v58  ;;  %3091 = vmatpush2.bf16.msra.mxu0 %v6397_v17  ;;  %v6438_v58 = vld [vmem:[%s11438_s3 + $0x384] ss:$8 sps:$4 sm:$0xff]  }
 0x1f6   :  { %3011 = vmatprep.subr.bf16.mxu1 %v6402_v62  ;;  %3092 = vmatprep.subr.bf16.mxu0 %v6405_v11  ;;  %v6441_v17 = vld [vmem:[%s11438_s3 + $0x644] ss:$8 sps:$4 sm:$0xff]   ;;  %v11603_v62 = vld [vmem:[#allocation12_spill] sm:$0xff] }
 0x1f7   :  { %v11604_v11 = vld [vmem:[#allocation16_spill] sm:$0xff] }
 0x1f9   :  { %3012 = vmatpush2.bf16.msra.mxu1 %v6400_v2  ;;  %3093 = vmatpush2.bf16.msra.mxu0 %v6403_v61  ;;  %v6436_v2 = vld [vmem:[%s11438_s3 + $0x380] ss:$8 sps:$4 sm:$0xff]  }
 0x1fa   :  { %3013 = vmatprep.subr.bf16.mxu1 %v6408_v50  ;;  %3094 = vmatprep.subr.bf16.mxu0 %v6411_v44  ;;  %v6439_v61 = vld [vmem:[%s11438_s3 + $0x640] ss:$8 sps:$4 sm:$0xff]   ;;  %v6444_v50 = vld [vmem:[%s11438_s3 + $0x574] ss:$8 sps:$4 sm:$0xff]  }
 0x1fb   :  { %v6447_v44 = vld [vmem:[%s11438_s3 + $0x634] ss:$8 sps:$4 sm:$0xff]  }
 0x1fd   :  { %3014 = vmatpush2.bf16.msra.mxu1 %v6406_v24  ;;  %3095 = vmatpush2.bf16.msra.mxu0 %v6409_v56  ;;  %v6442_v24 = vld [vmem:[%s11438_s3 + $0x570] ss:$8 sps:$4 sm:$0xff]  }
 0x1fe   :  { %3015 = vmatprep.subr.bf16.mxu1 %v6414_v32  ;;  %3096 = vmatprep.subr.bf16.mxu0 %v6417_v41  ;;  %v6445_v56 = vld [vmem:[%s11438_s3 + $0x630] ss:$8 sps:$4 sm:$0xff]   ;;  %v6450_v32 = vld [vmem:[%s11438_s3 + $0x564] ss:$8 sps:$4 sm:$0xff]  }
 0x1ff   :  { %v6453_v41 = vld [vmem:[%s11438_s3 + $0x624] ss:$8 sps:$4 sm:$0xff]  }
 0x201   :  { %3016 = vmatpush2.bf16.msra.mxu1 %v6412_v31  ;;  %3097 = vmatpush2.bf16.msra.mxu0 %v6415_v27  ;;  %v11605_v31 = vld [vmem:[#allocation14_spill] sm:$0xff]  ;;  %v11606_v27 = vld [vmem:[#allocation17_spill] sm:$0xff] }
 0x202   :  { %3017 = vmatprep.subr.bf16.mxu1 %v6420_v14  ;;  %4173 = vmatprep.subr.bf16.mxu0 %v6423_v48  ;;  %v9071_v48 = vsel %vm7323_vm3, %v11606_v27, 0  ;;  %v6480_v27 = vld [vmem:[%s11438_s3 + $0x514] ss:$8 sps:$4 sm:$0xff]  }
 0x203   :  { %v6675_v14 = vld [vmem:[%s11438_s3 + $0x74] ss:$8 sps:$4 sm:$0xff]  }
 0x204   :  { %3099 = vmatmul.mubr.bf16.vlgmr.msra.gmra.mxu0 %v11601_v16 }
 0x205   :  { %3018 = vmatpush2.bf16.msra.mxu1 %v6418_v0  ;;  %3108 = vmatprep.mubr.bf16.mxu0 %v11602_v13  ;;  %v6448_v0 = vld [vmem:[%s11438_s3 + $0x560] ss:$8 sps:$4 sm:$0xff]  }
 0x206   :  { %4174 = vmatpush1.bf16.msra.mxu0 %v6421_v10  ;;  %3019 = vmatprep.subr.bf16.mxu1 %v6426_v4  ;;  %v6451_v10 = vld [vmem:[%s11438_s3 + $0x620] ss:$8 sps:$4 sm:$0xff]   ;;  %v6456_v4 = vld [vmem:[%s11438_s3 + $0x554] ss:$8 sps:$4 sm:$0xff]  }
 0x207   :  { %4175 = vmatprep.subr.bf16.mxu0 %v6429_v3  ;;  %v6459_v3 = vld [vmem:[%s11438_s3 + $0x614] ss:$8 sps:$4 sm:$0xff]  }
 0x209   :  { %3020 = vmatpush2.bf16.msra.mxu1 %v6424_v42  ;;  %v6454_v42 = vld [vmem:[%s11438_s3 + $0x550] ss:$8 sps:$4 sm:$0xff]  }
 0x20a   :  { %4176 = vmatpush1.bf16.msra.mxu0 %v6427_v22  ;;  %3021 = vmatprep.subr.bf16.mxu1 %v6432_v52  ;;  %v6457_v22 = vld [vmem:[%s11438_s3 + $0x610] ss:$8 sps:$4 sm:$0xff]   ;;  %v11608_v52 = vld [vmem:[#allocation15_spill] sm:$0xff] }
 0x20b   :  { %4177 = vmatprep.subr.bf16.mxu0 %v6435_v51  ;;  %v9098_v51 = vsel %vm7323_vm3, %v11608_v52, 0  ;;  %v6484_v52 = vld [vmem:[%s11438_s3 + $0x500] ss:$8 sps:$4 sm:$0xff]  }
 0x20c   :  { %3109 = vmatmul.mubr.bf16.gmra.mxu0 %v11603_v62 }
 0x20d   :  { %3022 = vmatpush2.bf16.msra.mxu1 %v6430_v55  ;;  %3118 = vmatprep.mubr.bf16.mxu0 %v11604_v11  ;;  %v6462_v55 = vld [vmem:[%s11438_s3 + $0x544] ss:$8 sps:$4 sm:$0xff]  }
 0x20e   :  { %4178 = vmatpush1.bf16.msra.mxu0 %v6433_v23  ;;  %3023 = vmatprep.subr.bf16.mxu1 %v6438_v58  ;;  %v6465_v23 = vld [vmem:[%s11438_s3 + $0x604] ss:$8 sps:$4 sm:$0xff]   ;;  %v6460_v58 = vld [vmem:[%s11438_s3 + $0x540] ss:$8 sps:$4 sm:$0xff]  }
 0x20f   :  { %4179 = vmatprep.subr.bf16.mxu0 %v6441_v17  ;;  %v6463_v17 = vld [vmem:[%s11438_s3 + $0x600] ss:$8 sps:$4 sm:$0xff]  }
 0x211   :  { %3024 = vmatpush2.bf16.msra.mxu1 %v6436_v2  ;;  %v6468_v2 = vld [vmem:[%s11438_s3 + $0x534] ss:$8 sps:$4 sm:$0xff]  }
 0x212   :  { %4180 = vmatpush1.bf16.msra.mxu0 %v6439_v61  ;;  %4100 = vmatprep.subr.bf16.mxu1 %v6444_v50  ;;  %v6471_v61 = vld [vmem:[%s11438_s3 + $0x6f4] ss:$8 sps:$4 sm:$0xff]   ;;  %v6466_v50 = vld [vmem:[%s11438_s3 + $0x530] ss:$8 sps:$4 sm:$0xff]  }
 0x213   :  { %4181 = vmatprep.subr.bf16.mxu0 %v6447_v44  ;;  %v6469_v44 = vld [vmem:[%s11438_s3 + $0x6f0] ss:$8 sps:$4 sm:$0xff]  }
 0x214   :  { %5628 = vmatmul.mubr.msk.bf16.vlgmr.msra.gmra.mxu1 %vm8401_vm2, %v8551_v8  ;;  %3119 = vmatmul.mubr.bf16.gmra.mxu0 %v11605_v31 }
 0x215   :  { %5631 = vmatprep.mubr.msk.bf16.mxu1 %vm8561_vm4, %v8653_v30  ;;  %3128 = vmatprep.mubr.bf16.mxu0 %v9071_v48 }
 0x216   :  { %4101 = vmatpush1.bf16.msra.mxu1 %v6442_v24  ;;  %4182 = vmatpush1.bf16.msra.mxu0 %v6445_v56  ;;  %v6474_v24 = vld [vmem:[%s11438_s3 + $0x524] ss:$8 sps:$4 sm:$0xff]  }
 0x217   :  { %4102 = vmatprep.subr.bf16.mxu1 %v6450_v32  ;;  %4183 = vmatprep.subr.bf16.mxu0 %v6453_v41  ;;  %v6477_v56 = vld [vmem:[%s11438_s3 + $0x6e4] ss:$8 sps:$4 sm:$0xff]   ;;  %v6472_v32 = vld [vmem:[%s11438_s3 + $0x520] ss:$8 sps:$4 sm:$0xff]  }
 0x218   :  { %v6475_v41 = vld [vmem:[%s11438_s3 + $0x6e0] ss:$8 sps:$4 sm:$0xff]  }
 0x21a   :  { %4103 = vmatpush1.bf16.msra.mxu1 %v6448_v0  ;;  %4184 = vmatpush1.bf16.msra.mxu0 %v6451_v10  ;;  %v6483_v0 = vld [vmem:[%s11438_s3 + $0x6d4] ss:$8 sps:$4 sm:$0xff]   ;;  %v6478_v10 = vld [vmem:[%s11438_s3 + $0x510] ss:$8 sps:$4 sm:$0xff]  }
 0x21b   :  { %4104 = vmatprep.subr.bf16.mxu1 %v6456_v4  ;;  %4185 = vmatprep.subr.bf16.mxu0 %v6459_v3  ;;  %v6481_v4 = vld [vmem:[%s11438_s3 + $0x6d0] ss:$8 sps:$4 sm:$0xff]   ;;  %v6486_v3 = vld [vmem:[%s11438_s3 + $0x504] ss:$8 sps:$4 sm:$0xff]  }
 0x21c   :  { %5634 = vmatmul.mubr.msk.bf16.gmra.mxu1 %vm8561_vm4, %v8615_v12  ;;  %3129 = vmatmul.mubr.bf16.gmra.mxu0 %v9098_v51 }
 0x21d   :  { %5637 = vmatprep.mubr.msk.bf16.mxu1 %vm8628_vm5, %v8736_v19  ;;  %4205 = vmatprep.mubr.bf16.mxu0 %v8676_v60 }
 0x21e   :  { %4105 = vmatpush1.bf16.msra.mxu1 %v6454_v42  ;;  %4186 = vmatpush1.bf16.msra.mxu0 %v6457_v22  ;;  %v6489_v42 = vld [vmem:[%s11438_s3 + $0x6c4] ss:$8 sps:$4 sm:$0xff]   ;;  %v11609_v22 = vld [vmem:[#allocation8_spill] sm:$0xff] }
 0x21f   :  { %4106 = vmatprep.subr.bf16.mxu1 %v6462_v55  ;;  %4187 = vmatprep.subr.bf16.mxu0 %v6465_v23  ;;  %v6487_v55 = vld [vmem:[%s11438_s3 + $0x6c0] ss:$8 sps:$4 sm:$0xff]   ;;  %v6492_v23 = vld [vmem:[%s11438_s3 + $0x5f4] ss:$8 sps:$4 sm:$0xff]  }
 0x222   :  { %4107 = vmatpush1.bf16.msra.mxu1 %v6460_v58  ;;  %4188 = vmatpush1.bf16.msra.mxu0 %v6463_v17  ;;  %v6495_v58 = vld [vmem:[%s11438_s3 + $0x6b4] ss:$8 sps:$4 sm:$0xff]   ;;  %v6490_v17 = vld [vmem:[%s11438_s3 + $0x5f0] ss:$8 sps:$4 sm:$0xff]  }
 0x223   :  { %4108 = vmatprep.subr.bf16.mxu1 %v6468_v2  ;;  %4189 = vmatprep.subr.bf16.mxu0 %v6471_v61  ;;  %v6493_v2 = vld [vmem:[%s11438_s3 + $0x6b0] ss:$8 sps:$4 sm:$0xff]   ;;  %v6498_v61 = vld [vmem:[%s11438_s3 + $0x5e4] ss:$8 sps:$4 sm:$0xff]  }
 0x224   :  { %5640 = vmatmul.mubr.msk.bf16.gmra.mxu1 %vm8628_vm5, %v8729_v34 }
 0x225   :  { %5643 = vmatprep.mubr.msk.bf16.mxu1 %vm8712_vm6, %v8820_v45 }
 0x226   :  { %4109 = vmatpush1.bf16.msra.mxu1 %v6466_v50  ;;  %4190 = vmatpush2.bf16.msra.mxu0 %v6469_v44  ;;  %v6501_v50 = vld [vmem:[%s11438_s3 + $0x6a4] ss:$8 sps:$4 sm:$0xff]   ;;  %v6496_v44 = vld [vmem:[%s11438_s3 + $0x5e0] ss:$8 sps:$4 sm:$0xff]  }
 0x227   :  { %4110 = vmatprep.subr.bf16.mxu1 %v6474_v24  ;;  %4191 = vmatprep.subr.bf16.mxu0 %v6477_v56  ;;  %v6499_v24 = vld [vmem:[%s11438_s3 + $0x6a0] ss:$8 sps:$4 sm:$0xff]   ;;  %v6504_v56 = vld [vmem:[%s11438_s3 + $0x5d4] ss:$8 sps:$4 sm:$0xff]  }
 0x22a   :  { %4111 = vmatpush1.bf16.msra.mxu1 %v6472_v32  ;;  %4192 = vmatpush2.bf16.msra.mxu0 %v6475_v41  ;;  %v6507_v32 = vld [vmem:[%s11438_s3 + $0x694] ss:$8 sps:$4 sm:$0xff]   ;;  %v6502_v41 = vld [vmem:[%s11438_s3 + $0x5d0] ss:$8 sps:$4 sm:$0xff]  }
 0x22b   :  { %4112 = vmatprep.subr.bf16.mxu1 %v6480_v27  ;;  %4193 = vmatprep.subr.bf16.mxu0 %v6483_v0  ;;  %v6505_v27 = vld [vmem:[%s11438_s3 + $0x690] ss:$8 sps:$4 sm:$0xff]   ;;  %v6510_v0 = vld [vmem:[%s11438_s3 + $0x5c4] ss:$8 sps:$4 sm:$0xff]  }
 0x22c   :  { %5646 = vmatmul.mubr.msk.bf16.gmra.mxu1 %vm8712_vm6, %v8782_v38 }
 0x22d   :  { %4132 = vmatprep.mubr.bf16.mxu1 %v11609_v22  ;;  %v6519_v22 = vld [vmem:[%s11438_s3 + $0x874] ss:$8 sps:$4 sm:$0xff]  }
 0x22e   :  { %4113 = vmatpush1.bf16.msra.mxu1 %v6478_v10  ;;  %4194 = vmatpush2.bf16.msra.mxu0 %v6481_v4  ;;  %v6513_v10 = vld [vmem:[%s11438_s3 + $0x684] ss:$8 sps:$4 sm:$0xff]   ;;  %v6508_v4 = vld [vmem:[%s11438_s3 + $0x5c0] ss:$8 sps:$4 sm:$0xff]  }
 0x22f   :  { %4114 = vmatprep.subr.bf16.mxu1 %v6486_v3  ;;  %4195 = vmatprep.subr.bf16.mxu0 %v6489_v42  ;;  %v6511_v3 = vld [vmem:[%s11438_s3 + $0x680] ss:$8 sps:$4 sm:$0xff]   ;;  %v6516_v42 = vld [vmem:[%s11438_s3 + $0x5b4] ss:$8 sps:$4 sm:$0xff]  }
 0x232   :  { %4115 = vmatpush1.bf16.msra.mxu1 %v6484_v52  ;;  %4196 = vmatpush2.bf16.msra.mxu0 %v6487_v55  ;;  %v6514_v52 = vld [vmem:[%s11438_s3 + $0x5b0] ss:$8 sps:$4 sm:$0xff]  }
 0x233   :  { %4116 = vmatprep.subr.bf16.mxu1 %v6492_v23  ;;  %4197 = vmatprep.subr.bf16.mxu0 %v6495_v58  ;;  %v6517_v55 = vld [vmem:[%s11438_s3 + $0x870] ss:$8 sps:$4 sm:$0xff]   ;;  %v6522_v23 = vld [vmem:[%s11438_s3 + $0x5a4] ss:$8 sps:$4 sm:$0xff]  }
 0x234   :  { %v6525_v58 = vld [vmem:[%s11438_s3 + $0x864] ss:$8 sps:$4 sm:$0xff]  }
 0x236   :  { %4117 = vmatpush2.bf16.msra.mxu1 %v6490_v17  ;;  %4198 = vmatpush2.bf16.msra.mxu0 %v6493_v2  ;;  %v6520_v2 = vld [vmem:[%s11438_s3 + $0x5a0] ss:$8 sps:$4 sm:$0xff]  }
 0x237   :  { %4118 = vmatprep.subr.bf16.mxu1 %v6498_v61  ;;  %4199 = vmatprep.subr.bf16.mxu0 %v6501_v50  ;;  %v6523_v61 = vld [vmem:[%s11438_s3 + $0x860] ss:$8 sps:$4 sm:$0xff]   ;;  %v6528_v50 = vld [vmem:[%s11438_s3 + $0x594] ss:$8 sps:$4 sm:$0xff]  }
 0x23a   :  { %4119 = vmatpush2.bf16.msra.mxu1 %v6496_v44  ;;  %4200 = vmatpush2.bf16.msra.mxu0 %v6499_v24  ;;  %v6531_v44 = vld [vmem:[%s11438_s3 + $0x854] ss:$8 sps:$4 sm:$0xff]  }
 0x23b   :  { %4120 = vmatprep.subr.bf16.mxu1 %v6504_v56  ;;  %4201 = vmatprep.subr.bf16.mxu0 %v6507_v32  ;;  %v6526_v56 = vld [vmem:[%s11438_s3 + $0x590] ss:$8 sps:$4 sm:$0xff]  }
 0x23c   :  { %v6529_v32 = vld [vmem:[%s11438_s3 + $0x850] ss:$8 sps:$4 sm:$0xff]  }
 0x23e   :  { %4121 = vmatpush2.bf16.msra.mxu1 %v6502_v41  ;;  %4202 = vmatpush2.bf16.msra.mxu0 %v6505_v27  ;;  %v6534_v41 = vld [vmem:[%s11438_s3 + $0x584] ss:$8 sps:$4 sm:$0xff]  }
 0x23f   :  { %4122 = vmatprep.subr.bf16.mxu1 %v6510_v0  ;;  %4203 = vmatprep.subr.bf16.mxu0 %v6513_v10  ;;  %v6537_v27 = vld [vmem:[%s11438_s3 + $0x844] ss:$8 sps:$4 sm:$0xff]   ;;  %v6532_v10 = vld [vmem:[%s11438_s3 + $0x580] ss:$8 sps:$4 sm:$0xff]  }
 0x242   :  { %4123 = vmatpush2.bf16.msra.mxu1 %v6508_v4  ;;  %4204 = vmatpush2.bf16.msra.mxu0 %v6511_v3  ;;  %v9245_v17 = vpop.f32.mrf.mxu0  ;;  %v6535_v4 = vld [vmem:[%s11438_s3 + $0x840] ss:$8 sps:$4 sm:$0xff]   ;;  %v6540_v3 = vld [vmem:[%s11438_s3 + $0x774] ss:$8 sps:$4 sm:$0xff]  }
 0x243   :  { %4124 = vmatprep.subr.bf16.mxu1 %v6516_v42  ;;  %4319 = vmatprep.subr.bf16.mxu0 %v6519_v22  ;;  %v6543_v42 = vld [vmem:[%s11438_s3 + $0x834] ss:$8 sps:$4 sm:$0xff]  }
 0x244   :  { %v9260_v24 = vpop.f32.mrf.mxu0 }
 0x245   :  { %4206 = vmatmul.mubr.bf16.vlgmr.msra.gmra.mxu0 %v8719_v33 }
 0x246   :  { %4125 = vmatpush2.bf16.msra.mxu1 %v6514_v52  ;;  %4215 = vmatprep.mubr.bf16.mxu0 %v8800_v5  ;;  %v9275_v0 = vpop.f32.mrf.mxu0  ;;  %v6538_v52 = vld [vmem:[%s11438_s3 + $0x770] ss:$8 sps:$4 sm:$0xff]  }
 0x247   :  { %4320 = vmatpush1.bf16.msra.mxu0 %v6517_v55  ;;  %4126 = vmatprep.subr.bf16.mxu1 %v6522_v23  ;;  %v6541_v55 = vld [vmem:[%s11438_s3 + $0x830] ss:$8 sps:$4 sm:$0xff]   ;;  %v6546_v23 = vld [vmem:[%s11438_s3 + $0x764] ss:$8 sps:$4 sm:$0xff]  }
 0x248   :  { %4321 = vmatprep.subr.bf16.mxu0 %v6525_v58  ;;  %v9290_v22 = vpop.f32.mrf.mxu0  ;;  %v6549_v58 = vld [vmem:[%s11438_s3 + $0x824] ss:$8 sps:$4 sm:$0xff]  }
 0x249   :  { %11610 = vst [vmem:[#allocation11_spill] sm:$0xff] %v9290_v22  ;;  %v6609_v22 = vld [vmem:[%s11438_s3 + $0x884] ss:$8 sps:$4 sm:$0xff]  }
 0x24a   :  { %4127 = vmatpush2.bf16.msra.mxu1 %v6520_v2  ;;  %v11611_v2 = vld [vmem:[#allocation9_spill] sm:$0xff] }
 0x24b   :  { %4322 = vmatpush1.bf16.msra.mxu0 %v6523_v61  ;;  %4128 = vmatprep.subr.bf16.mxu1 %v6528_v50  ;;  %v9306_v61 = vpop.f32.mrf.mxu0  ;;  %v11612_v50 = vld [vmem:[#allocation4_spill] sm:$0xff] }
 0x24c   :  { %4323 = vmatprep.subr.bf16.mxu0 %v6531_v44  ;;  %v6544_v44 = vld [vmem:[%s11438_s3 + $0x760] ss:$8 sps:$4 sm:$0xff]  }
 0x24d   :  { %4216 = vmatmul.mubr.bf16.gmra.mxu0 %v8808_v57 }
 0x24e   :  { %4129 = vmatpush2.bf16.msra.mxu1 %v6526_v56  ;;  %4225 = vmatprep.mubr.bf16.mxu0 %v8835_v47  ;;  %v6547_v56 = vld [vmem:[%s11438_s3 + $0x820] ss:$8 sps:$4 sm:$0xff]  }
 0x24f   :  { %4324 = vmatpush1.bf16.msra.mxu0 %v6529_v32  ;;  %4130 = vmatprep.subr.bf16.mxu1 %v6534_v41  ;;  %v6552_v32 = vld [vmem:[%s11438_s3 + $0x754] ss:$8 sps:$4 sm:$0xff]  }
 0x250   :  { %4325 = vmatprep.subr.bf16.mxu0 %v6537_v27  ;;  %v6555_v41 = vld [vmem:[%s11438_s3 + $0x814] ss:$8 sps:$4 sm:$0xff]   ;;  %v9322_v27 = vpop.f32.mrf.mxu0 }
 0x252   :  { %4131 = vmatpush2.bf16.msra.mxu1 %v6532_v10  ;;  %v6550_v10 = vld [vmem:[%s11438_s3 + $0x750] ss:$8 sps:$4 sm:$0xff]  }
 0x253   :  { %4326 = vmatpush1.bf16.msra.mxu0 %v6535_v4  ;;  %4246 = vmatprep.subr.bf16.mxu1 %v6540_v3  ;;  %v6553_v4 = vld [vmem:[%s11438_s3 + $0x810] ss:$8 sps:$4 sm:$0xff]   ;;  %v6558_v3 = vld [vmem:[%s11438_s3 + $0x744] ss:$8 sps:$4 sm:$0xff]  }
 0x254   :  { %4327 = vmatprep.subr.bf16.mxu0 %v6543_v42  ;;  %v6561_v42 = vld [vmem:[%s11438_s3 + $0x804] ss:$8 sps:$4 sm:$0xff]  }
 0x255   :  { %4133 = vmatmul.mubr.bf16.vlgmr.msra.gmra.mxu1 %v11611_v2  ;;  %4226 = vmatmul.mubr.bf16.gmra.mxu0 %v8868_v20  ;;  %v6559_v2 = vld [vmem:[%s11438_s3 + $0x800] ss:$8 sps:$4 sm:$0xff]  }
 0x256   :  { %4142 = vmatprep.mubr.bf16.mxu1 %v11612_v50  ;;  %4235 = vmatprep.mubr.bf16.mxu0 %v8899_v1  ;;  %v6564_v50 = vld [vmem:[%s11438_s3 + $0x734] ss:$8 sps:$4 sm:$0xff]  }
 0x257   :  { %4247 = vmatpush1.bf16.msra.mxu1 %v6538_v52  ;;  %4328 = vmatpush1.bf16.msra.mxu0 %v6541_v55  ;;  %v11613_v52 = vld [vmem:[#allocation6_spill] sm:$0xff]  ;;  %v9338_v55 = vpop.f32.mrf.mxu0 }
 0x258   :  { %4248 = vmatprep.subr.bf16.mxu1 %v6546_v23  ;;  %4329 = vmatprep.subr.bf16.mxu0 %v6549_v58  ;;  %v11614_v23 = vld [vmem:[#allocation10_spill] sm:$0xff] }
 0x259   :  { %v6556_v58 = vld [vmem:[%s11438_s3 + $0x740] ss:$8 sps:$4 sm:$0xff]  }
 0x25b   :  { %4249 = vmatpush1.bf16.msra.mxu1 %v6544_v44  ;;  %4330 = vmatpush1.bf16.msra.mxu0 %v6547_v56  ;;  %v6567_v44 = vld [vmem:[%s11438_s3 + $0x8f4] ss:$8 sps:$4 sm:$0xff]   ;;  %v9356_v56 = vpop.f32.mrf.mxu0 }
 0x25c   :  { %4250 = vmatprep.subr.bf16.mxu1 %v6552_v32  ;;  %4331 = vmatprep.subr.bf16.mxu0 %v6555_v41  ;;  %11615 = vst [vmem:[#allocation12_spill] sm:$0xff] %v9356_v56  ;;  %v6562_v32 = vld [vmem:[%s11438_s3 + $0x730] ss:$8 sps:$4 sm:$0xff]   ;;  %v6603_v56 = vld [vmem:[%s11438_s3 + $0x894] ss:$8 sps:$4 sm:$0xff]  }
 0x25d   :  { %4143 = vmatmul.mubr.bf16.gmra.mxu1 %v11613_v52  ;;  %4236 = vmatmul.mubr.bf16.gmra.mxu0 %v8925_v28  ;;  %v6565_v41 = vld [vmem:[%s11438_s3 + $0x8f0] ss:$8 sps:$4 sm:$0xff]   ;;  %v11617_v52 = vld [vmem:[#allocation18_spill] sm:$0xff] }
 0x25e   :  { %4152 = vmatprep.mubr.bf16.mxu1 %v11614_v23  ;;  %5993 = vmatprep.mubr.msk.bf16.mxu0 %vm8401_vm2, %v8934_v49  ;;  %v6568_v23 = vld [vmem:[%s11438_s3 + $0x720] ss:$8 sps:$4 sm:$0xff]  }
 0x25f   :  { %4251 = vmatpush1.bf16.msra.mxu1 %v6550_v10  ;;  %4332 = vmatpush1.bf16.msra.mxu0 %v6553_v4  ;;  %v6570_v10 = vld [vmem:[%s11438_s3 + $0x724] ss:$8 sps:$4 sm:$0xff]  }
 0x260   :  { %4252 = vmatprep.subr.bf16.mxu1 %v6558_v3  ;;  %4333 = vmatprep.subr.bf16.mxu0 %v6561_v42  ;;  %v6573_v4 = vld [vmem:[%s11438_s3 + $0x8e4] ss:$8 sps:$4 sm:$0xff]   ;;  %v11616_v3 = vld [vmem:[#allocation13_spill] sm:$0xff]  ;;  %v9371_v42 = vpop.f32.mrf.mxu0 }
 0x263   :  { %4253 = vmatpush1.bf16.msra.mxu1 %v6556_v58  ;;  %4334 = vmatpush1.bf16.msra.mxu0 %v6559_v2  ;;  %v6571_v58 = vld [vmem:[%s11438_s3 + $0x8e0] ss:$8 sps:$4 sm:$0xff]   ;;  %v6576_v2 = vld [vmem:[%s11438_s3 + $0x714] ss:$8 sps:$4 sm:$0xff]  }
 0x264   :  { %4254 = vmatprep.subr.bf16.mxu1 %v6564_v50  ;;  %4335 = vmatprep.subr.bf16.mxu0 %v6567_v44  ;;  %v6579_v50 = vld [vmem:[%s11438_s3 + $0x8d4] ss:$8 sps:$4 sm:$0xff]   ;;  %v9386_v44 = vpop.f32.mrf.mxu0 }
 0x265   :  { %4153 = vmatmul.mubr.bf16.gmra.mxu1 %v11616_v3  ;;  %v11618_v3 = vld [vmem:[#allocation20_spill] sm:$0xff] }
 0x266   :  { %4162 = vmatprep.mubr.bf16.mxu1 %v11617_v52  ;;  %v9401_v52 = vpop.f32.mrf.mxu0 }
 0x267   :  { %4255 = vmatpush1.bf16.msra.mxu1 %v6562_v32  ;;  %4336 = vmatpush2.bf16.msra.mxu0 %v6565_v41  ;;  %v6574_v32 = vld [vmem:[%s11438_s3 + $0x710] ss:$8 sps:$4 sm:$0xff]  }
 0x268   :  { %4256 = vmatprep.subr.bf16.mxu1 %v6570_v10  ;;  %4337 = vmatprep.subr.bf16.mxu0 %v6573_v4  ;;  %v6577_v41 = vld [vmem:[%s11438_s3 + $0x8d0] ss:$8 sps:$4 sm:$0xff]   ;;  %v6582_v10 = vld [vmem:[%s11438_s3 + $0x704] ss:$8 sps:$4 sm:$0xff]  }
 0x269   :  { %v6585_v4 = vld [vmem:[%s11438_s3 + $0x8c4] ss:$8 sps:$4 sm:$0xff]  }
 0x26b   :  { %4257 = vmatpush1.bf16.msra.mxu1 %v6568_v23  ;;  %4338 = vmatpush2.bf16.msra.mxu0 %v6571_v58  ;;  %v11619_v23 = vld [vmem:[#allocation19_spill] sm:$0xff] }
 0x26c   :  { %4258 = vmatprep.subr.bf16.mxu1 %v6576_v2  ;;  %4339 = vmatprep.subr.bf16.mxu0 %v6579_v50  ;;  %v6580_v58 = vld [vmem:[%s11438_s3 + $0x700] ss:$8 sps:$4 sm:$0xff]   ;;  %v6588_v50 = vld [vmem:[%s11438_s3 + $0x7f4] ss:$8 sps:$4 sm:$0xff]  }
 0x26d   :  { %4163 = vmatmul.mubr.bf16.gmra.mxu1 %v11618_v3  ;;  %v6583_v2 = vld [vmem:[%s11438_s3 + $0x8c0] ss:$8 sps:$4 sm:$0xff]   ;;  %v6591_v3 = vld [vmem:[%s11438_s3 + $0x8b4] ss:$8 sps:$4 sm:$0xff]  }
 0x26e   :  { %5969 = vmatprep.mubr.msk.bf16.mxu1 %vm8401_vm2, %v11619_v23 }
 0x26f   :  { %4259 = vmatpush1.bf16.msra.mxu1 %v6574_v32  ;;  %4340 = vmatpush2.bf16.msra.mxu0 %v6577_v41  ;;  %v9418_v32 = vpop.f32.mrf.mxu0  ;;  %v6586_v41 = vld [vmem:[%s11438_s3 + $0x7f0] ss:$8 sps:$4 sm:$0xff]  }
 0x270   :  { %4260 = vmatprep.subr.bf16.mxu1 %v6582_v10  ;;  %4341 = vmatprep.subr.bf16.mxu0 %v6585_v4  ;;  %11620 = vst [vmem:[#allocation16_spill] sm:$0xff] %v9418_v32  ;;  %v6589_v10 = vld [vmem:[%s11438_s3 + $0x8b0] ss:$8 sps:$4 sm:$0xff]   ;;  %v6594_v4 = vld [vmem:[%s11438_s3 + $0x7e4] ss:$8 sps:$4 sm:$0xff]  }
 0x271   :  { %v6597_v32 = vld [vmem:[%s11438_s3 + $0x8a4] ss:$8 sps:$4 sm:$0xff]  }
 0x273   :  { %4261 = vmatpush1.bf16.msra.mxu1 %v6580_v58  ;;  %4342 = vmatpush2.bf16.msra.mxu0 %v6583_v2  ;;  %v9432_v58 = vpop.f32.mrf.mxu0  ;;  %v6592_v2 = vld [vmem:[%s11438_s3 + $0x7e0] ss:$8 sps:$4 sm:$0xff]  }
 0x274   :  { %4262 = vmatprep.subr.bf16.mxu1 %v6588_v50  ;;  %4343 = vmatprep.subr.bf16.mxu0 %v6591_v3  ;;  %v6595_v50 = vld [vmem:[%s11438_s3 + $0x8a0] ss:$8 sps:$4 sm:$0xff]   ;;  %v6600_v3 = vld [vmem:[%s11438_s3 + $0x7d4] ss:$8 sps:$4 sm:$0xff]  }
 0x277   :  { %4263 = vmatpush2.bf16.msra.mxu1 %v6586_v41  ;;  %4344 = vmatpush2.bf16.msra.mxu0 %v6589_v10  ;;  %v9446_v41 = vpop.f32.mrf.mxu0  ;;  %v6598_v10 = vld [vmem:[%s11438_s3 + $0x7d0] ss:$8 sps:$4 sm:$0xff]  }
 0x278   :  { %4264 = vmatprep.subr.bf16.mxu1 %v6594_v4  ;;  %4345 = vmatprep.subr.bf16.mxu0 %v6597_v32  ;;  %v6601_v32 = vld [vmem:[%s11438_s3 + $0x890] ss:$8 sps:$4 sm:$0xff]   ;;  %v6606_v4 = vld [vmem:[%s11438_s3 + $0x7c4] ss:$8 sps:$4 sm:$0xff]  }
 0x27b   :  { %4265 = vmatpush2.bf16.msra.mxu1 %v6592_v2  ;;  %4346 = vmatpush2.bf16.msra.mxu0 %v6595_v50  ;;  %v9460_v2 = vpop.f32.mrf.mxu0  ;;  %v6604_v50 = vld [vmem:[%s11438_s3 + $0x7c0] ss:$8 sps:$4 sm:$0xff]  }
 0x27c   :  { %4266 = vmatprep.subr.bf16.mxu1 %v6600_v3  ;;  %4347 = vmatprep.subr.bf16.mxu0 %v6603_v56  ;;  %v6607_v56 = vld [vmem:[%s11438_s3 + $0x880] ss:$8 sps:$4 sm:$0xff]   ;;  %v6612_v3 = vld [vmem:[%s11438_s3 + $0x7b4] ss:$8 sps:$4 sm:$0xff]  }
 0x27d   :  { %v9471_v25 = vpop.f32.mrf.mxu0 }
 0x27e   :  { %11621 = vst [vmem:[#allocation14_spill] sm:$0xff] %v9471_v25 }
 0x27f   :  { %4267 = vmatpush2.bf16.msra.mxu1 %v6598_v10  ;;  %4348 = vmatpush2.bf16.msra.mxu0 %v6601_v32  ;;  %v6610_v10 = vld [vmem:[%s11438_s3 + $0x7b0] ss:$8 sps:$4 sm:$0xff]  }
 0x280   :  { %4268 = vmatprep.subr.bf16.mxu1 %v6606_v4  ;;  %4349 = vmatprep.subr.bf16.mxu0 %v6609_v22  ;;  %v6615_v22 = vld [vmem:[%s11438_s3 + $0x7a4] ss:$8 sps:$4 sm:$0xff]  }
 0x283   :  { %4269 = vmatpush2.bf16.msra.mxu1 %v6604_v50  ;;  %4350 = vmatpush2.bf16.msra.mxu0 %v6607_v56  ;;  %v2954_v32 = vpop.f32.mrf.mxu0  ;;  %v6613_v50 = vld [vmem:[%s11438_s3 + $0x7a0] ss:$8 sps:$4 sm:$0xff]  }
 0x284   :  { %4270 = vmatprep.subr.bf16.mxu1 %v6612_v3  ;;  %4481 = vmatprep.subr.bf16.mxu0 %v6675_v14  ;;  %v6676_v14 = vld [vmem:[%s11438_s3 + $0x70] ss:$8 sps:$4 sm:$0xff]   ;;  %v6618_v3 = vld [vmem:[%s11438_s3 + $0x794] ss:$8 sps:$4 sm:$0xff]  }
 0x285   :  { %v2956_v4 = vpop.f32.mrf.mxu0 }
 0x286   :  { %5996 = vmatmul.mubr.msk.bf16.vlgmr.msra.gmra.mxu0 %vm8401_vm2, %v8551_v8 }
 0x287   :  { %4271 = vmatpush2.bf16.msra.mxu1 %v6610_v10  ;;  %5999 = vmatprep.mubr.msk.bf16.mxu0 %vm8561_vm4, %v8653_v30  ;;  %v2958_v56 = vpop.f32.mrf.mxu0  ;;  %v6677_v10 = vld [vmem:[%s11438_s3 + $0x64] ss:$8 sps:$4 sm:$0xff]  }
 0x288   :  { %4482 = vmatpush1.bf16.msra.mxu0 %v6676_v14  ;;  %4272 = vmatprep.subr.bf16.mxu1 %v6615_v22  ;;  %v6678_v22 = vld [vmem:[%s11438_s3 + $0x60] ss:$8 sps:$4 sm:$0xff]  }
 0x289   :  { %4483 = vmatprep.subr.bf16.mxu0 %v6677_v10  ;;  %v9500_v25 = vpop.f32.mrf.mxu0 }
 0x28a   :  { %11622 = vst [vmem:[#allocation17_spill] sm:$0xff] %v9500_v25 }
 0x28b   :  { %4273 = vmatpush2.bf16.msra.mxu1 %v6613_v50  ;;  %v9508_v14 = vpop.f32.mrf.mxu0  ;;  %v6679_v50 = vld [vmem:[%s11438_s3 + $0x54] ss:$8 sps:$4 sm:$0xff]  }
 0x28c   :  { %4484 = vmatpush1.bf16.msra.mxu0 %v6678_v22  ;;  %4274 = vmatprep.subr.bf16.mxu1 %v6618_v3  ;;  %v6619_v3 = vld [vmem:[%s11438_s3 + $0x780] ss:$8 sps:$4 sm:$0xff]   ;;  %v6680_v22 = vld [vmem:[%s11438_s3 + $0x50] ss:$8 sps:$4 sm:$0xff]  }
 0x28d   :  { %4485 = vmatprep.subr.bf16.mxu0 %v6679_v50  ;;  %v9519_v10 = vpop.f32.mrf.mxu0  ;;  %v6624_v50 = vld [vmem:[%s11438_s3 + $0x974] ss:$8 sps:$4 sm:$0xff]  }
 0x28e   :  { %6002 = vmatmul.mubr.msk.bf16.gmra.mxu0 %vm8561_vm4, %v8615_v12 }
 0x28f   :  { %4275 = vmatpush2.bf16.msra.mxu1 %v6616_v6  ;;  %6005 = vmatprep.mubr.msk.bf16.mxu0 %vm8628_vm5, %v8736_v19  ;;  %v6681_v6 = vld [vmem:[%s11438_s3 + $0x44] ss:$8 sps:$4 sm:$0xff]   ;;  %v9536_v25 = vpop.f32.mrf.mxu0 }
 0x290   :  { %4486 = vmatpush1.bf16.msra.mxu0 %v6680_v22  ;;  %4276 = vmatprep.subr.bf16.mxu1 %v6621_v46  ;;  %v6622_v46 = vld [vmem:[%s11438_s3 + $0x970] ss:$8 sps:$4 sm:$0xff]  }
 0x291   :  { %4487 = vmatprep.subr.bf16.mxu0 %v6681_v6  ;;  %v6683_v6 = vld [vmem:[%s11438_s3 + $0x34] ss:$8 sps:$4 sm:$0xff]   ;;  %v9551_v54 = vpop.f32.mrf.mxu0 }
 0x292   :  { %11623 = vst [vmem:[#allocation15_spill] sm:$0xff] %v9551_v54 }
 0x293   :  { %4277 = vmatpush2.bf16.msra.mxu1 %v6619_v3  ;;  %v6627_v3 = vld [vmem:[%s11438_s3 + $0x964] ss:$8 sps:$4 sm:$0xff]  }
 0x294   :  { %v2881_v18 = vpop.f32.mrf.mxu1  ;;  %4488 = vmatpush1.bf16.msra.mxu0 %v6682_v26  ;;  %4392 = vmatprep.subr.bf16.mxu1 %v6624_v50  ;;  %v6684_v50 = vld [vmem:[%s11438_s3 + $0x30] ss:$8 sps:$4 sm:$0xff]  }
 0x295   :  { %v2882_v22 = vadd.f32 %v2881_v18, %v9245_v17  ;;  %4489 = vmatprep.subr.bf16.mxu0 %v6683_v6  ;;  %v6630_v6 = vld [vmem:[%s11438_s3 + $0x954] ss:$8 sps:$4 sm:$0xff]  }
 0x296   :  { %v2883_v9 = vpop.f32.mrf.mxu1  ;;  %5972 = vmatmul.mubr.msk.bf16.vlgmr.msra.gmra.mxu1 %vm8401_vm2, %v8119_v29  ;;  %6008 = vmatmul.mubr.msk.bf16.gmra.mxu0 %vm8628_vm5, %v8729_v34 }
 0x297   :  { %v2884_v26 = vadd.f32 %v2883_v9, %v9260_v24  ;;  %v9560_v18 = vadd.f32 %v2954_v32, %v2882_v22  ;;  %5975 = vmatprep.mubr.msk.bf16.mxu1 %vm8561_vm4, %v8172_v40  ;;  %6011 = vmatprep.mubr.msk.bf16.mxu0 %vm8712_vm6, %v8820_v45  ;;  %v6625_v9 = vld [vmem:[%s11438_s3 + $0x960] ss:$8 sps:$4 sm:$0xff]   ;;  %v6685_v22 = vld [vmem:[%s11438_s3 + $0x24] ss:$8 sps:$4 sm:$0xff]  }
 0x298   :  { %v2885_v17 = vpop.f32.mrf.mxu1  ;;  %4393 = vmatpush1.bf16.msra.mxu1 %v6622_v46  ;;  %4490 = vmatpush1.bf16.msra.mxu0 %v6684_v50  ;;  %v2974_v50 = vpop.f32.mrf.mxu0 }
 0x299   :  { %v2886_v24 = vadd.f32 %v2885_v17, %v9275_v0  ;;  %v9575_v32 = vadd.f32 %v2956_v4, %v2884_v26  ;;  %4394 = vmatprep.subr.bf16.mxu1 %v6627_v3  ;;  %4491 = vmatprep.subr.bf16.mxu0 %v6685_v22  ;;  %v6686_v0 = vld [vmem:[%s11438_s3 + $0x20] ss:$8 sps:$4 sm:$0xff]   ;;  %v6628_v4 = vld [vmem:[%s11438_s3 + $0x950] ss:$8 sps:$4 sm:$0xff]   ;;  %v6687_v26 = vld [vmem:[%s11438_s3 + $0x14] ss:$8 sps:$4 sm:$0xff]  }
 0x29a   :  { %v9580_v46 = vpop.f32.mrf.mxu1  ;;  %v6633_v17 = vld [vmem:[%s11438_s3 + $0x944] ss:$8 sps:$4 sm:$0xff]  }
 0x29b   :  { %11624 = vst [vmem:[#allocation8_spill] sm:$0xff] %v9580_v46  ;;  %v9585_v54 = vadd.f32 %v2958_v56, %v2886_v24  ;;  %v6784_v46 = vld [vmem:[%s11438_s3 + $0x424] ss:$8 sps:$4 sm:$0xff]  }
 0x29c   :  { %4395 = vmatpush1.bf16.msra.mxu1 %v6625_v9  ;;  %4492 = vmatpush1.bf16.msra.mxu0 %v6686_v0  ;;  %v2891_v3 = vpop.f32.mrf.mxu1  ;;  %v2976_v9 = vpop.f32.mrf.mxu0  ;;  %v6631_v0 = vld [vmem:[%s11438_s3 + $0x940] ss:$8 sps:$4 sm:$0xff]  }
 0x29d   :  { %4396 = vmatprep.subr.bf16.mxu1 %v6630_v6  ;;  %4493 = vmatprep.subr.bf16.mxu0 %v6687_v26  ;;  %v2892_v56 = vadd.f32 %v2891_v3, %v9306_v61  ;;  %v6688_v6 = vld [vmem:[%s11438_s3 + $0x10] ss:$8 sps:$4 sm:$0xff]   ;;  %v6689_v26 = vld [vmem:[%s11438_s3 + $0x4] ss:$8 sps:$4 sm:$0xff]  }
 0x29e   :  { %5978 = vmatmul.mubr.msk.bf16.gmra.mxu1 %vm8561_vm4, %v8168_v39  ;;  %6014 = vmatmul.mubr.msk.bf16.gmra.mxu0 %vm8712_vm6, %v8782_v38  ;;  %v2893_v24 = vpop.f32.mrf.mxu1 }
 0x29f   :  { %5981 = vmatprep.mubr.msk.bf16.mxu1 %vm8628_vm5, %v8256_v53  ;;  %4513 = vmatprep.mubr.bf16.mxu0 %v8676_v60  ;;  %v2894_v61 = vadd.f32 %v2893_v24, %v9322_v27  ;;  %v9612_v22 = vadd.f32 %v9508_v14, %v2892_v56  ;;  %v6636_v14 = vld [vmem:[%s11438_s3 + $0x934] ss:$8 sps:$4 sm:$0xff]   ;;  %v2978_v56 = vpop.f32.mrf.mxu0 }
 0x2a0   :  { %4397 = vmatpush1.bf16.msra.mxu1 %v6628_v4  ;;  %4494 = vmatpush1.bf16.msra.mxu0 %v6688_v6  ;;  %v2895_v3 = vpop.f32.mrf.mxu1 }
 0x2a1   :  { %4398 = vmatprep.subr.bf16.mxu1 %v6633_v17  ;;  %4495 = vmatprep.subr.bf16.mxu0 %v6689_v26  ;;  %v2896_v27 = vadd.f32 %v2895_v3, %v9338_v55  ;;  %v9628_v4 = vadd.f32 %v9519_v10, %v2894_v61  ;;  %v6690_v17 = vld [vmem:[%s11438_s3] ss:$8 sps:$4 sm:$0xff]   ;;  %v6634_v55 = vld [vmem:[%s11438_s3 + $0x930] ss:$8 sps:$4 sm:$0xff]   ;;  %v6691_v10 = vld [vmem:[%s11438_s3 + $0xf4] ss:$8 sps:$4 sm:$0xff]  }
 0x2a2   :  { %v9630_v24 = vpop.f32.mrf.mxu1  ;;  %v6639_v61 = vld [vmem:[%s11438_s3 + $0x924] ss:$8 sps:$4 sm:$0xff]  }
 0x2a3   :  { %11625 = vst [vmem:[#allocation9_spill] sm:$0xff] %v9630_v24  ;;  %v9633_v6 = vadd.f32 %v9536_v25, %v2896_v27 }
 0x2a4   :  { %4399 = vmatpush1.bf16.msra.mxu1 %v6631_v0  ;;  %4496 = vmatpush1.bf16.msra.mxu0 %v6690_v17  ;;  %v2901_v3 = vpop.f32.mrf.mxu1  ;;  %v9648_v0 = vpop.f32.mrf.mxu0  ;;  %v6637_v17 = vld [vmem:[%s11438_s3 + $0x920] ss:$8 sps:$4 sm:$0xff]  }
 0x2a5   :  { %4400 = vmatprep.subr.bf16.mxu1 %v6636_v14  ;;  %4497 = vmatprep.subr.bf16.mxu0 %v6691_v10  ;;  %v2902_v25 = vadd.f32 %v2901_v3, %v9371_v42  ;;  %11626 = vst [vmem:[#allocation4_spill] sm:$0xff] %v9648_v0  ;;  %v6692_v42 = vld [vmem:[%s11438_s3 + $0xf0] ss:$8 sps:$4 sm:$0xff]   ;;  %v6693_v10 = vld [vmem:[%s11438_s3 + $0xe4] ss:$8 sps:$4 sm:$0xff]  }
 0x2a6   :  { %5984 = vmatmul.mubr.msk.bf16.gmra.mxu1 %vm8628_vm5, %v8243_v59  ;;  %v2903_v26 = vpop.f32.mrf.mxu1 }
 0x2a7   :  { %5987 = vmatprep.mubr.msk.bf16.mxu1 %vm8712_vm6, %v8314_v15  ;;  %v2904_v27 = vadd.f32 %v2903_v26, %v9386_v44  ;;  %v9657_v14 = vadd.f32 %v2974_v50, %v2902_v25  ;;  %v6642_v50 = vld [vmem:[%s11438_s3 + $0x914] ss:$8 sps:$4 sm:$0xff]   ;;  %v2984_v25 = vpop.f32.mrf.mxu0 }
 0x2a8   :  { %4401 = vmatpush1.bf16.msra.mxu1 %v6634_v55  ;;  %4498 = vmatpush2.bf16.msra.mxu0 %v6692_v42  ;;  %v2905_v3 = vpop.f32.mrf.mxu1 }
 0x2a9   :  { %4402 = vmatprep.subr.bf16.mxu1 %v6639_v61  ;;  %4499 = vmatprep.subr.bf16.mxu0 %v6693_v10  ;;  %v2906_v44 = vadd.f32 %v2905_v3, %v9401_v52  ;;  %v9672_v55 = vadd.f32 %v2976_v9, %v2904_v27  ;;  %v6694_v61 = vld [vmem:[%s11438_s3 + $0xe0] ss:$8 sps:$4 sm:$0xff]   ;;  %v6640_v52 = vld [vmem:[%s11438_s3 + $0x910] ss:$8 sps:$4 sm:$0xff]   ;;  %v6695_v9 = vld [vmem:[%s11438_s3 + $0xd4] ss:$8 sps:$4 sm:$0xff]  }
 0x2aa   :  { %v9674_v26 = vpop.f32.mrf.mxu1  ;;  %v6645_v27 = vld [vmem:[%s11438_s3 + $0x904] ss:$8 sps:$4 sm:$0xff]  }
 0x2ab   :  { %11627 = vst [vmem:[#allocation6_spill] sm:$0xff] %v9674_v26  ;;  %v9676_v42 = vadd.f32 %v2978_v56, %v2906_v44 }
 0x2ac   :  { %4403 = vmatpush1.bf16.msra.mxu1 %v6637_v17  ;;  %4500 = vmatpush2.bf16.msra.mxu0 %v6694_v61  ;;  %v2911_v3 = vpop.f32.mrf.mxu1  ;;  %v2986_v17 = vpop.f32.mrf.mxu0  ;;  %v6643_v61 = vld [vmem:[%s11438_s3 + $0x900] ss:$8 sps:$4 sm:$0xff]  }
 0x2ad   :  { %4404 = vmatprep.subr.bf16.mxu1 %v6642_v50  ;;  %4501 = vmatprep.subr.bf16.mxu0 %v6695_v9  ;;  %v2912_v56 = vadd.f32 %v2911_v3, %v9432_v58  ;;  %v6696_v58 = vld [vmem:[%s11438_s3 + $0xd0] ss:$8 sps:$4 sm:$0xff]   ;;  %v6697_v9 = vld [vmem:[%s11438_s3 + $0xc4] ss:$8 sps:$4 sm:$0xff]  }
 0x2ae   :  { %5990 = vmatmul.mubr.msk.bf16.gmra.mxu1 %vm8712_vm6, %v8294_v37  ;;  %v2913_v10 = vpop.f32.mrf.mxu1 }
 0x2af   :  { %4424 = vmatprep.mubr.bf16.mxu1 %v11585_v7  ;;  %v2914_v44 = vadd.f32 %v2913_v10, %v9446_v41  ;;  %v9696_v50 = vadd.f32 %v2984_v25, %v2912_v56  ;;  %v6648_v25 = vld [vmem:[%s11438_s3 + $0x9f4] ss:$8 sps:$4 sm:$0xff]   ;;  %v2988_v56 = vpop.f32.mrf.mxu0 }
 0x2b0   :  { %4405 = vmatpush1.bf16.msra.mxu1 %v6640_v52  ;;  %4502 = vmatpush2.bf16.msra.mxu0 %v6696_v58  ;;  %v2915_v3 = vpop.f32.mrf.mxu1  ;;  %v6646_v58 = vld [vmem:[%s11438_s3 + $0x9f0] ss:$8 sps:$4 sm:$0xff]  }
 0x2b1   :  { %4406 = vmatprep.subr.bf16.mxu1 %v6645_v27  ;;  %4503 = vmatprep.subr.bf16.mxu0 %v6697_v9  ;;  %v2916_v41 = vadd.f32 %v2915_v3, %v9460_v2  ;;  %v9711_v52 = vadd.f32 %v2986_v17, %v2914_v44  ;;  %v6698_v27 = vld [vmem:[%s11438_s3 + $0xc0] ss:$8 sps:$4 sm:$0xff]   ;;  %v6699_v2 = vld [vmem:[%s11438_s3 + $0xb4] ss:$8 sps:$4 sm:$0xff]   ;;  %v6651_v17 = vld [vmem:[%s11438_s3 + $0x9e4] ss:$8 sps:$4 sm:$0xff]  }
 0x2b2   :  { %v6700_v44 = vld [vmem:[%s11438_s3 + $0xb0] ss:$8 sps:$4 sm:$0xff]   ;;  %v6701_v3 = vld [vmem:[%s11438_s3 + $0xa4] ss:$8 sps:$4 sm:$0xff]   ;;  %v6654_v9 = vld [vmem:[%s11438_s3 + $0x9d4] ss:$8 sps:$4 sm:$0xff]   ;;  %v9817_v0 = vpop.f32.mrf.mxu1 }
 0x2b3   :  { %v9713_v10 = vadd.f32 %v2988_v56, %v2916_v41  ;;  %v6702_v41 = vld [vmem:[%s11438_s3 + $0xa0] ss:$8 sps:$4 sm:$0xff]   ;;  %v6703_v56 = vld [vmem:[%s11438_s3 + $0x94] ss:$8 sps:$4 sm:$0xff]   ;;  %11630 = vst [vmem:[#allocation18_spill] sm:$0xff] %v9817_v0 }
 0x2b4   :  { %4407 = vmatpush1.bf16.msra.mxu1 %v6643_v61  ;;  %4504 = vmatpush2.bf16.msra.mxu0 %v6698_v27  ;;  %v6649_v61 = vld [vmem:[%s11438_s3 + $0x9e0] ss:$8 sps:$4 sm:$0xff]   ;;  %v6657_v27 = vld [vmem:[%s11438_s3 + $0x9c4] ss:$8 sps:$4 sm:$0xff]  }
 0x2b5   :  { %4408 = vmatprep.subr.bf16.mxu1 %v6648_v25  ;;  %4505 = vmatprep.subr.bf16.mxu0 %v6699_v2  ;;  %v6652_v25 = vld [vmem:[%s11438_s3 + $0x9d0] ss:$8 sps:$4 sm:$0xff]   ;;  %v6655_v2 = vld [vmem:[%s11438_s3 + $0x9c0] ss:$8 sps:$4 sm:$0xff]  }
 0x2b8   :  { %4409 = vmatpush2.bf16.msra.mxu1 %v6646_v58  ;;  %4506 = vmatpush2.bf16.msra.mxu0 %v6700_v44  ;;  %v6704_v58 = vld [vmem:[%s11438_s3 + $0x90] ss:$8 sps:$4 sm:$0xff]   ;;  %v6660_v44 = vld [vmem:[%s11438_s3 + $0x9b4] ss:$8 sps:$4 sm:$0xff]  }
 0x2b9   :  { %4410 = vmatprep.subr.bf16.mxu1 %v6651_v17  ;;  %4507 = vmatprep.subr.bf16.mxu0 %v6701_v3  ;;  %v6705_v17 = vld [vmem:[%s11438_s3 + $0x84] ss:$8 sps:$4 sm:$0xff]   ;;  %v6706_v3 = vld [vmem:[%s11438_s3 + $0x80] ss:$8 sps:$4 sm:$0xff]  }
 0x2bc   :  { %4411 = vmatpush2.bf16.msra.mxu1 %v6649_v61  ;;  %4508 = vmatpush2.bf16.msra.mxu0 %v6702_v41  ;;  %v9763_v61 = vpop.f32.mrf.mxu0  ;;  %v6658_v41 = vld [vmem:[%s11438_s3 + $0x9b0] ss:$8 sps:$4 sm:$0xff]  }
 0x2bd   :  { %4412 = vmatprep.subr.bf16.mxu1 %v6654_v9  ;;  %4509 = vmatprep.subr.bf16.mxu0 %v6703_v56  ;;  %11628 = vst [vmem:[#allocation10_spill] sm:$0xff] %v9763_v61  ;;  %v6663_v56 = vld [vmem:[%s11438_s3 + $0x9a4] ss:$8 sps:$4 sm:$0xff]   ;;  %v6664_v61 = vld [vmem:[%s11438_s3 + $0x990] ss:$8 sps:$4 sm:$0xff]  }
 0x2c0   :  { %4413 = vmatpush2.bf16.msra.mxu1 %v6652_v25  ;;  %4510 = vmatpush2.bf16.msra.mxu0 %v6704_v58  ;;  %v6707_v25 = vld [vmem:[%s11438_s3 + $0x274] ss:$8 sps:$4 sm:$0xff]  }
 0x2c1   :  { %4414 = vmatprep.subr.bf16.mxu1 %v6657_v27  ;;  %4511 = vmatprep.subr.bf16.mxu0 %v6705_v17  ;;  %v6708_v17 = vld [vmem:[%s11438_s3 + $0x270] ss:$8 sps:$4 sm:$0xff]  }
 0x2c4   :  { %4415 = vmatpush2.bf16.msra.mxu1 %v6655_v2  ;;  %4512 = vmatpush2.bf16.msra.mxu0 %v6706_v3  ;;  %v3100_v9 = vpop.f32.mrf.mxu0  ;;  %v6661_v2 = vld [vmem:[%s11438_s3 + $0x9a0] ss:$8 sps:$4 sm:$0xff]   ;;  %v6709_v3 = vld [vmem:[%s11438_s3 + $0x264] ss:$8 sps:$4 sm:$0xff]  }
 0x2c5   :  { %4416 = vmatprep.subr.bf16.mxu1 %v6660_v44  ;;  %4627 = vmatprep.subr.bf16.mxu0 %v6707_v25  ;;  %v6666_v44 = vld [vmem:[%s11438_s3 + $0x994] ss:$8 sps:$4 sm:$0xff]  }
 0x2c6   :  { %v3102_v27 = vpop.f32.mrf.mxu0 }
 0x2c7   :  { %4514 = vmatmul.mubr.bf16.vlgmr.msra.gmra.mxu0 %v8719_v33 }
 0x2c8   :  { %4417 = vmatpush2.bf16.msra.mxu1 %v6658_v41  ;;  %4523 = vmatprep.mubr.bf16.mxu0 %v8800_v5  ;;  %v3104_v58 = vpop.f32.mrf.mxu0 }
 0x2c9   :  { %4628 = vmatpush1.bf16.msra.mxu0 %v6708_v17  ;;  %4418 = vmatprep.subr.bf16.mxu1 %v6663_v56  ;;  %v6710_v56 = vld [vmem:[%s11438_s3 + $0x260] ss:$8 sps:$4 sm:$0xff]   ;;  %v6669_v17 = vld [vmem:[%s11438_s3 + $0x984] ss:$8 sps:$4 sm:$0xff]  }
 0x2ca   :  { %4629 = vmatprep.subr.bf16.mxu0 %v6709_v3  ;;  %v9791_v41 = vpop.f32.mrf.mxu0 }
 0x2cb   :  { %11629 = vst [vmem:[#allocation13_spill] sm:$0xff] %v9791_v41  ;;  %v6714_v41 = vld [vmem:[%s11438_s3 + $0x240] ss:$8 sps:$4 sm:$0xff]  }
 0x2cc   :  { %4419 = vmatpush2.bf16.msra.mxu1 %v6661_v2  ;;  %v9793_v25 = vpop.f32.mrf.mxu0  ;;  %v6711_v2 = vld [vmem:[%s11438_s3 + $0x254] ss:$8 sps:$4 sm:$0xff]  }
 0x2cd   :  { %4630 = vmatpush1.bf16.msra.mxu0 %v6710_v56  ;;  %4420 = vmatprep.subr.bf16.mxu1 %v6666_v44  ;;  %v6667_v44 = vld [vmem:[%s11438_s3 + $0x980] ss:$8 sps:$4 sm:$0xff]   ;;  %v6712_v56 = vld [vmem:[%s11438_s3 + $0x250] ss:$8 sps:$4 sm:$0xff]  }
 0x2ce   :  { %4631 = vmatprep.subr.bf16.mxu0 %v6711_v2  ;;  %v9807_v3 = vpop.f32.mrf.mxu0 }
 0x2cf   :  { %4524 = vmatmul.mubr.bf16.gmra.mxu0 %v8808_v57 }
 0x2d0   :  { %4421 = vmatpush2.bf16.msra.mxu1 %v6664_v61  ;;  %4533 = vmatprep.mubr.bf16.mxu0 %v8835_v47  ;;  %v9819_v2 = vpop.f32.mrf.mxu0  ;;  %v6713_v61 = vld [vmem:[%s11438_s3 + $0x244] ss:$8 sps:$4 sm:$0xff]  }
 0x2d1   :  { %4632 = vmatpush1.bf16.msra.mxu0 %v6712_v56  ;;  %4422 = vmatprep.subr.bf16.mxu1 %v6669_v17  ;;  %v6715_v17 = vld [vmem:[%s11438_s3 + $0x174] ss:$8 sps:$4 sm:$0xff]  }
 0x2d2   :  { %4633 = vmatprep.subr.bf16.mxu0 %v6713_v61  ;;  %v9831_v56 = vpop.f32.mrf.mxu0  ;;  %v6716_v61 = vld [vmem:[%s11438_s3 + $0x234] ss:$8 sps:$4 sm:$0xff]  }
 0x2d3   :  { %11631 = vst [vmem:[#allocation20_spill] sm:$0xff] %v9831_v56 }
 0x2d4   :  { %4423 = vmatpush2.bf16.msra.mxu1 %v6667_v44  ;;  %v3027_v26 = vpop.f32.mrf.mxu1 }
 0x2d5   :  { %4634 = vmatpush1.bf16.msra.mxu0 %v6714_v41  ;;  %v3028_v24 = vadd.f32 %v3027_v26, %v9560_v18  ;;  %4554 = vmatprep.subr.bf16.mxu1 %v6715_v17  ;;  %v6717_v41 = vld [vmem:[%s11438_s3 + $0x170] ss:$8 sps:$4 sm:$0xff]  }
 0x2d6   :  { %4635 = vmatprep.subr.bf16.mxu0 %v6716_v61  ;;  %v3029_v44 = vpop.f32.mrf.mxu1  ;;  %v6719_v61 = vld [vmem:[%s11438_s3 + $0x164] ss:$8 sps:$4 sm:$0xff]  }
 0x2d7   :  { %v9836_v0 = vadd.f32 %v3100_v9, %v3028_v24  ;;  %4425 = vmatmul.mubr.bf16.vlgmr.msra.gmra.mxu1 %v11601_v16  ;;  %4534 = vmatmul.mubr.bf16.gmra.mxu0 %v8868_v20  ;;  %v3030_v18 = vadd.f32 %v3029_v44, %v9575_v32  ;;  %v6718_v24 = vld [vmem:[%s11438_s3 + $0x230] ss:$8 sps:$4 sm:$0xff]   ;;  %v3120_v32 = vpop.f32.mrf.mxu0  ;;  %v6720_v44 = vld [vmem:[%s11438_s3 + $0x224] ss:$8 sps:$4 sm:$0xff]  }
 0x2d8   :  { %4434 = vmatprep.mubr.bf16.mxu1 %v11602_v13  ;;  %4543 = vmatprep.mubr.bf16.mxu0 %v8899_v1  ;;  %v3031_v26 = vpop.f32.mrf.mxu1 }
 0x2d9   :  { %4555 = vmatpush1.bf16.msra.mxu1 %v6717_v41  ;;  %4636 = vmatpush1.bf16.msra.mxu0 %v6718_v24  ;;  %v9849_v9 = vadd.f32 %v3102_v27, %v3030_v18  ;;  %v3032_v17 = vadd.f32 %v3031_v26, %v9585_v54  ;;  %v6721_v54 = vld [vmem:[%s11438_s3 + $0x160] ss:$8 sps:$4 sm:$0xff]   ;;  %v3122_v26 = vpop.f32.mrf.mxu0 }
 0x2da   :  { %4556 = vmatprep.subr.bf16.mxu1 %v6719_v61  ;;  %4637 = vmatprep.subr.bf16.mxu0 %v6720_v44  ;;  %v9858_v41 = vpop.f32.mrf.mxu1  ;;  %v6722_v27 = vld [vmem:[%s11438_s3 + $0x220] ss:$8 sps:$4 sm:$0xff]   ;;  %v6723_v61 = vld [vmem:[%s11438_s3 + $0x154] ss:$8 sps:$4 sm:$0xff]  }
 0x2db   :  { %11632 = vst [vmem:[#allocation19_spill] sm:$0xff] %v9858_v41  ;;  %v9860_v56 = vadd.f32 %v3104_v58, %v3032_v17  ;;  %v6724_v58 = vld [vmem:[%s11438_s3 + $0x214] ss:$8 sps:$4 sm:$0xff]   ;;  %v6778_v41 = vld [vmem:[%s11438_s3 + $0x440] ss:$8 sps:$4 sm:$0xff]  }
 0x2dc   :  { %v3037_v24 = vpop.f32.mrf.mxu1 }
 0x2dd   :  { %4557 = vmatpush1.bf16.msra.mxu1 %v6721_v54  ;;  %4638 = vmatpush1.bf16.msra.mxu0 %v6722_v27  ;;  %v3038_v18 = vadd.f32 %v3037_v24, %v9612_v22  ;;  %v6725_v54 = vld [vmem:[%s11438_s3 + $0x150] ss:$8 sps:$4 sm:$0xff]  }
 0x2de   :  { %4558 = vmatprep.subr.bf16.mxu1 %v6723_v61  ;;  %4639 = vmatprep.subr.bf16.mxu0 %v6724_v58  ;;  %v3039_v17 = vpop.f32.mrf.mxu1  ;;  %v6727_v61 = vld [vmem:[%s11438_s3 + $0x144] ss:$8 sps:$4 sm:$0xff]  }
 0x2df   :  { %v9876_v44 = vadd.f32 %v9793_v25, %v3038_v18  ;;  %4435 = vmatmul.mubr.bf16.gmra.mxu1 %v11603_v62  ;;  %4544 = vmatmul.mubr.bf16.gmra.mxu0 %v8925_v28  ;;  %v3040_v22 = vadd.f32 %v3039_v17, %v9628_v4  ;;  %v6726_v25 = vld [vmem:[%s11438_s3 + $0x210] ss:$8 sps:$4 sm:$0xff]   ;;  %v3124_v18 = vpop.f32.mrf.mxu0  ;;  %v6728_v58 = vld [vmem:[%s11438_s3 + $0x204] ss:$8 sps:$4 sm:$0xff]  }
 0x2e0   :  { %4444 = vmatprep.mubr.bf16.mxu1 %v11604_v11  ;;  %6041 = vmatprep.mubr.msk.bf16.mxu0 %vm8401_vm2, %v8934_v49  ;;  %v3041_v24 = vpop.f32.mrf.mxu1  ;;  %v11646_v49 = vld [vmem:[#allocation29_spill] sm:$0xff] }
 0x2e1   :  { %4559 = vmatpush1.bf16.msra.mxu1 %v6725_v54  ;;  %4640 = vmatpush1.bf16.msra.mxu0 %v6726_v25  ;;  %v9892_v27 = vadd.f32 %v9807_v3, %v3040_v22  ;;  %v3042_v4 = vadd.f32 %v3041_v24, %v9633_v6  ;;  %v6729_v6 = vld [vmem:[%s11438_s3 + $0x140] ss:$8 sps:$4 sm:$0xff]   ;;  %v9913_v25 = vpop.f32.mrf.mxu0 }
 0x2e2   :  { %4560 = vmatprep.subr.bf16.mxu1 %v6727_v61  ;;  %4641 = vmatprep.subr.bf16.mxu0 %v6728_v58  ;;  %v9901_v17 = vpop.f32.mrf.mxu1  ;;  %v6730_v22 = vld [vmem:[%s11438_s3 + $0x200] ss:$8 sps:$4 sm:$0xff]   ;;  %11636 = vst [vmem:[#allocation44_spill] sm:$0xff] %v9913_v25 }
 0x2e3   :  { %11633 = vst [vmem:[#allocation41_spill] sm:$0xff] %v9892_v27  ;;  %11634 = vst [vmem:[#allocation42_spill] sm:$0xff] %v9901_v17  ;;  %v9904_v54 = vadd.f32 %v9819_v2, %v3042_v4  ;;  %v6731_v2 = vld [vmem:[%s11438_s3 + $0x134] ss:$8 sps:$4 sm:$0xff]   ;;  %v11650_v27 = vld [vmem:[#allocation38_spill] sm:$0xff] }
 0x2e4   :  { %v3047_v3 = vpop.f32.mrf.mxu1  ;;  %v6732_v4 = vld [vmem:[%s11438_s3 + $0x2f4] ss:$8 sps:$4 sm:$0xff]  }
 0x2e5   :  { %11635 = vst [vmem:[#allocation43_spill] sm:$0xff] %v9904_v54  ;;  %4561 = vmatpush1.bf16.msra.mxu1 %v6729_v6  ;;  %4642 = vmatpush1.bf16.msra.mxu0 %v6730_v22  ;;  %v3048_v24 = vadd.f32 %v3047_v3, %v9657_v14  ;;  %v6733_v3 = vld [vmem:[%s11438_s3 + $0x130] ss:$8 sps:$4 sm:$0xff]   ;;  %v6843_v54 = vld [vmem:[%s11438_s3 + $0x574] ss:$8 sps:$4 sm:$0xff]  }
 0x2e6   :  { %4562 = vmatprep.subr.bf16.mxu1 %v6731_v2  ;;  %4643 = vmatprep.subr.bf16.mxu0 %v6732_v4  ;;  %v3049_v61 = vpop.f32.mrf.mxu1  ;;  %v6734_v22 = vld [vmem:[%s11438_s3 + $0x2f0] ss:$8 sps:$4 sm:$0xff]   ;;  %v6736_v4 = vld [vmem:[%s11438_s3 + $0x2e4] ss:$8 sps:$4 sm:$0xff]  }
 0x2e7   :  { %v9921_v58 = vadd.f32 %v3120_v32, %v3048_v24  ;;  %4445 = vmatmul.mubr.bf16.gmra.mxu1 %v11605_v31  ;;  %v3050_v6 = vadd.f32 %v3049_v61, %v9672_v55  ;;  %v3130_v24 = vpop.f32.mrf.mxu0  ;;  %v6735_v55 = vld [vmem:[%s11438_s3 + $0x124] ss:$8 sps:$4 sm:$0xff]  }
 0x2e8   :  { %4454 = vmatprep.mubr.bf16.mxu1 %v9071_v48  ;;  %v3051_v14 = vpop.f32.mrf.mxu1 }
 0x2e9   :  { %11637 = vst [vmem:[#allocation45_spill] sm:$0xff] %v9921_v58  ;;  %4563 = vmatpush1.bf16.msra.mxu1 %v6733_v3  ;;  %4644 = vmatpush2.bf16.msra.mxu0 %v6734_v22  ;;  %v9932_v2 = vadd.f32 %v3122_v26, %v3050_v6  ;;  %v3052_v32 = vadd.f32 %v3051_v14, %v9676_v42  ;;  %v6737_v42 = vld [vmem:[%s11438_s3 + $0x120] ss:$8 sps:$4 sm:$0xff]   ;;  %v3132_v14 = vpop.f32.mrf.mxu0 }
 0x2ea   :  { %4564 = vmatprep.subr.bf16.mxu1 %v6735_v55  ;;  %4645 = vmatprep.subr.bf16.mxu0 %v6736_v4  ;;  %v9941_v61 = vpop.f32.mrf.mxu1  ;;  %v6738_v26 = vld [vmem:[%s11438_s3 + $0x2e0] ss:$8 sps:$4 sm:$0xff]   ;;  %v6739_v55 = vld [vmem:[%s11438_s3 + $0x114] ss:$8 sps:$4 sm:$0xff]  }
 0x2eb   :  { %11638 = vst [vmem:[#allocation46_spill] sm:$0xff] %v9932_v2  ;;  %11639 = vst [vmem:[#allocation47_spill] sm:$0xff] %v9941_v61  ;;  %v9943_v3 = vadd.f32 %v3124_v18, %v3052_v32  ;;  %v6740_v18 = vld [vmem:[%s11438_s3 + $0x2d4] ss:$8 sps:$4 sm:$0xff]   ;;  %v6777_v61 = vld [vmem:[%s11438_s3 + $0x180] ss:$8 sps:$4 sm:$0xff]  }
 0x2ec   :  { %v3057_v22 = vpop.f32.mrf.mxu1  ;;  %v6837_v2 = vld [vmem:[%s11438_s3 + $0x390] ss:$8 sps:$4 sm:$0xff]   ;;  %v6842_v58 = vld [vmem:[%s11438_s3 + $0x640] ss:$8 sps:$4 sm:$0xff]  }
 0x2ed   :  { %11640 = vst [vmem:[#allocation48_spill] sm:$0xff] %v9943_v3  ;;  %4565 = vmatpush1.bf16.msra.mxu1 %v6737_v42  ;;  %4646 = vmatpush2.bf16.msra.mxu0 %v6738_v26  ;;  %v3058_v6 = vadd.f32 %v3057_v22, %v9696_v50  ;;  %v6741_v22 = vld [vmem:[%s11438_s3 + $0x110] ss:$8 sps:$4 sm:$0xff]  }
 0x2ee   :  { %4566 = vmatprep.subr.bf16.mxu1 %v6739_v55  ;;  %4647 = vmatprep.subr.bf16.mxu0 %v6740_v18  ;;  %v3059_v32 = vpop.f32.mrf.mxu1  ;;  %v6742_v26 = vld [vmem:[%s11438_s3 + $0x2d0] ss:$8 sps:$4 sm:$0xff]   ;;  %v6743_v55 = vld [vmem:[%s11438_s3 + $0x104] ss:$8 sps:$4 sm:$0xff]  }
 0x2ef   :  { %v9958_v4 = vadd.f32 %v3130_v24, %v3058_v6  ;;  %4455 = vmatmul.mubr.bf16.gmra.mxu1 %v9098_v51  ;;  %v3060_v42 = vadd.f32 %v3059_v32, %v9711_v52  ;;  %v3134_v52 = vpop.f32.mrf.mxu0  ;;  %v6744_v18 = vld [vmem:[%s11438_s3 + $0x2c4] ss:$8 sps:$4 sm:$0xff]  }
 0x2f0   :  { %6017 = vmatprep.mubr.msk.bf16.mxu1 %vm8401_vm2, %v11619_v23  ;;  %v3061_v50 = vpop.f32.mrf.mxu1 }
 0x2f1   :  { %11641 = vst [vmem:[#allocation49_spill] sm:$0xff] %v9958_v4  ;;  %4567 = vmatpush1.bf16.msra.mxu1 %v6741_v22  ;;  %4648 = vmatpush2.bf16.msra.mxu0 %v6742_v26  ;;  %v9971_v24 = vadd.f32 %v3132_v14, %v3060_v42  ;;  %v3062_v6 = vadd.f32 %v3061_v50, %v9713_v10  ;;  %v6745_v14 = vld [vmem:[%s11438_s3 + $0x100] ss:$8 sps:$4 sm:$0xff]   ;;  %v6747_v42 = vld [vmem:[%s11438_s3 + $0x1f4] ss:$8 sps:$4 sm:$0xff]  }
 0x2f2   :  { %4568 = vmatprep.subr.bf16.mxu1 %v6743_v55  ;;  %4649 = vmatprep.subr.bf16.mxu0 %v6744_v18  ;;  %v6746_v10 = vld [vmem:[%s11438_s3 + $0x2c0] ss:$8 sps:$4 sm:$0xff]   ;;  %v6748_v50 = vld [vmem:[%s11438_s3 + $0x2b4] ss:$8 sps:$4 sm:$0xff]   ;;  %v6749_v22 = vld [vmem:[%s11438_s3 + $0x1f0] ss:$8 sps:$4 sm:$0xff]   ;;  %v10091_v25 = vpop.f32.mrf.mxu1 }
 0x2f3   :  { %11642 = vst [vmem:[#allocation50_spill] sm:$0xff] %v9971_v24  ;;  %v9980_v32 = vadd.f32 %v3134_v52, %v3062_v6  ;;  %v6750_v26 = vld [vmem:[%s11438_s3 + $0x2b0] ss:$8 sps:$4 sm:$0xff]   ;;  %v6751_v6 = vld [vmem:[%s11438_s3 + $0x1e4] ss:$8 sps:$4 sm:$0xff]   ;;  %11645 = vst [vmem:[#allocation53_spill] sm:$0xff] %v10091_v25 }
 0x2f4   :  { %v6752_v52 = vld [vmem:[%s11438_s3 + $0x2a4] ss:$8 sps:$4 sm:$0xff]   ;;  %v6753_v55 = vld [vmem:[%s11438_s3 + $0x1e0] ss:$8 sps:$4 sm:$0xff]   ;;  %v6779_v25 = vld [vmem:[%s11438_s3 + $0x374] ss:$8 sps:$4 sm:$0xff]  }
 0x2f5   :  { %11643 = vst [vmem:[#allocation51_spill] sm:$0xff] %v9980_v32  ;;  %4569 = vmatpush1.bf16.msra.mxu1 %v6745_v14  ;;  %4650 = vmatpush2.bf16.msra.mxu0 %v6746_v10  ;;  %v6754_v18 = vld [vmem:[%s11438_s3 + $0x2a0] ss:$8 sps:$4 sm:$0xff]   ;;  %v6755_v14 = vld [vmem:[%s11438_s3 + $0x1d4] ss:$8 sps:$4 sm:$0xff]  }
 0x2f6   :  { %4570 = vmatprep.subr.bf16.mxu1 %v6747_v42  ;;  %4651 = vmatprep.subr.bf16.mxu0 %v6748_v50  ;;  %v6756_v10 = vld [vmem:[%s11438_s3 + $0x294] ss:$8 sps:$4 sm:$0xff]   ;;  %v6757_v42 = vld [vmem:[%s11438_s3 + $0x1d0] ss:$8 sps:$4 sm:$0xff]  }
 0x2f7   :  { %v6758_v50 = vld [vmem:[%s11438_s3 + $0x290] ss:$8 sps:$4 sm:$0xff]  }
 0x2f9   :  { %4571 = vmatpush2.bf16.msra.mxu1 %v6749_v22  ;;  %4652 = vmatpush2.bf16.msra.mxu0 %v6750_v26  ;;  %v6759_v22 = vld [vmem:[%s11438_s3 + $0x1c4] ss:$8 sps:$4 sm:$0xff]  }
 0x2fa   :  { %4572 = vmatprep.subr.bf16.mxu1 %v6751_v6  ;;  %4653 = vmatprep.subr.bf16.mxu0 %v6752_v52  ;;  %v6760_v26 = vld [vmem:[%s11438_s3 + $0x284] ss:$8 sps:$4 sm:$0xff]   ;;  %v10030_v6 = vpop.f32.mrf.mxu0  ;;  %v6761_v52 = vld [vmem:[%s11438_s3 + $0x1c0] ss:$8 sps:$4 sm:$0xff]  }
 0x2fb   :  { %11644 = vst [vmem:[#allocation52_spill] sm:$0xff] %v10030_v6 }
 0x2fd   :  { %4573 = vmatpush2.bf16.msra.mxu1 %v6753_v55  ;;  %4654 = vmatpush2.bf16.msra.mxu0 %v6754_v18  ;;  %v6762_v55 = vld [vmem:[%s11438_s3 + $0x280] ss:$8 sps:$4 sm:$0xff]  }
 0x2fe   :  { %4574 = vmatprep.subr.bf16.mxu1 %v6755_v14  ;;  %4655 = vmatprep.subr.bf16.mxu0 %v6756_v10  ;;  %v6763_v14 = vld [vmem:[%s11438_s3 + $0x1b4] ss:$8 sps:$4 sm:$0xff]  }
 0x2ff   :  { %v6764_v10 = vld [vmem:[%s11438_s3 + $0x474] ss:$8 sps:$4 sm:$0xff]  }
 0x301   :  { %4575 = vmatpush2.bf16.msra.mxu1 %v6757_v42  ;;  %4656 = vmatpush2.bf16.msra.mxu0 %v6758_v50  ;;  %v6765_v50 = vld [vmem:[%s11438_s3 + $0x1b0] ss:$8 sps:$4 sm:$0xff]  }
 0x302   :  { %4576 = vmatprep.subr.bf16.mxu1 %v6759_v22  ;;  %4657 = vmatprep.subr.bf16.mxu0 %v6760_v26  ;;  %v6766_v26 = vld [vmem:[%s11438_s3 + $0x470] ss:$8 sps:$4 sm:$0xff]  }
 0x305   :  { %4577 = vmatpush2.bf16.msra.mxu1 %v6761_v52  ;;  %4658 = vmatpush2.bf16.msra.mxu0 %v6762_v55  ;;  %v4207_v18 = vpop.f32.mrf.mxu0  ;;  %v6767_v52 = vld [vmem:[%s11438_s3 + $0x1a4] ss:$8 sps:$4 sm:$0xff]  }
 0x306   :  { %4578 = vmatprep.subr.bf16.mxu1 %v6763_v14  ;;  %4773 = vmatprep.subr.bf16.mxu0 %v6764_v10  ;;  %v6768_v55 = vld [vmem:[%s11438_s3 + $0x464] ss:$8 sps:$4 sm:$0xff]   ;;  %v6769_v10 = vld [vmem:[%s11438_s3 + $0x1a0] ss:$8 sps:$4 sm:$0xff]  }
 0x307   :  { %v4209_v42 = vpop.f32.mrf.mxu0 }
 0x308   :  { %6044 = vmatmul.mubr.msk.bf16.vlgmr.msra.gmra.mxu0 %vm8401_vm2, %v8551_v8 }
 0x309   :  { %4579 = vmatpush2.bf16.msra.mxu1 %v6765_v50  ;;  %6047 = vmatprep.mubr.msk.bf16.mxu0 %vm8561_vm4, %v8653_v30  ;;  %v4211_v22 = vpop.f32.mrf.mxu0 }
 0x30a   :  { %4774 = vmatpush1.bf16.msra.mxu0 %v6766_v26  ;;  %4580 = vmatprep.subr.bf16.mxu1 %v6767_v52  ;;  %v6770_v26 = vld [vmem:[%s11438_s3 + $0x460] ss:$8 sps:$4 sm:$0xff]   ;;  %v6771_v52 = vld [vmem:[%s11438_s3 + $0x194] ss:$8 sps:$4 sm:$0xff]  }
 0x30b   :  { %4775 = vmatprep.subr.bf16.mxu0 %v6768_v55  ;;  %v10062_v14 = vpop.f32.mrf.mxu0  ;;  %v6772_v55 = vld [vmem:[%s11438_s3 + $0x454] ss:$8 sps:$4 sm:$0xff]  }
 0x30d   :  { %4581 = vmatpush2.bf16.msra.mxu1 %v6769_v10  ;;  %v4217_v50 = vpop.f32.mrf.mxu0  ;;  %v6773_v10 = vld [vmem:[%s11438_s3 + $0x190] ss:$8 sps:$4 sm:$0xff]  }
 0x30e   :  { %4776 = vmatpush1.bf16.msra.mxu0 %v6770_v26  ;;  %4582 = vmatprep.subr.bf16.mxu1 %v6771_v52  ;;  %v6774_v52 = vld [vmem:[%s11438_s3 + $0x450] ss:$8 sps:$4 sm:$0xff]  }
 0x30f   :  { %4777 = vmatprep.subr.bf16.mxu0 %v6772_v55  ;;  %v4219_v6 = vpop.f32.mrf.mxu0  ;;  %v6775_v55 = vld [vmem:[%s11438_s3 + $0x184] ss:$8 sps:$4 sm:$0xff]  }
 0x310   :  { %6050 = vmatmul.mubr.msk.bf16.gmra.mxu0 %vm8561_vm4, %v8615_v12 }
 0x311   :  { %4583 = vmatpush2.bf16.msra.mxu1 %v6773_v10  ;;  %6053 = vmatprep.mubr.msk.bf16.mxu0 %vm8628_vm5, %v8736_v19  ;;  %v4221_v26 = vpop.f32.mrf.mxu0  ;;  %v6776_v10 = vld [vmem:[%s11438_s3 + $0x444] ss:$8 sps:$4 sm:$0xff]  }
 0x312   :  { %4778 = vmatpush1.bf16.msra.mxu0 %v6774_v52  ;;  %4584 = vmatprep.subr.bf16.mxu1 %v6775_v55 }
 0x313   :  { %4779 = vmatprep.subr.bf16.mxu0 %v6776_v10  ;;  %v10099_v17 = vpop.f32.mrf.mxu0  ;;  %v6780_v10 = vld [vmem:[%s11438_s3 + $0x434] ss:$8 sps:$4 sm:$0xff]  }
 0x315   :  { %4585 = vmatpush2.bf16.msra.mxu1 %v6777_v61  ;;  %v4134_v52 = vpop.f32.mrf.mxu1 }
 0x316   :  { %4780 = vmatpush1.bf16.msra.mxu0 %v6778_v41  ;;  %v10104_v55 = vadd.f32 %v4207_v18, %v4134_v52  ;;  %4700 = vmatprep.subr.bf16.mxu1 %v6779_v25  ;;  %v4227_v18 = vpop.f32.mrf.mxu0  ;;  %v6781_v52 = vld [vmem:[%s11438_s3 + $0x370] ss:$8 sps:$4 sm:$0xff]  }
 0x317   :  { %4781 = vmatprep.subr.bf16.mxu0 %v6780_v10  ;;  %v4136_v61 = vpop.f32.mrf.mxu1 }
 0x318   :  { %6020 = vmatmul.mubr.msk.bf16.vlgmr.msra.gmra.mxu1 %vm8401_vm2, %v8119_v29  ;;  %6056 = vmatmul.mubr.msk.bf16.gmra.mxu0 %vm8628_vm5, %v8729_v34  ;;  %v10118_v41 = vadd.f32 %v4209_v42, %v4136_v61  ;;  %v6782_v42 = vld [vmem:[%s11438_s3 + $0x430] ss:$8 sps:$4 sm:$0xff]   ;;  %v6783_v61 = vld [vmem:[%s11438_s3 + $0x364] ss:$8 sps:$4 sm:$0xff]  }
 0x319   :  { %6023 = vmatprep.mubr.msk.bf16.mxu1 %vm8561_vm4, %v8172_v40  ;;  %6059 = vmatprep.mubr.msk.bf16.mxu0 %vm8712_vm6, %v8820_v45  ;;  %v4138_v25 = vpop.f32.mrf.mxu1 }
 0x31a   :  { %4701 = vmatpush1.bf16.msra.mxu1 %v6781_v52  ;;  %4782 = vmatpush1.bf16.msra.mxu0 %v6782_v42  ;;  %v10132_v10 = vadd.f32 %v4211_v22, %v4138_v25  ;;  %v4229_v52 = vpop.f32.mrf.mxu0  ;;  %v6785_v42 = vld [vmem:[%s11438_s3 + $0x360] ss:$8 sps:$4 sm:$0xff]  }
 0x31b   :  { %4702 = vmatprep.subr.bf16.mxu1 %v6783_v61  ;;  %4783 = vmatprep.subr.bf16.mxu0 %v6784_v46  ;;  %v10140_v45 = vpop.f32.mrf.mxu1  ;;  %v6786_v22 = vld [vmem:[%s11438_s3 + $0x420] ss:$8 sps:$4 sm:$0xff]   ;;  %v6787_v46 = vld [vmem:[%s11438_s3 + $0x354] ss:$8 sps:$4 sm:$0xff]  }
 0x31c   :  { %v6788_v61 = vld [vmem:[%s11438_s3 + $0x414] ss:$8 sps:$4 sm:$0xff]  }
 0x31d   :  { %v4144_v34 = vpop.f32.mrf.mxu1 }
 0x31e   :  { %4703 = vmatpush1.bf16.msra.mxu1 %v6785_v42  ;;  %4784 = vmatpush1.bf16.msra.mxu0 %v6786_v22  ;;  %v10148_v25 = vadd.f32 %v4217_v50, %v4144_v34  ;;  %v4231_v50 = vpop.f32.mrf.mxu0  ;;  %v6789_v22 = vld [vmem:[%s11438_s3 + $0x350] ss:$8 sps:$4 sm:$0xff]  }
 0x31f   :  { %4704 = vmatprep.subr.bf16.mxu1 %v6787_v46  ;;  %4785 = vmatprep.subr.bf16.mxu0 %v6788_v61  ;;  %v4146_v19 = vpop.f32.mrf.mxu1  ;;  %v6790_v46 = vld [vmem:[%s11438_s3 + $0x410] ss:$8 sps:$4 sm:$0xff]   ;;  %v6792_v61 = vld [vmem:[%s11438_s3 + $0x404] ss:$8 sps:$4 sm:$0xff]  }
 0x320   :  { %6026 = vmatmul.mubr.msk.bf16.gmra.mxu1 %vm8561_vm4, %v8168_v39  ;;  %6062 = vmatmul.mubr.msk.bf16.gmra.mxu0 %vm8712_vm6, %v8782_v38  ;;  %v10162_v34 = vadd.f32 %v4219_v6, %v4146_v19  ;;  %v6791_v6 = vld [vmem:[%s11438_s3 + $0x344] ss:$8 sps:$4 sm:$0xff]  }
 0x321   :  { %6029 = vmatprep.mubr.msk.bf16.mxu1 %vm8628_vm5, %v8256_v53  ;;  %4805 = vmatprep.mubr.bf16.mxu0 %v8861_v35  ;;  %v4148_v42 = vpop.f32.mrf.mxu1 }
 0x322   :  { %4705 = vmatpush1.bf16.msra.mxu1 %v6789_v22  ;;  %4786 = vmatpush1.bf16.msra.mxu0 %v6790_v46  ;;  %v10174_v19 = vadd.f32 %v4221_v26, %v4148_v42  ;;  %v10184_v22 = vpop.f32.mrf.mxu0  ;;  %v6793_v26 = vld [vmem:[%s11438_s3 + $0x340] ss:$8 sps:$4 sm:$0xff]  }
 0x323   :  { %4706 = vmatprep.subr.bf16.mxu1 %v6791_v6  ;;  %4787 = vmatprep.subr.bf16.mxu0 %v6792_v61  ;;  %v10182_v35 = vpop.f32.mrf.mxu1  ;;  %v6794_v42 = vld [vmem:[%s11438_s3 + $0x400] ss:$8 sps:$4 sm:$0xff]   ;;  %v6795_v6 = vld [vmem:[%s11438_s3 + $0x334] ss:$8 sps:$4 sm:$0xff]  }
 0x324   :  { %v6796_v61 = vld [vmem:[%s11438_s3 + $0x4f4] ss:$8 sps:$4 sm:$0xff]  }
 0x325   :  { %v4154_v38 = vpop.f32.mrf.mxu1 }
 0x326   :  { %4707 = vmatpush1.bf16.msra.mxu1 %v6793_v26  ;;  %4788 = vmatpush1.bf16.msra.mxu0 %v6794_v42  ;;  %v10192_v46 = vadd.f32 %v4227_v18, %v4154_v38  ;;  %v4237_v42 = vpop.f32.mrf.mxu0  ;;  %v6797_v18 = vld [vmem:[%s11438_s3 + $0x330] ss:$8 sps:$4 sm:$0xff]  }
 0x327   :  { %4708 = vmatprep.subr.bf16.mxu1 %v6795_v6  ;;  %4789 = vmatprep.subr.bf16.mxu0 %v6796_v61  ;;  %v4156_v12 = vpop.f32.mrf.mxu1  ;;  %v6798_v6 = vld [vmem:[%s11438_s3 + $0x4f0] ss:$8 sps:$4 sm:$0xff]  }
 0x328   :  { %6032 = vmatmul.mubr.msk.bf16.gmra.mxu1 %vm8628_vm5, %v8243_v59  ;;  %v10203_v26 = vadd.f32 %v4229_v52, %v4156_v12  ;;  %v6799_v12 = vld [vmem:[%s11438_s3 + $0x324] ss:$8 sps:$4 sm:$0xff]  }
 0x329   :  { %6035 = vmatprep.mubr.msk.bf16.mxu1 %vm8712_vm6, %v8314_v15  ;;  %v4158_v38 = vpop.f32.mrf.mxu1  ;;  %v6800_v52 = vld [vmem:[%s11438_s3 + $0x4e4] ss:$8 sps:$4 sm:$0xff]  }
 0x32a   :  { %4709 = vmatpush1.bf16.msra.mxu1 %v6797_v18  ;;  %4790 = vmatpush2.bf16.msra.mxu0 %v6798_v6  ;;  %v10214_v61 = vadd.f32 %v4231_v50, %v4158_v38  ;;  %v4239_v18 = vpop.f32.mrf.mxu0  ;;  %v6801_v6 = vld [vmem:[%s11438_s3 + $0x320] ss:$8 sps:$4 sm:$0xff]  }
 0x32b   :  { %4710 = vmatprep.subr.bf16.mxu1 %v6799_v12  ;;  %4791 = vmatprep.subr.bf16.mxu0 %v6800_v52  ;;  %v10222_v30 = vpop.f32.mrf.mxu1  ;;  %v6802_v50 = vld [vmem:[%s11438_s3 + $0x4e0] ss:$8 sps:$4 sm:$0xff]   ;;  %v6803_v12 = vld [vmem:[%s11438_s3 + $0x314] ss:$8 sps:$4 sm:$0xff]  }
 0x32c   :  { %v6804_v52 = vld [vmem:[%s11438_s3 + $0x4d4] ss:$8 sps:$4 sm:$0xff]  }
 0x32d   :  { %v4164_v8 = vpop.f32.mrf.mxu1 }
 0x32e   :  { %4711 = vmatpush1.bf16.msra.mxu1 %v6801_v6  ;;  %4792 = vmatpush2.bf16.msra.mxu0 %v6802_v50  ;;  %v10230_v38 = vadd.f32 %v4237_v42, %v4164_v8  ;;  %v4241_v50 = vpop.f32.mrf.mxu0  ;;  %v6805_v42 = vld [vmem:[%s11438_s3 + $0x310] ss:$8 sps:$4 sm:$0xff]  }
 0x32f   :  { %4712 = vmatprep.subr.bf16.mxu1 %v6803_v12  ;;  %4793 = vmatprep.subr.bf16.mxu0 %v6804_v52  ;;  %v4166_v32 = vpop.f32.mrf.mxu1  ;;  %v6806_v12 = vld [vmem:[%s11438_s3 + $0x4d0] ss:$8 sps:$4 sm:$0xff]  }
 0x330   :  { %6038 = vmatmul.mubr.msk.bf16.gmra.mxu1 %vm8712_vm6, %v8294_v37  ;;  %v10241_v6 = vadd.f32 %v4239_v18, %v4166_v32  ;;  %v6807_v32 = vld [vmem:[%s11438_s3 + $0x304] ss:$8 sps:$4 sm:$0xff]  }
 0x331   :  { %4732 = vmatprep.mubr.bf16.mxu1 %v11585_v7  ;;  %v4168_v8 = vpop.f32.mrf.mxu1  ;;  %v6808_v18 = vld [vmem:[%s11438_s3 + $0x4c4] ss:$8 sps:$4 sm:$0xff]  }
 0x332   :  { %4713 = vmatpush1.bf16.msra.mxu1 %v6805_v42  ;;  %4794 = vmatpush2.bf16.msra.mxu0 %v6806_v12  ;;  %v10250_v52 = vadd.f32 %v4241_v50, %v4168_v8  ;;  %v6809_v42 = vld [vmem:[%s11438_s3 + $0x300] ss:$8 sps:$4 sm:$0xff]   ;;  %v6811_v8 = vld [vmem:[%s11438_s3 + $0x3f4] ss:$8 sps:$4 sm:$0xff]  }
 0x333   :  { %4714 = vmatprep.subr.bf16.mxu1 %v6807_v32  ;;  %4795 = vmatprep.subr.bf16.mxu0 %v6808_v18  ;;  %v6810_v50 = vld [vmem:[%s11438_s3 + $0x4c0] ss:$8 sps:$4 sm:$0xff]   ;;  %v6812_v12 = vld [vmem:[%s11438_s3 + $0x4b4] ss:$8 sps:$4 sm:$0xff]   ;;  %v6813_v32 = vld [vmem:[%s11438_s3 + $0x3f0] ss:$8 sps:$4 sm:$0xff]  }
 0x334   :  { %v6814_v18 = vld [vmem:[%s11438_s3 + $0x4b0] ss:$8 sps:$4 sm:$0xff]   ;;  %v11651_v7 = vld [vmem:[#allocation34_spill] sm:$0xff] }
 0x336   :  { %4715 = vmatpush1.bf16.msra.mxu1 %v6809_v42  ;;  %4796 = vmatpush2.bf16.msra.mxu0 %v6810_v50  ;;  %v6815_v42 = vld [vmem:[%s11438_s3 + $0x3e4] ss:$8 sps:$4 sm:$0xff]  }
 0x337   :  { %4716 = vmatprep.subr.bf16.mxu1 %v6811_v8  ;;  %4797 = vmatprep.subr.bf16.mxu0 %v6812_v12  ;;  %v6816_v50 = vld [vmem:[%s11438_s3 + $0x4a4] ss:$8 sps:$4 sm:$0xff]   ;;  %v6817_v8 = vld [vmem:[%s11438_s3 + $0x3e0] ss:$8 sps:$4 sm:$0xff]  }
 0x338   :  { %v6818_v12 = vld [vmem:[%s11438_s3 + $0x4a0] ss:$8 sps:$4 sm:$0xff]  }
 0x33a   :  { %4717 = vmatpush2.bf16.msra.mxu1 %v6813_v32  ;;  %4798 = vmatpush2.bf16.msra.mxu0 %v6814_v18  ;;  %v6819_v32 = vld [vmem:[%s11438_s3 + $0x3d4] ss:$8 sps:$4 sm:$0xff]  }
 0x33b   :  { %4718 = vmatprep.subr.bf16.mxu1 %v6815_v42  ;;  %4799 = vmatprep.subr.bf16.mxu0 %v6816_v50  ;;  %v6820_v18 = vld [vmem:[%s11438_s3 + $0x494] ss:$8 sps:$4 sm:$0xff]   ;;  %v6821_v42 = vld [vmem:[%s11438_s3 + $0x3d0] ss:$8 sps:$4 sm:$0xff]  }
 0x33c   :  { %v6822_v50 = vld [vmem:[%s11438_s3 + $0x490] ss:$8 sps:$4 sm:$0xff]  }
 0x33e   :  { %4719 = vmatpush2.bf16.msra.mxu1 %v6817_v8  ;;  %4800 = vmatpush2.bf16.msra.mxu0 %v6818_v12  ;;  %v6823_v8 = vld [vmem:[%s11438_s3 + $0x3c4] ss:$8 sps:$4 sm:$0xff]  }
 0x33f   :  { %4720 = vmatprep.subr.bf16.mxu1 %v6819_v32  ;;  %4801 = vmatprep.subr.bf16.mxu0 %v6820_v18  ;;  %v6824_v12 = vld [vmem:[%s11438_s3 + $0x484] ss:$8 sps:$4 sm:$0xff]   ;;  %v10306_v32 = vpop.f32.mrf.mxu0  ;;  %v6825_v18 = vld [vmem:[%s11438_s3 + $0x3c0] ss:$8 sps:$4 sm:$0xff]  }
 0x342   :  { %4721 = vmatpush2.bf16.msra.mxu1 %v6821_v42  ;;  %4802 = vmatpush2.bf16.msra.mxu0 %v6822_v50  ;;  %v6826_v42 = vld [vmem:[%s11438_s3 + $0x480] ss:$8 sps:$4 sm:$0xff]  }
 0x343   :  { %4722 = vmatprep.subr.bf16.mxu1 %v6823_v8  ;;  %4803 = vmatprep.subr.bf16.mxu0 %v6824_v12  ;;  %v6827_v8 = vld [vmem:[%s11438_s3 + $0x3b4] ss:$8 sps:$4 sm:$0xff]  }
 0x344   :  { %v6828_v12 = vld [vmem:[%s11438_s3 + $0x674] ss:$8 sps:$4 sm:$0xff]  }
 0x346   :  { %4723 = vmatpush2.bf16.msra.mxu1 %v6825_v18  ;;  %4804 = vmatpush2.bf16.msra.mxu0 %v6826_v42  ;;  %v4353_v50 = vpop.f32.mrf.mxu0  ;;  %v6829_v18 = vld [vmem:[%s11438_s3 + $0x3b0] ss:$8 sps:$4 sm:$0xff]  }
 0x347   :  { %4724 = vmatprep.subr.bf16.mxu1 %v6827_v8  ;;  %4935 = vmatprep.subr.bf16.mxu0 %v6828_v12  ;;  %v11647_v42 = vld [vmem:[#allocation32_spill] sm:$0xff]  ;;  %v6831_v12 = vld [vmem:[%s11438_s3 + $0x3a4] ss:$8 sps:$4 sm:$0xff]  }
 0x348   :  { %v4355_v24 = vpop.f32.mrf.mxu0  ;;  %v6830_v8 = vld [vmem:[%s11438_s3 + $0x670] ss:$8 sps:$4 sm:$0xff]  }
 0x349   :  { %4806 = vmatmul.mubr.bf16.vlgmr.msra.gmra.mxu0 %v11646_v49  ;;  %v6832_v49 = vld [vmem:[%s11438_s3 + $0x664] ss:$8 sps:$4 sm:$0xff]  }
 0x34a   :  { %4725 = vmatpush2.bf16.msra.mxu1 %v6829_v18  ;;  %4815 = vmatprep.mubr.bf16.mxu0 %v11647_v42  ;;  %v10325_v28 = vpop.f32.mrf.mxu0  ;;  %v6833_v42 = vld [vmem:[%s11438_s3 + $0x3a0] ss:$8 sps:$4 sm:$0xff]  }
 0x34b   :  { %4936 = vmatpush1.bf16.msra.mxu0 %v6830_v8  ;;  %4726 = vmatprep.subr.bf16.mxu1 %v6831_v12  ;;  %v6834_v8 = vld [vmem:[%s11438_s3 + $0x660] ss:$8 sps:$4 sm:$0xff]   ;;  %v6835_v12 = vld [vmem:[%s11438_s3 + $0x394] ss:$8 sps:$4 sm:$0xff]  }
 0x34c   :  { %4937 = vmatprep.subr.bf16.mxu0 %v6832_v49  ;;  %v10336_v18 = vpop.f32.mrf.mxu0  ;;  %v6836_v49 = vld [vmem:[%s11438_s3 + $0x654] ss:$8 sps:$4 sm:$0xff]  }
 0x34e   :  { %4727 = vmatpush2.bf16.msra.mxu1 %v6833_v42  ;;  %v10341_v4 = vpop.f32.mrf.mxu0  ;;  %v11648_v42 = vld [vmem:[#allocation33_spill] sm:$0xff] }
 0x34f   :  { %4938 = vmatpush1.bf16.msra.mxu0 %v6834_v8  ;;  %4728 = vmatprep.subr.bf16.mxu1 %v6835_v12  ;;  %v11649_v8 = vld [vmem:[#allocation37_spill] sm:$0xff] }
 0x350   :  { %4939 = vmatprep.subr.bf16.mxu0 %v6836_v49  ;;  %v10352_v3 = vpop.f32.mrf.mxu0  ;;  %v6838_v12 = vld [vmem:[%s11438_s3 + $0x650] ss:$8 sps:$4 sm:$0xff]   ;;  %v6839_v49 = vld [vmem:[%s11438_s3 + $0x384] ss:$8 sps:$4 sm:$0xff]  }
 0x351   :  { %4816 = vmatmul.mubr.bf16.gmra.mxu0 %v11648_v42  ;;  %v10367_v42 = vpop.f32.mrf.mxu1 }
 0x352   :  { %4729 = vmatpush2.bf16.msra.mxu1 %v6837_v2  ;;  %4825 = vmatprep.mubr.bf16.mxu0 %v11649_v8  ;;  %v10359_v1 = vpop.f32.mrf.mxu0  ;;  %v6840_v2 = vld [vmem:[%s11438_s3 + $0x644] ss:$8 sps:$4 sm:$0xff]   ;;  %v6841_v8 = vld [vmem:[%s11438_s3 + $0x380] ss:$8 sps:$4 sm:$0xff]  }
 0x353   :  { %4940 = vmatpush1.bf16.msra.mxu0 %v6838_v12  ;;  %4730 = vmatprep.subr.bf16.mxu1 %v6839_v49 }
 0x354   :  { %4941 = vmatprep.subr.bf16.mxu0 %v6840_v2  ;;  %v10375_v20 = vpop.f32.mrf.mxu0  ;;  %v6844_v2 = vld [vmem:[%s11438_s3 + $0x634] ss:$8 sps:$4 sm:$0xff]  }
 0x356   :  { %4731 = vmatpush2.bf16.msra.mxu1 %v6841_v8  ;;  %v4280_v12 = vpop.f32.mrf.mxu1 }
 0x357   :  { %4942 = vmatpush1.bf16.msra.mxu0 %v6842_v58  ;;  %v4281_v49 = vadd.f32 %v4280_v12, %v10104_v55  ;;  %4862 = vmatprep.subr.bf16.mxu1 %v6843_v54  ;;  %v10392_v58 = vsel %vm7323_vm3, %v11651_v7, 0  ;;  %v10397_v54 = vpop.f32.mrf.mxu0  ;;  %v6846_v7 = vld [vmem:[%s11438_s3 + $0x630] ss:$8 sps:$4 sm:$0xff]  }
 0x358   :  { %4943 = vmatprep.subr.bf16.mxu0 %v6844_v2  ;;  %v4282_v8 = vpop.f32.mrf.mxu1  ;;  %11653 = vst [vmem:[#allocation34_spill] sm:$0xff] %v10392_v58 }
 0x359   :  { %4733 = vmatmul.mubr.bf16.vlgmr.msra.gmra.mxu1 %v11601_v16  ;;  %4826 = vmatmul.mubr.bf16.gmra.mxu0 %v11650_v27  ;;  %v4283_v55 = vadd.f32 %v4282_v8, %v10118_v41  ;;  %v10395_v12 = vadd.f32 %v4353_v50, %v4281_v49  ;;  %v4214_v16 = vadd.f32 %v10062_v14, %v10140_v45  ;;  %v6845_v27 = vld [vmem:[%s11438_s3 + $0x570] ss:$8 sps:$4 sm:$0xff]   ;;  %v6847_v49 = vld [vmem:[%s11438_s3 + $0x564] ss:$8 sps:$4 sm:$0xff]  }
 0x35a   :  { %4742 = vmatprep.mubr.bf16.mxu1 %v11602_v13  ;;  %4835 = vmatprep.mubr.bf16.mxu0 %v10392_v58  ;;  %v4284_v2 = vpop.f32.mrf.mxu1  ;;  %v6848_v45 = vld [vmem:[%s11438_s3 + $0x624] ss:$8 sps:$4 sm:$0xff]  }
 0x35b   :  { %4863 = vmatpush1.bf16.msra.mxu1 %v6845_v27  ;;  %4944 = vmatpush1.bf16.msra.mxu0 %v6846_v7  ;;  %v4285_v41 = vadd.f32 %v4284_v2, %v10132_v10  ;;  %v10410_v50 = vadd.f32 %v4355_v24, %v4283_v55  ;;  %v4375_v7 = vpop.f32.mrf.mxu0  ;;  %v6849_v24 = vld [vmem:[%s11438_s3 + $0x560] ss:$8 sps:$4 sm:$0xff]  }
 0x35c   :  { %4864 = vmatprep.subr.bf16.mxu1 %v6847_v49  ;;  %4945 = vmatprep.subr.bf16.mxu0 %v6848_v45  ;;  %v4286_v27 = vpop.f32.mrf.mxu1  ;;  %v6850_v10 = vld [vmem:[%s11438_s3 + $0x620] ss:$8 sps:$4 sm:$0xff]   ;;  %v6852_v49 = vld [vmem:[%s11438_s3 + $0x614] ss:$8 sps:$4 sm:$0xff]  }
 0x35d   :  { %v4287_v14 = vadd.f32 %v4286_v27, %v4214_v16  ;;  %v10419_v8 = vadd.f32 %v10325_v28, %v4285_v41  ;;  %v11654_v16 = vld [vmem:[#allocation35_spill] sm:$0xff]  ;;  %v6851_v41 = vld [vmem:[%s11438_s3 + $0x554] ss:$8 sps:$4 sm:$0xff]   ;;  %v4224_v27 = vadd.f32 %v10099_v17, %v10182_v35 }
 0x35e   :  { %v4290_v58 = vpop.f32.mrf.mxu1  ;;  %v10434_v28 = vsel %vm7323_vm3, %v11654_v16, 0  ;;  %v6856_v35 = vld [vmem:[%s11438_s3 + $0x604] ss:$8 sps:$4 sm:$0xff]  }
 0x35f   :  { %4865 = vmatpush1.bf16.msra.mxu1 %v6849_v24  ;;  %4946 = vmatpush1.bf16.msra.mxu0 %v6850_v10  ;;  %v4291_v55 = vadd.f32 %v4290_v58, %v10148_v25  ;;  %v10429_v2 = vadd.f32 %v10336_v18, %v4287_v14  ;;  %v4377_v18 = vpop.f32.mrf.mxu0  ;;  %v6853_v14 = vld [vmem:[%s11438_s3 + $0x550] ss:$8 sps:$4 sm:$0xff]  }
 0x360   :  { %4866 = vmatprep.subr.bf16.mxu1 %v6851_v41  ;;  %4947 = vmatprep.subr.bf16.mxu0 %v6852_v49  ;;  %v4292_v45 = vpop.f32.mrf.mxu1  ;;  %v6858_v41 = vld [vmem:[%s11438_s3 + $0x600] ss:$8 sps:$4 sm:$0xff]  }
 0x361   :  { %4743 = vmatmul.mubr.bf16.gmra.mxu1 %v11603_v62  ;;  %4836 = vmatmul.mubr.bf16.gmra.mxu0 %v10434_v28  ;;  %v4293_v25 = vadd.f32 %v4292_v45, %v10162_v34  ;;  %v10446_v47 = vadd.f32 %v10341_v4, %v4291_v55  ;;  %v6854_v4 = vld [vmem:[%s11438_s3 + $0x610] ss:$8 sps:$4 sm:$0xff]   ;;  %v4379_v16 = vpop.f32.mrf.mxu0 }
 0x362   :  { %4752 = vmatprep.mubr.bf16.mxu1 %v11604_v11  ;;  %6065 = vmatprep.mubr.msk.bf16.mxu0 %vm8401_vm2, %v11619_v23  ;;  %v4294_v58 = vpop.f32.mrf.mxu1  ;;  %v6855_v23 = vld [vmem:[%s11438_s3 + $0x544] ss:$8 sps:$4 sm:$0xff]  }
 0x363   :  { %4867 = vmatpush1.bf16.msra.mxu1 %v6853_v14  ;;  %4948 = vmatpush1.bf16.msra.mxu0 %v6854_v4  ;;  %v4295_v34 = vadd.f32 %v4294_v58, %v10174_v19  ;;  %v10462_v24 = vadd.f32 %v10352_v3, %v4293_v25  ;;  %v6857_v3 = vld [vmem:[%s11438_s3 + $0x540] ss:$8 sps:$4 sm:$0xff]   ;;  %v6860_v25 = vld [vmem:[%s11438_s3 + $0x6f4] ss:$8 sps:$4 sm:$0xff]   ;;  %v4234_v4 = vadd.f32 %v10184_v22, %v10222_v30  ;;  %v6864_v30 = vld [vmem:[%s11438_s3 + $0x6e4] ss:$8 sps:$4 sm:$0xff]  }
 0x364   :  { %4868 = vmatprep.subr.bf16.mxu1 %v6855_v23  ;;  %4949 = vmatprep.subr.bf16.mxu0 %v6856_v35  ;;  %v4296_v17 = vpop.f32.mrf.mxu1  ;;  %v6862_v23 = vld [vmem:[%s11438_s3 + $0x6f0] ss:$8 sps:$4 sm:$0xff]   ;;  %v6863_v35 = vld [vmem:[%s11438_s3 + $0x524] ss:$8 sps:$4 sm:$0xff]  }
 0x365   :  { %v4297_v10 = vadd.f32 %v4296_v17, %v4224_v27  ;;  %v10471_v55 = vadd.f32 %v10359_v1, %v4295_v34  ;;  %v6859_v1 = vld [vmem:[%s11438_s3 + $0x534] ss:$8 sps:$4 sm:$0xff]   ;;  %v6861_v34 = vld [vmem:[%s11438_s3 + $0x530] ss:$8 sps:$4 sm:$0xff]  }
 0x366   :  { %v4300_v19 = vpop.f32.mrf.mxu1 }
 0x367   :  { %4869 = vmatpush1.bf16.msra.mxu1 %v6857_v3  ;;  %4950 = vmatpush1.bf16.msra.mxu0 %v6858_v41  ;;  %v4301_v49 = vadd.f32 %v4300_v19, %v10192_v46  ;;  %v10481_v45 = vadd.f32 %v10375_v20, %v4297_v10  ;;  %v4383_v20 = vpop.f32.mrf.mxu0 }
 0x368   :  { %4870 = vmatprep.subr.bf16.mxu1 %v6859_v1  ;;  %4951 = vmatprep.subr.bf16.mxu0 %v6860_v25  ;;  %v4302_v58 = vpop.f32.mrf.mxu1  ;;  %v6868_v1 = vld [vmem:[%s11438_s3 + $0x6d4] ss:$8 sps:$4 sm:$0xff]  }
 0x369   :  { %4753 = vmatmul.mubr.bf16.gmra.mxu1 %v11605_v31  ;;  %v4303_v27 = vadd.f32 %v4302_v58, %v10203_v26  ;;  %v10492_v46 = vadd.f32 %v10397_v54, %v4301_v49  ;;  %v4385_v19 = vpop.f32.mrf.mxu0 }
 0x36a   :  { %4762 = vmatprep.mubr.bf16.mxu1 %v9071_v48  ;;  %v4304_v14 = vpop.f32.mrf.mxu1 }
 0x36b   :  { %4871 = vmatpush1.bf16.msra.mxu1 %v6861_v34  ;;  %4952 = vmatpush2.bf16.msra.mxu0 %v6862_v23  ;;  %v4305_v26 = vadd.f32 %v4304_v14, %v10214_v61  ;;  %v10504_v54 = vadd.f32 %v4375_v7, %v4303_v27  ;;  %v6865_v61 = vld [vmem:[%s11438_s3 + $0x520] ss:$8 sps:$4 sm:$0xff]   ;;  %v4244_v14 = vadd.f32 %v10306_v32, %v10367_v42  ;;  %v6870_v34 = vld [vmem:[%s11438_s3 + $0x6d0] ss:$8 sps:$4 sm:$0xff]   ;;  %v6872_v32 = vld [vmem:[%s11438_s3 + $0x6c4] ss:$8 sps:$4 sm:$0xff]  }
 0x36c   :  { %4872 = vmatprep.subr.bf16.mxu1 %v6863_v35  ;;  %4953 = vmatprep.subr.bf16.mxu0 %v6864_v30  ;;  %v4306_v22 = vpop.f32.mrf.mxu1  ;;  %v6866_v7 = vld [vmem:[%s11438_s3 + $0x6e0] ss:$8 sps:$4 sm:$0xff]  }
 0x36d   :  { %v4307_v17 = vadd.f32 %v4306_v22, %v4234_v4  ;;  %v10512_v10 = vadd.f32 %v4377_v18, %v4305_v26  ;;  %v6867_v18 = vld [vmem:[%s11438_s3 + $0x514] ss:$8 sps:$4 sm:$0xff]   ;;  %v6869_v4 = vld [vmem:[%s11438_s3 + $0x510] ss:$8 sps:$4 sm:$0xff]   ;;  %v6874_v30 = vld [vmem:[%s11438_s3 + $0x6c0] ss:$8 sps:$4 sm:$0xff]  }
 0x36e   :  { %v4310_v3 = vpop.f32.mrf.mxu1 }
 0x36f   :  { %4873 = vmatpush1.bf16.msra.mxu1 %v6865_v61  ;;  %4954 = vmatpush2.bf16.msra.mxu0 %v6866_v7  ;;  %v4311_v41 = vadd.f32 %v4310_v3, %v10230_v38  ;;  %v10521_v49 = vadd.f32 %v4379_v16, %v4307_v17  ;;  %v4387_v38 = vpop.f32.mrf.mxu0  ;;  %v6875_v17 = vld [vmem:[%s11438_s3 + $0x5f4] ss:$8 sps:$4 sm:$0xff]   ;;  %v6877_v3 = vld [vmem:[%s11438_s3 + $0x5f0] ss:$8 sps:$4 sm:$0xff]   ;;  %v6879_v7 = vld [vmem:[%s11438_s3 + $0x5e4] ss:$8 sps:$4 sm:$0xff]  }
 0x370   :  { %4874 = vmatprep.subr.bf16.mxu1 %v6867_v18  ;;  %4955 = vmatprep.subr.bf16.mxu0 %v6868_v1  ;;  %v4312_v25 = vpop.f32.mrf.mxu1  ;;  %v6878_v61 = vld [vmem:[%s11438_s3 + $0x6b0] ss:$8 sps:$4 sm:$0xff]   ;;  %v6881_v18 = vld [vmem:[%s11438_s3 + $0x5e0] ss:$8 sps:$4 sm:$0xff]  }
 0x371   :  { %4763 = vmatmul.mubr.bf16.gmra.mxu1 %v9098_v51  ;;  %v4313_v58 = vadd.f32 %v4312_v25, %v10241_v6  ;;  %v10531_v27 = vadd.f32 %v4383_v20, %v4311_v41  ;;  %v4389_v35 = vpop.f32.mrf.mxu0  ;;  %v6880_v41 = vld [vmem:[%s11438_s3 + $0x6a4] ss:$8 sps:$4 sm:$0xff]   ;;  %v6882_v1 = vld [vmem:[%s11438_s3 + $0x6a0] ss:$8 sps:$4 sm:$0xff]   ;;  %v6883_v25 = vld [vmem:[%s11438_s3 + $0x5d4] ss:$8 sps:$4 sm:$0xff]  }
 0x372   :  { %4894 = vmatprep.mubr.bf16.mxu1 %v8676_v60  ;;  %v4314_v16 = vpop.f32.mrf.mxu1  ;;  %v6871_v60 = vld [vmem:[%s11438_s3 + $0x504] ss:$8 sps:$4 sm:$0xff]  }
 0x373   :  { %4875 = vmatpush1.bf16.msra.mxu1 %v6869_v4  ;;  %4956 = vmatpush2.bf16.msra.mxu0 %v6870_v34  ;;  %v4315_v6 = vadd.f32 %v4314_v16, %v10250_v52  ;;  %v10543_v20 = vadd.f32 %v4385_v19, %v4313_v58  ;;  %v6873_v52 = vld [vmem:[%s11438_s3 + $0x500] ss:$8 sps:$4 sm:$0xff]   ;;  %v6876_v19 = vld [vmem:[%s11438_s3 + $0x6b4] ss:$8 sps:$4 sm:$0xff]   ;;  %v6886_v16 = vld [vmem:[%s11438_s3 + $0x690] ss:$8 sps:$4 sm:$0xff]  }
 0x374   :  { %4876 = vmatprep.subr.bf16.mxu1 %v6871_v60  ;;  %4957 = vmatprep.subr.bf16.mxu0 %v6872_v32  ;;  %v4316_v42 = vpop.f32.mrf.mxu1  ;;  %v6884_v58 = vld [vmem:[%s11438_s3 + $0x694] ss:$8 sps:$4 sm:$0xff]   ;;  %v6888_v4 = vld [vmem:[%s11438_s3 + $0x684] ss:$8 sps:$4 sm:$0xff]   ;;  %v6889_v34 = vld [vmem:[%s11438_s3 + $0x5c0] ss:$8 sps:$4 sm:$0xff]  }
 0x375   :  { %v4317_v23 = vadd.f32 %v4316_v42, %v4244_v14  ;;  %v10551_v26 = vadd.f32 %v4387_v38, %v4315_v6  ;;  %v6885_v38 = vld [vmem:[%s11438_s3 + $0x5d0] ss:$8 sps:$4 sm:$0xff]   ;;  %v6887_v14 = vld [vmem:[%s11438_s3 + $0x5c4] ss:$8 sps:$4 sm:$0xff]   ;;  %v6890_v6 = vld [vmem:[%s11438_s3 + $0x680] ss:$8 sps:$4 sm:$0xff]  }
 0x376   :  { %v6891_v60 = vld [vmem:[%s11438_s3 + $0x5b4] ss:$8 sps:$4 sm:$0xff]  }
 0x377   :  { %4877 = vmatpush1.bf16.msra.mxu1 %v6873_v52  ;;  %4958 = vmatpush2.bf16.msra.mxu0 %v6874_v30  ;;  %v10559_v22 = vadd.f32 %v4389_v35, %v4317_v23  ;;  %v6892_v32 = vld [vmem:[%s11438_s3 + $0x874] ss:$8 sps:$4 sm:$0xff]   ;;  %v6893_v23 = vld [vmem:[%s11438_s3 + $0x5b0] ss:$8 sps:$4 sm:$0xff]   ;;  %v6895_v52 = vld [vmem:[%s11438_s3 + $0x5a4] ss:$8 sps:$4 sm:$0xff]  }
 0x378   :  { %4878 = vmatprep.subr.bf16.mxu1 %v6875_v17  ;;  %4959 = vmatprep.subr.bf16.mxu0 %v6876_v19  ;;  %v6894_v35 = vld [vmem:[%s11438_s3 + $0x870] ss:$8 sps:$4 sm:$0xff]   ;;  %v6898_v17 = vld [vmem:[%s11438_s3 + $0x860] ss:$8 sps:$4 sm:$0xff]   ;;  %v6899_v19 = vld [vmem:[%s11438_s3 + $0x594] ss:$8 sps:$4 sm:$0xff]  }
 0x37b   :  { %4879 = vmatpush2.bf16.msra.mxu1 %v6877_v3  ;;  %4960 = vmatpush2.bf16.msra.mxu0 %v6878_v61  ;;  %v6900_v3 = vld [vmem:[%s11438_s3 + $0x854] ss:$8 sps:$4 sm:$0xff]  }
 0x37c   :  { %4880 = vmatprep.subr.bf16.mxu1 %v6879_v7  ;;  %4961 = vmatprep.subr.bf16.mxu0 %v6880_v41  ;;  %v6901_v7 = vld [vmem:[%s11438_s3 + $0x590] ss:$8 sps:$4 sm:$0xff]  }
 0x37d   :  { %v6902_v41 = vld [vmem:[%s11438_s3 + $0x850] ss:$8 sps:$4 sm:$0xff]  }
 0x37f   :  { %4881 = vmatpush2.bf16.msra.mxu1 %v6881_v18  ;;  %4962 = vmatpush2.bf16.msra.mxu0 %v6882_v1  ;;  %v6903_v18 = vld [vmem:[%s11438_s3 + $0x584] ss:$8 sps:$4 sm:$0xff]  }
 0x380   :  { %4882 = vmatprep.subr.bf16.mxu1 %v6883_v25  ;;  %4963 = vmatprep.subr.bf16.mxu0 %v6884_v58  ;;  %v6906_v58 = vld [vmem:[%s11438_s3 + $0x840] ss:$8 sps:$4 sm:$0xff]  }
 0x383   :  { %4883 = vmatpush2.bf16.msra.mxu1 %v6885_v38  ;;  %4964 = vmatpush2.bf16.msra.mxu0 %v6886_v16  ;;  %v6907_v16 = vld [vmem:[%s11438_s3 + $0x774] ss:$8 sps:$4 sm:$0xff]  }
 0x384   :  { %4884 = vmatprep.subr.bf16.mxu1 %v6887_v14  ;;  %4965 = vmatprep.subr.bf16.mxu0 %v6888_v4  ;;  %v6908_v14 = vld [vmem:[%s11438_s3 + $0x834] ss:$8 sps:$4 sm:$0xff]  }
 0x387   :  { %4885 = vmatpush2.bf16.msra.mxu1 %v6889_v34  ;;  %4966 = vmatpush2.bf16.msra.mxu0 %v6890_v6  ;;  %v10615_v42 = vpop.f32.mrf.mxu0  ;;  %v6959_v6 = vld [vmem:[%s11438_s3 + $0x794] ss:$8 sps:$4 sm:$0xff]  }
 0x388   :  { %4886 = vmatprep.subr.bf16.mxu1 %v6891_v60  ;;  %5081 = vmatprep.subr.bf16.mxu0 %v6892_v32  ;;  %v6909_v32 = vld [vmem:[%s11438_s3 + $0x770] ss:$8 sps:$4 sm:$0xff]  }
 0x389   :  { %v10635_v30 = vpop.f32.mrf.mxu0 }
 0x38a   :  { %6068 = vmatmul.mubr.msk.bf16.vlgmr.msra.gmra.mxu0 %vm8401_vm2, %v8119_v29  ;;  %v6896_v29 = vld [vmem:[%s11438_s3 + $0x864] ss:$8 sps:$4 sm:$0xff]  }
 0x38b   :  { %4887 = vmatpush2.bf16.msra.mxu1 %v6893_v23  ;;  %6071 = vmatprep.mubr.msk.bf16.mxu0 %vm8561_vm4, %v8172_v40  ;;  %v6897_v40 = vld [vmem:[%s11438_s3 + $0x5a0] ss:$8 sps:$4 sm:$0xff]   ;;  %v10649_v61 = vpop.f32.mrf.mxu0 }
 0x38c   :  { %5082 = vmatpush1.bf16.msra.mxu0 %v6894_v35  ;;  %4888 = vmatprep.subr.bf16.mxu1 %v6895_v52  ;;  %v6956_v52 = vld [vmem:[%s11438_s3 + $0x7b0] ss:$8 sps:$4 sm:$0xff]  }
 0x38d   :  { %5083 = vmatprep.subr.bf16.mxu0 %v6896_v29  ;;  %v10669_v1 = vpop.f32.mrf.mxu0 }
 0x38f   :  { %4889 = vmatpush2.bf16.msra.mxu1 %v6897_v40  ;;  %v10686_v34 = vpop.f32.mrf.mxu0  ;;  %v6913_v40 = vld [vmem:[%s11438_s3 + $0x760] ss:$8 sps:$4 sm:$0xff]  }
 0x390   :  { %5084 = vmatpush1.bf16.msra.mxu0 %v6898_v17  ;;  %4890 = vmatprep.subr.bf16.mxu1 %v6899_v19  ;;  %v6914_v17 = vld [vmem:[%s11438_s3 + $0x820] ss:$8 sps:$4 sm:$0xff]  }
 0x391   :  { %5085 = vmatprep.subr.bf16.mxu0 %v6900_v3  ;;  %v10718_v35 = vpop.f32.mrf.mxu0  ;;  %v6915_v3 = vld [vmem:[%s11438_s3 + $0x754] ss:$8 sps:$4 sm:$0xff]  }
 0x392   :  { %6074 = vmatmul.mubr.msk.bf16.gmra.mxu0 %vm8561_vm4, %v8168_v39  ;;  %v6904_v39 = vld [vmem:[%s11438_s3 + $0x844] ss:$8 sps:$4 sm:$0xff]  }
 0x393   :  { %4891 = vmatpush2.bf16.msra.mxu1 %v6901_v7  ;;  %6077 = vmatprep.mubr.msk.bf16.mxu0 %vm8628_vm5, %v8256_v53  ;;  %v6905_v53 = vld [vmem:[%s11438_s3 + $0x580] ss:$8 sps:$4 sm:$0xff]  }
 0x394   :  { %5086 = vmatpush1.bf16.msra.mxu0 %v6902_v41  ;;  %4892 = vmatprep.subr.bf16.mxu1 %v6903_v18  ;;  %v10740_v41 = vpop.f32.mrf.mxu0 }
 0x395   :  { %5087 = vmatprep.subr.bf16.mxu0 %v6904_v39  ;;  %v11655_v39 = vld [vmem:[#allocation28_spill] sm:$0xff] }
 0x397   :  { %4893 = vmatpush2.bf16.msra.mxu1 %v6905_v53  ;;  %v4426_v25 = vpop.f32.mrf.mxu1  ;;  %v11656_v53 = vld [vmem:[#allocation3_spill] sm:$0xff] }
 0x398   :  { %5088 = vmatpush1.bf16.msra.mxu0 %v6906_v58  ;;  %v10678_v38 = vadd.f32 %v4426_v25, %v10395_v12  ;;  %5008 = vmatprep.subr.bf16.mxu1 %v6907_v16  ;;  %v6917_v58 = vld [vmem:[%s11438_s3 + $0x750] ss:$8 sps:$4 sm:$0xff]  }
 0x399   :  { %5089 = vmatprep.subr.bf16.mxu0 %v6908_v14  ;;  %v4428_v4 = vpop.f32.mrf.mxu1  ;;  %v6919_v14 = vld [vmem:[%s11438_s3 + $0x744] ss:$8 sps:$4 sm:$0xff]  }
 0x39a   :  { %4895 = vmatmul.mubr.bf16.vlgmr.msra.gmra.mxu1 %v8719_v33  ;;  %6080 = vmatmul.mubr.msk.bf16.gmra.mxu0 %vm8628_vm5, %v8243_v59  ;;  %v10695_v12 = vadd.f32 %v4428_v4, %v10410_v50  ;;  %v6910_v33 = vld [vmem:[%s11438_s3 + $0x830] ss:$8 sps:$4 sm:$0xff]   ;;  %v6912_v50 = vld [vmem:[%s11438_s3 + $0x824] ss:$8 sps:$4 sm:$0xff]  }
 0x39b   :  { %4904 = vmatprep.mubr.bf16.mxu1 %v8800_v5  ;;  %6083 = vmatprep.mubr.msk.bf16.mxu0 %vm8712_vm6, %v8314_v15  ;;  %v4430_v60 = vpop.f32.mrf.mxu1  ;;  %v6911_v15 = vld [vmem:[%s11438_s3 + $0x764] ss:$8 sps:$4 sm:$0xff]  }
 0x39c   :  { %5009 = vmatpush1.bf16.msra.mxu1 %v6909_v32  ;;  %5090 = vmatpush1.bf16.msra.mxu0 %v6910_v33  ;;  %v10710_v5 = vadd.f32 %v4430_v60, %v10419_v8  ;;  %v6920_v4 = vld [vmem:[%s11438_s3 + $0x804] ss:$8 sps:$4 sm:$0xff]   ;;  %v10770_v32 = vpop.f32.mrf.mxu0 }
 0x39d   :  { %5010 = vmatprep.subr.bf16.mxu1 %v6911_v15  ;;  %5091 = vmatprep.subr.bf16.mxu0 %v6912_v50  ;;  %v4432_v23 = vpop.f32.mrf.mxu1  ;;  %v11658_v33 = vld [vmem:[#allocation43_spill] sm:$0xff] }
 0x39e   :  { %v10723_v29 = vadd.f32 %v4432_v23, %v10429_v2  ;;  %v6916_v2 = vld [vmem:[%s11438_s3 + $0x814] ss:$8 sps:$4 sm:$0xff]   ;;  %v6921_v23 = vld [vmem:[%s11438_s3 + $0x740] ss:$8 sps:$4 sm:$0xff]  }
 0x39f   :  { %v4436_v8 = vpop.f32.mrf.mxu1 }
 0x3a0   :  { %5011 = vmatpush1.bf16.msra.mxu1 %v6913_v40  ;;  %5092 = vmatpush1.bf16.msra.mxu0 %v6914_v17  ;;  %v10732_v19 = vadd.f32 %v4436_v8, %v10446_v47  ;;  %v6922_v8 = vld [vmem:[%s11438_s3 + $0x800] ss:$8 sps:$4 sm:$0xff]   ;;  %v6923_v17 = vld [vmem:[%s11438_s3 + $0x734] ss:$8 sps:$4 sm:$0xff]  }
 0x3a1   :  { %5012 = vmatprep.subr.bf16.mxu1 %v6915_v3  ;;  %5093 = vmatprep.subr.bf16.mxu0 %v6916_v2  ;;  %v4438_v7 = vpop.f32.mrf.mxu1  ;;  %v10792_v2 = vpop.f32.mrf.mxu0 }
 0x3a2   :  { %4905 = vmatmul.mubr.bf16.gmra.mxu1 %v8808_v57  ;;  %6086 = vmatmul.mubr.msk.bf16.gmra.mxu0 %vm8712_vm6, %v8294_v37  ;;  %v10749_v47 = vadd.f32 %v4438_v7, %v10462_v24  ;;  %v6918_v57 = vld [vmem:[%s11438_s3 + $0x810] ss:$8 sps:$4 sm:$0xff]  }
 0x3a3   :  { %4914 = vmatprep.mubr.bf16.mxu1 %v11655_v39  ;;  %5113 = vmatprep.mubr.bf16.mxu0 %v11656_v53  ;;  %v4440_v25 = vpop.f32.mrf.mxu1  ;;  %v11657_v37 = vld [vmem:[#allocation41_spill] sm:$0xff]  ;;  %v11660_v53 = vld [vmem:[#allocation31_spill] sm:$0xff] }
 0x3a4   :  { %5013 = vmatpush1.bf16.msra.mxu1 %v6917_v58  ;;  %5094 = vmatpush1.bf16.msra.mxu0 %v6918_v57  ;;  %v10762_v24 = vadd.f32 %v4440_v25, %v10471_v55  ;;  %v11659_v7 = vld [vmem:[#allocation45_spill] sm:$0xff]  ;;  %v11661_v25 = vld [vmem:[#allocation36_spill] sm:$0xff] }
 0x3a5   :  { %5014 = vmatprep.subr.bf16.mxu1 %v6919_v14  ;;  %5095 = vmatprep.subr.bf16.mxu0 %v6920_v4  ;;  %v4442_v60 = vpop.f32.mrf.mxu1  ;;  %v6925_v57 = vld [vmem:[%s11438_s3 + $0x730] ss:$8 sps:$4 sm:$0xff]   ;;  %v11662_v4 = vld [vmem:[#allocation46_spill] sm:$0xff] }
 0x3a6   :  { %v10775_v50 = vadd.f32 %v4442_v60, %v10481_v45  ;;  %v6924_v45 = vld [vmem:[%s11438_s3 + $0x8f4] ss:$8 sps:$4 sm:$0xff]   ;;  %v6926_v14 = vld [vmem:[%s11438_s3 + $0x8f0] ss:$8 sps:$4 sm:$0xff]  }
 0x3a7   :  { %v4446_v55 = vpop.f32.mrf.mxu1 }
 0x3a8   :  { %5015 = vmatpush1.bf16.msra.mxu1 %v6921_v23  ;;  %5096 = vmatpush1.bf16.msra.mxu0 %v6922_v8  ;;  %v10784_v40 = vadd.f32 %v4446_v55, %v10492_v46  ;;  %v6928_v23 = vld [vmem:[%s11438_s3 + $0x8e4] ss:$8 sps:$4 sm:$0xff]  }
 0x3a9   :  { %5016 = vmatprep.subr.bf16.mxu1 %v6923_v17  ;;  %5097 = vmatprep.subr.bf16.mxu0 %v6924_v45  ;;  %v4448_v3 = vpop.f32.mrf.mxu1  ;;  %v10818_v17 = vpop.f32.mrf.mxu0  ;;  %v11663_v45 = vld [vmem:[#allocation48_spill] sm:$0xff] }
 0x3aa   :  { %4915 = vmatmul.mubr.bf16.gmra.mxu1 %v11660_v53  ;;  %v10798_v46 = vadd.f32 %v4448_v3, %v10504_v54  ;;  %v6927_v54 = vld [vmem:[%s11438_s3 + $0x724] ss:$8 sps:$4 sm:$0xff]   ;;  %v6934_v3 = vld [vmem:[%s11438_s3 + $0x8d0] ss:$8 sps:$4 sm:$0xff]  }
 0x3ab   :  { %4924 = vmatprep.mubr.bf16.mxu1 %v11661_v25  ;;  %v4450_v58 = vpop.f32.mrf.mxu1  ;;  %v6929_v25 = vld [vmem:[%s11438_s3 + $0x720] ss:$8 sps:$4 sm:$0xff]  }
 0x3ac   :  { %5017 = vmatpush1.bf16.msra.mxu1 %v6925_v57  ;;  %5098 = vmatpush2.bf16.msra.mxu0 %v6926_v14  ;;  %v10810_v55 = vadd.f32 %v4450_v58, %v10512_v10  ;;  %v6930_v58 = vld [vmem:[%s11438_s3 + $0x8e0] ss:$8 sps:$4 sm:$0xff]   ;;  %v6931_v14 = vld [vmem:[%s11438_s3 + $0x714] ss:$8 sps:$4 sm:$0xff]  }
 0x3ad   :  { %5018 = vmatprep.subr.bf16.mxu1 %v6927_v54  ;;  %5099 = vmatprep.subr.bf16.mxu0 %v6928_v23  ;;  %v4452_v8 = vpop.f32.mrf.mxu1  ;;  %v10840_v23 = vpop.f32.mrf.mxu0 }
 0x3ae   :  { %v10823_v53 = vadd.f32 %v4452_v8, %v10521_v49  ;;  %v6932_v49 = vld [vmem:[%s11438_s3 + $0x8d4] ss:$8 sps:$4 sm:$0xff]  }
 0x3af   :  { %v4456_v10 = vpop.f32.mrf.mxu1  ;;  %v11665_v8 = vld [vmem:[#allocation49_spill] sm:$0xff]  ;;  %v10868_v60 = vpop.f32.mrf.mxu0 }
 0x3b0   :  { %5019 = vmatpush1.bf16.msra.mxu1 %v6929_v25  ;;  %5100 = vmatpush2.bf16.msra.mxu0 %v6930_v58  ;;  %v10832_v57 = vadd.f32 %v4456_v10, %v10531_v27  ;;  %v11666_v58 = vld [vmem:[#allocation39_spill] sm:$0xff]  ;;  %v11668_v10 = vld [vmem:[#allocation40_spill] sm:$0xff] }
 0x3b1   :  { %5020 = vmatprep.subr.bf16.mxu1 %v6931_v14  ;;  %5101 = vmatprep.subr.bf16.mxu0 %v6932_v49  ;;  %v4458_v54 = vpop.f32.mrf.mxu1  ;;  %v6933_v49 = vld [vmem:[%s11438_s3 + $0x710] ss:$8 sps:$4 sm:$0xff]  }
 0x3b2   :  { %11664 = vst [vmem:[#allocation7_spill] sm:$0xff] %v10832_v57  ;;  %4925 = vmatmul.mubr.bf16.gmra.mxu1 %v11666_v58  ;;  %v10846_v27 = vadd.f32 %v4458_v54, %v10543_v20  ;;  %v6935_v54 = vld [vmem:[%s11438_s3 + $0x704] ss:$8 sps:$4 sm:$0xff]  }
 0x3b3   :  { %6089 = vmatprep.mubr.msk.bf16.mxu1 %vm8401_vm2, %v11668_v10  ;;  %v4460_v14 = vpop.f32.mrf.mxu1  ;;  %v6936_v10 = vld [vmem:[%s11438_s3 + $0x8c4] ss:$8 sps:$4 sm:$0xff]  }
 0x3b4   :  { %11667 = vst [vmem:[#allocation35_spill] sm:$0xff] %v10846_v27  ;;  %5021 = vmatpush1.bf16.msra.mxu1 %v6933_v49  ;;  %5102 = vmatpush2.bf16.msra.mxu0 %v6934_v3  ;;  %v10860_v20 = vadd.f32 %v4460_v14, %v10551_v26  ;;  %v6937_v26 = vld [vmem:[%s11438_s3 + $0x700] ss:$8 sps:$4 sm:$0xff]  }
 0x3b5   :  { %5022 = vmatprep.subr.bf16.mxu1 %v6935_v54  ;;  %5103 = vmatprep.subr.bf16.mxu0 %v6936_v10  ;;  %v4462_v49 = vpop.f32.mrf.mxu1  ;;  %v6938_v14 = vld [vmem:[%s11438_s3 + $0x8c0] ss:$8 sps:$4 sm:$0xff]   ;;  %v6939_v54 = vld [vmem:[%s11438_s3 + $0x7f4] ss:$8 sps:$4 sm:$0xff]   ;;  %v10887_v10 = vpop.f32.mrf.mxu0 }
 0x3b6   :  { %11670 = vst [vmem:[#allocation28_spill] sm:$0xff] %v10860_v20  ;;  %v10873_v25 = vadd.f32 %v4462_v49, %v10559_v22  ;;  %v6940_v22 = vld [vmem:[%s11438_s3 + $0x8b4] ss:$8 sps:$4 sm:$0xff]   ;;  %v6941_v49 = vld [vmem:[%s11438_s3 + $0x7f0] ss:$8 sps:$4 sm:$0xff]   ;;  %v11675_v58 = vld [vmem:[#allocation23_spill] sm:$0xff] }
 0x3b8   :  { %11672 = vst [vmem:[#allocation3_spill] sm:$0xff] %v10873_v25  ;;  %5023 = vmatpush1.bf16.msra.mxu1 %v6937_v26  ;;  %5104 = vmatpush2.bf16.msra.mxu0 %v6938_v14  ;;  %v6942_v26 = vld [vmem:[%s11438_s3 + $0x8b0] ss:$8 sps:$4 sm:$0xff]   ;;  %v6943_v14 = vld [vmem:[%s11438_s3 + $0x7e4] ss:$8 sps:$4 sm:$0xff]  }
 0x3b9   :  { %5024 = vmatprep.subr.bf16.mxu1 %v6939_v54  ;;  %5105 = vmatprep.subr.bf16.mxu0 %v6940_v22  ;;  %v6944_v54 = vld [vmem:[%s11438_s3 + $0x8a4] ss:$8 sps:$4 sm:$0xff]   ;;  %v10901_v22 = vpop.f32.mrf.mxu0  ;;  %v11674_v25 = vld [vmem:[#allocation21_spill] sm:$0xff] }
 0x3bb   :  { %v10915_v39 = vpop.f32.mrf.mxu0 }
 0x3bc   :  { %5025 = vmatpush2.bf16.msra.mxu1 %v6941_v49  ;;  %5106 = vmatpush2.bf16.msra.mxu0 %v6942_v26  ;;  %v6945_v49 = vld [vmem:[%s11438_s3 + $0x7e0] ss:$8 sps:$4 sm:$0xff]  }
 0x3bd   :  { %5026 = vmatprep.subr.bf16.mxu1 %v6943_v14  ;;  %5107 = vmatprep.subr.bf16.mxu0 %v6944_v54  ;;  %v6946_v26 = vld [vmem:[%s11438_s3 + $0x8a0] ss:$8 sps:$4 sm:$0xff]   ;;  %v6947_v14 = vld [vmem:[%s11438_s3 + $0x7d4] ss:$8 sps:$4 sm:$0xff]   ;;  %v10929_v15 = vpop.f32.mrf.mxu0 }
 0x3be   :  { %v6948_v54 = vld [vmem:[%s11438_s3 + $0x894] ss:$8 sps:$4 sm:$0xff]  }
 0x3c0   :  { %5027 = vmatpush2.bf16.msra.mxu1 %v6945_v49  ;;  %5108 = vmatpush2.bf16.msra.mxu0 %v6946_v26  ;;  %v6949_v49 = vld [vmem:[%s11438_s3 + $0x7d0] ss:$8 sps:$4 sm:$0xff]  }
 0x3c1   :  { %5028 = vmatprep.subr.bf16.mxu1 %v6947_v14  ;;  %5109 = vmatprep.subr.bf16.mxu0 %v6948_v54  ;;  %v6950_v26 = vld [vmem:[%s11438_s3 + $0x890] ss:$8 sps:$4 sm:$0xff]   ;;  %v6951_v14 = vld [vmem:[%s11438_s3 + $0x7c4] ss:$8 sps:$4 sm:$0xff]  }
 0x3c2   :  { %v6952_v54 = vld [vmem:[%s11438_s3 + $0x884] ss:$8 sps:$4 sm:$0xff]  }
 0x3c4   :  { %5029 = vmatpush2.bf16.msra.mxu1 %v6949_v49  ;;  %5110 = vmatpush2.bf16.msra.mxu0 %v6950_v26  ;;  %v6953_v49 = vld [vmem:[%s11438_s3 + $0x7c0] ss:$8 sps:$4 sm:$0xff]  }
 0x3c5   :  { %5030 = vmatprep.subr.bf16.mxu1 %v6951_v14  ;;  %5111 = vmatprep.subr.bf16.mxu0 %v6952_v54  ;;  %v6954_v26 = vld [vmem:[%s11438_s3 + $0x880] ss:$8 sps:$4 sm:$0xff]   ;;  %v6955_v14 = vld [vmem:[%s11438_s3 + $0x7b4] ss:$8 sps:$4 sm:$0xff]  }
 0x3c6   :  { %v11673_v54 = vld [vmem:[#allocation5_spill] sm:$0xff] }
 0x3c8   :  { %5031 = vmatpush2.bf16.msra.mxu1 %v6953_v49  ;;  %5112 = vmatpush2.bf16.msra.mxu0 %v6954_v26  ;;  %v4661_v16 = vpop.f32.mrf.mxu0  ;;  %v6957_v26 = vld [vmem:[%s11438_s3 + $0x7a4] ss:$8 sps:$4 sm:$0xff]  }
 0x3c9   :  { %5032 = vmatprep.subr.bf16.mxu1 %v6955_v14  ;;  %v6958_v14 = vld [vmem:[%s11438_s3 + $0x7a0] ss:$8 sps:$4 sm:$0xff]  }
 0x3ca   :  { %v4663_v18 = vpop.f32.mrf.mxu0 }
 0x3cb   :  { %5114 = vmatmul.mubr.bf16.vlgmr.msra.gmra.mxu0 %v11673_v54 }
 0x3cc   :  { %5033 = vmatpush2.bf16.msra.mxu1 %v6956_v52  ;;  %5123 = vmatprep.mubr.bf16.mxu0 %v11602_v13  ;;  %v4665_v49 = vpop.f32.mrf.mxu0  ;;  %v6960_v13 = vld [vmem:[%s11438_s3 + $0x790] ss:$8 sps:$4 sm:$0xff]  }
 0x3cd   :  { %5034 = vmatprep.subr.bf16.mxu1 %v6957_v26 }
 0x3ce   :  { %v4667_v59 = vpop.f32.mrf.mxu0 }
 0x3d0   :  { %5035 = vmatpush2.bf16.msra.mxu1 %v6958_v14  ;;  %v4671_v54 = vpop.f32.mrf.mxu0  ;;  %v6961_v14 = vld [vmem:[%s11438_s3 + $0x784] ss:$8 sps:$4 sm:$0xff]  }
 0x3d1   :  { %5036 = vmatprep.subr.bf16.mxu1 %v6959_v6  ;;  %v6962_v6 = vld [vmem:[%s11438_s3 + $0x780] ss:$8 sps:$4 sm:$0xff]  }
 0x3d2   :  { %v4673_v52 = vpop.f32.mrf.mxu0 }
 0x3d3   :  { %5124 = vmatmul.mubr.bf16.gmra.mxu0 %v11603_v62 }
 0x3d4   :  { %5037 = vmatpush2.bf16.msra.mxu1 %v6960_v13  ;;  %5133 = vmatprep.mubr.bf16.mxu0 %v11604_v11  ;;  %v4675_v26 = vpop.f32.mrf.mxu0  ;;  %v6963_v13 = vld [vmem:[%s11438_s3 + $0x974] ss:$8 sps:$4 sm:$0xff]  }
 0x3d5   :  { %5038 = vmatprep.subr.bf16.mxu1 %v6961_v14 }
 0x3d6   :  { %v4677_v20 = vpop.f32.mrf.mxu0 }
 0x3d8   :  { %5039 = vmatpush2.bf16.msra.mxu1 %v6962_v6  ;;  %v4588_v62 = vpop.f32.mrf.mxu1  ;;  %v4681_v6 = vpop.f32.mrf.mxu0 }
 0x3d9   :  { %v4589_v3 = vadd.f32 %v4588_v62, %v10615_v42  ;;  %5154 = vmatprep.subr.bf16.mxu1 %v6963_v13  ;;  %v6964_v62 = vld [vmem:[%s11438_s3 + $0x970] ss:$8 sps:$4 sm:$0xff]   ;;  %v6966_v13 = vld [vmem:[%s11438_s3 + $0x960] ss:$8 sps:$4 sm:$0xff]  }
 0x3da   :  { %v4590_v11 = vpop.f32.mrf.mxu1 }
 0x3db   :  { %6092 = vmatmul.mubr.msk.bf16.vlgmr.msra.gmra.mxu1 %vm8401_vm2, %v11674_v25  ;;  %5134 = vmatmul.mubr.bf16.gmra.mxu0 %v11605_v31  ;;  %v4591_v14 = vadd.f32 %v4590_v11, %v10635_v30  ;;  %v10974_v27 = vadd.f32 %v4661_v16, %v4589_v3  ;;  %v6965_v30 = vld [vmem:[%s11438_s3 + $0x964] ss:$8 sps:$4 sm:$0xff]   ;;  %v6967_v11 = vld [vmem:[%s11438_s3 + $0x954] ss:$8 sps:$4 sm:$0xff]  }
 0x3dc   :  { %6095 = vmatprep.mubr.msk.bf16.mxu1 %vm8561_vm4, %v11675_v58  ;;  %5143 = vmatprep.mubr.bf16.mxu0 %v9071_v48  ;;  %v4592_v42 = vpop.f32.mrf.mxu1  ;;  %v4683_v48 = vpop.f32.mrf.mxu0 }
 0x3dd   :  { %5155 = vmatpush1.bf16.msra.mxu1 %v6964_v62  ;;  %v4593_v43 = vadd.f32 %v4592_v42, %v10649_v61  ;;  %v10984_v31 = vadd.f32 %v4663_v18, %v4591_v14 }
 0x3de   :  { %5156 = vmatprep.subr.bf16.mxu1 %v6965_v30  ;;  %v4594_v16 = vpop.f32.mrf.mxu1  ;;  %v4685_v62 = vpop.f32.mrf.mxu0 }
 0x3df   :  { %v4595_v25 = vadd.f32 %v4594_v16, %v10669_v1  ;;  %v10990_v58 = vadd.f32 %v4665_v49, %v4593_v43  ;;  %v11676_v1 = vld [vmem:[#allocation22_spill] sm:$0xff]  ;;  %v6968_v43 = vld [vmem:[%s11438_s3 + $0x950] ss:$8 sps:$4 sm:$0xff]  }
 0x3e0   :  { %v4598_v3 = vpop.f32.mrf.mxu1 }
 0x3e1   :  { %5157 = vmatpush1.bf16.msra.mxu1 %v6966_v13  ;;  %v4599_v61 = vadd.f32 %v4598_v3, %v10686_v34  ;;  %v10996_v18 = vadd.f32 %v4667_v59, %v4595_v25  ;;  %v11677_v34 = vld [vmem:[#allocation25_spill] sm:$0xff]  ;;  %v4687_v25 = vpop.f32.mrf.mxu0  ;;  %v6970_v13 = vld [vmem:[%s11438_s3 + $0x940] ss:$8 sps:$4 sm:$0xff]  }
 0x3e2   :  { %5158 = vmatprep.subr.bf16.mxu1 %v6967_v11  ;;  %v4600_v14 = vpop.f32.mrf.mxu1 }
 0x3e3   :  { %6098 = vmatmul.mubr.msk.bf16.gmra.mxu1 %vm8561_vm4, %v11676_v1  ;;  %5144 = vmatmul.mubr.bf16.gmra.mxu0 %v9098_v51  ;;  %v4601_v49 = vadd.f32 %v4600_v14, %v10718_v35  ;;  %v11006_v42 = vadd.f32 %v4671_v54, %v4599_v61  ;;  %v6969_v51 = vld [vmem:[%s11438_s3 + $0x944] ss:$8 sps:$4 sm:$0xff]   ;;  %v6971_v61 = vld [vmem:[%s11438_s3 + $0x934] ss:$8 sps:$4 sm:$0xff]   ;;  %v4691_v1 = vpop.f32.mrf.mxu0 }
 0x3e4   :  { %6101 = vmatprep.mubr.msk.bf16.mxu1 %vm8628_vm5, %v11677_v34  ;;  %v4602_v59 = vpop.f32.mrf.mxu1 }
 0x3e5   :  { %5159 = vmatpush1.bf16.msra.mxu1 %v6968_v43  ;;  %v4603_v63 = vadd.f32 %v4602_v59, %v10740_v41  ;;  %v11015_v30 = vadd.f32 %v4673_v52, %v4601_v49  ;;  %v11679_v49 = vld [vmem:[#allocation27_spill] sm:$0xff] }
 0x3e6   :  { %5160 = vmatprep.subr.bf16.mxu1 %v6969_v51  ;;  %v4604_v35 = vpop.f32.mrf.mxu1 }
 0x3e7   :  { %v4605_v54 = vadd.f32 %v4604_v35, %v10770_v32  ;;  %v11021_v16 = vadd.f32 %v4675_v26, %v4603_v63  ;;  %v11678_v32 = vld [vmem:[#allocation24_spill] sm:$0xff]  ;;  %v4693_v63 = vpop.f32.mrf.mxu0  ;;  %v6974_v35 = vld [vmem:[%s11438_s3 + $0x920] ss:$8 sps:$4 sm:$0xff]  }
 0x3e8   :  { %v4608_v3 = vpop.f32.mrf.mxu1 }
 0x3e9   :  { %5161 = vmatpush1.bf16.msra.mxu1 %v6970_v13  ;;  %v4609_v41 = vadd.f32 %v4608_v3, %v10792_v2  ;;  %v11027_v52 = vadd.f32 %v4677_v20, %v4605_v54  ;;  %v6972_v20 = vld [vmem:[%s11438_s3 + $0x930] ss:$8 sps:$4 sm:$0xff]   ;;  %v6975_v54 = vld [vmem:[%s11438_s3 + $0x914] ss:$8 sps:$4 sm:$0xff]  }
 0x3ea   :  { %5162 = vmatprep.subr.bf16.mxu1 %v6971_v61  ;;  %v4610_v11 = vpop.f32.mrf.mxu1  ;;  %v11681_v61 = vld [vmem:[#allocation30_spill] sm:$0xff] }
 0x3eb   :  { %6104 = vmatmul.mubr.msk.bf16.gmra.mxu1 %vm8628_vm5, %v11678_v32  ;;  %v4611_v26 = vadd.f32 %v4610_v11, %v10818_v17  ;;  %v11036_v14 = vadd.f32 %v4681_v6, %v4609_v41  ;;  %v4695_v41 = vpop.f32.mrf.mxu0 }
 0x3ec   :  { %6107 = vmatprep.mubr.msk.bf16.mxu1 %vm8712_vm6, %v11679_v49  ;;  %v4612_v2 = vpop.f32.mrf.mxu1 }
 0x3ed   :  { %5163 = vmatpush1.bf16.msra.mxu1 %v6972_v20  ;;  %v4613_v34 = vadd.f32 %v4612_v2, %v10840_v23  ;;  %v11045_v59 = vadd.f32 %v4683_v48, %v4611_v26  ;;  %v4697_v49 = vpop.f32.mrf.mxu0  ;;  %v6978_v2 = vld [vmem:[%s11438_s3 + $0x900] ss:$8 sps:$4 sm:$0xff]  }
 0x3ee   :  { %5164 = vmatprep.subr.bf16.mxu1 %v6973_v21  ;;  %v4614_v17 = vpop.f32.mrf.mxu1  ;;  %v6982_v21 = vld [vmem:[%s11438_s3 + $0x9e0] ss:$8 sps:$4 sm:$0xff]  }
 0x3ef   :  { %v4615_v6 = vadd.f32 %v4614_v17, %v10868_v60  ;;  %v11051_v43 = vadd.f32 %v4685_v62, %v4613_v34  ;;  %v11680_v60 = vld [vmem:[#allocation26_spill] sm:$0xff]  ;;  %v6980_v34 = vld [vmem:[%s11438_s3 + $0x9f0] ss:$8 sps:$4 sm:$0xff]   ;;  %v6983_v17 = vld [vmem:[%s11438_s3 + $0x9d4] ss:$8 sps:$4 sm:$0xff]  }
 0x3f0   :  { %v4618_v51 = vpop.f32.mrf.mxu1 }
 0x3f1   :  { %5165 = vmatpush1.bf16.msra.mxu1 %v6974_v35  ;;  %v4619_v23 = vadd.f32 %v4618_v51, %v10887_v10  ;;  %v11057_v48 = vadd.f32 %v4687_v25, %v4615_v6  ;;  %v6976_v25 = vld [vmem:[%s11438_s3 + $0x910] ss:$8 sps:$4 sm:$0xff]   ;;  %v6986_v51 = vld [vmem:[%s11438_s3 + $0x9c0] ss:$8 sps:$4 sm:$0xff]  }
 0x3f2   :  { %5166 = vmatprep.subr.bf16.mxu1 %v6975_v54  ;;  %v4620_v3 = vpop.f32.mrf.mxu1  ;;  %v6984_v6 = vld [vmem:[%s11438_s3 + $0x9d0] ss:$8 sps:$4 sm:$0xff]  }
 0x3f3   :  { %6110 = vmatmul.mubr.msk.bf16.gmra.mxu1 %vm8712_vm6, %v11680_v60  ;;  %v4621_v62 = vadd.f32 %v4620_v3, %v10901_v22  ;;  %v11066_v13 = vadd.f32 %v4691_v1, %v4619_v23  ;;  %v6987_v23 = vld [vmem:[%s11438_s3 + $0x9b4] ss:$8 sps:$4 sm:$0xff]   ;;  %v6988_v3 = vld [vmem:[%s11438_s3 + $0x9b0] ss:$8 sps:$4 sm:$0xff]  }
 0x3f4   :  { %5186 = vmatprep.mubr.bf16.mxu1 %v11681_v61  ;;  %v4622_v10 = vpop.f32.mrf.mxu1  ;;  %v6990_v61 = vld [vmem:[%s11438_s3 + $0x9a0] ss:$8 sps:$4 sm:$0xff]  }
 0x3f5   :  { %5167 = vmatpush1.bf16.msra.mxu1 %v6976_v25  ;;  %v4623_v11 = vadd.f32 %v4622_v10, %v10915_v39  ;;  %v11073_v32 = vadd.f32 %v4693_v63, %v4621_v62  ;;  %v6979_v39 = vld [vmem:[%s11438_s3 + $0x9f4] ss:$8 sps:$4 sm:$0xff]   ;;  %v6985_v63 = vld [vmem:[%s11438_s3 + $0x9c4] ss:$8 sps:$4 sm:$0xff]  }
 0x3f6   :  { %5168 = vmatprep.subr.bf16.mxu1 %v6977_v36  ;;  %v4624_v22 = vpop.f32.mrf.mxu1  ;;  %v6989_v62 = vld [vmem:[%s11438_s3 + $0x9a4] ss:$8 sps:$4 sm:$0xff]   ;;  %v6991_v25 = vld [vmem:[%s11438_s3 + $0x994] ss:$8 sps:$4 sm:$0xff]   ;;  %v6992_v36 = vld [vmem:[%s11438_s3 + $0x990] ss:$8 sps:$4 sm:$0xff]  }
 0x3f7   :  { %v4625_v26 = vadd.f32 %v4624_v22, %v10929_v15  ;;  %v11079_v1 = vadd.f32 %v4695_v41, %v4623_v11  ;;  %v6981_v15 = vld [vmem:[%s11438_s3 + $0x9e4] ss:$8 sps:$4 sm:$0xff]  }
 0x3f9   :  { %5169 = vmatpush1.bf16.msra.mxu1 %v6978_v2  ;;  %v11084_v20 = vadd.f32 %v4697_v49, %v4625_v26  ;;  %v11683_v26 = vld [vmem:[#allocation11_spill] sm:$0xff]  ;;  %v11684_v49 = vld [vmem:[#allocation8_spill] sm:$0xff] }
 0x3fa   :  { %5170 = vmatprep.subr.bf16.mxu1 %v6979_v39  ;;  %v2888_v2 = vadd.f32 %v11684_v49, %v11683_v26  ;;  %v6993_v39 = vld [vmem:[%s11438_s3 + $0x984] ss:$8 sps:$4 sm:$0xff]   ;;  %v11689_v26 = vld [vmem:[#allocation9_spill] sm:$0xff] }
 0x3fb   :  { %11682 = vst [vmem:[#allocation41_spill] sm:$0xff] %v11084_v20  ;;  %v11690_v20 = vld [vmem:[#allocation32_spill] sm:$0xff] }
 0x3fd   :  { %5171 = vmatpush2.bf16.msra.mxu1 %v6980_v34  ;;  %v6994_v34 = vld [vmem:[%s11438_s3 + $0x980] ss:$8 sps:$4 sm:$0xff]  }
 0x3fe   :  { %5172 = vmatprep.subr.bf16.mxu1 %v6981_v15 }
 0x401   :  { %5173 = vmatpush2.bf16.msra.mxu1 %v6982_v21 }
 0x402   :  { %5174 = vmatprep.subr.bf16.mxu1 %v6983_v17  ;;  %v11685_v17 = vld [vmem:[#allocation17_spill] sm:$0xff] }
 0x405   :  { %5175 = vmatpush2.bf16.msra.mxu1 %v6984_v6  ;;  %v2961_v6 = vadd.f32 %v11685_v17, %v2888_v2  ;;  %v11692_v17 = vld [vmem:[#allocation13_spill] sm:$0xff] }
 0x406   :  { %5176 = vmatprep.subr.bf16.mxu1 %v6985_v63 }
 0x409   :  { %5177 = vmatpush2.bf16.msra.mxu1 %v6986_v51  ;;  %v4807_v35 = vpop.f32.mrf.mxu0 }
 0x40a   :  { %5178 = vmatprep.subr.bf16.mxu1 %v6987_v23  ;;  %v11686_v23 = vld [vmem:[#allocation19_spill] sm:$0xff] }
 0x40b   :  { %v4809_v54 = vpop.f32.mrf.mxu0 }
 0x40d   :  { %5179 = vmatpush2.bf16.msra.mxu1 %v6988_v3  ;;  %v4811_v60 = vpop.f32.mrf.mxu0  ;;  %v3034_v3 = vadd.f32 %v11686_v23, %v2961_v6 }
 0x40e   :  { %5180 = vmatprep.subr.bf16.mxu1 %v6989_v62 }
 0x40f   :  { %v4813_v41 = vpop.f32.mrf.mxu0  ;;  %v3107_v6 = vadd.f32 %v11692_v17, %v3034_v3  ;;  %v11695_v3 = vmax.f32 %v9860_v56, %v10710_v5  ;;  %v11702_v17 = vld [vmem:[#allocation20_spill] sm:$0xff] }
 0x411   :  { %5181 = vmatpush2.bf16.msra.mxu1 %v6990_v61  ;;  %v4817_v10 = vpop.f32.mrf.mxu0  ;;  %v11687_v61 = vld [vmem:[#allocation29_spill] sm:$0xff] }
 0x412   :  { %5182 = vmatprep.subr.bf16.mxu1 %v6991_v25 }
 0x413   :  { %v4819_v11 = vpop.f32.mrf.mxu0 }
 0x415   :  { %5183 = vmatpush2.bf16.msra.mxu1 %v6992_v36  ;;  %v4821_v22 = vpop.f32.mrf.mxu0  ;;  %v11688_v36 = vld [vmem:[#allocation12_spill] sm:$0xff] }
 0x416   :  { %5184 = vmatprep.subr.bf16.mxu1 %v6993_v39  ;;  %v2898_v49 = vadd.f32 %v11689_v26, %v11688_v36 }
 0x417   :  { %v4823_v15 = vpop.f32.mrf.mxu0 }
 0x419   :  { %5185 = vmatpush2.bf16.msra.mxu1 %v6994_v34  ;;  %v4734_v21 = vpop.f32.mrf.mxu1  ;;  %v4827_v39 = vpop.f32.mrf.mxu0 }
 0x41a   :  { %v4735_v63 = vadd.f32 %v4734_v21, %v10974_v27  ;;  %v11691_v27 = vmax.f32 %v9836_v0, %v10678_v38 }
 0x41b   :  { %v4736_v51 = vpop.f32.mrf.mxu1 }
 0x41c   :  { %v4808_v62 = vadd.f32 %v4807_v35, %v4735_v63  ;;  %5187 = vmatmul.mubr.bf16.vlgmr.msra.gmra.mxu1 %v11687_v61  ;;  %v4737_v25 = vadd.f32 %v4736_v51, %v10984_v31  ;;  %v11693_v51 = vmax.f32 %v9849_v9, %v10695_v12  ;;  %v4829_v61 = vpop.f32.mrf.mxu0  ;;  %v11697_v12 = vld [vmem:[#allocation33_spill] sm:$0xff] }
 0x41d   :  { %5196 = vmatprep.mubr.bf16.mxu1 %v11690_v20  ;;  %v4738_v34 = vpop.f32.mrf.mxu1  ;;  %v11694_v20 = vld [vmem:[#allocation15_spill] sm:$0xff] }
 0x41e   :  { %v4810_v57 = vadd.f32 %v4809_v54, %v4737_v25  ;;  %v4739_v2 = vadd.f32 %v4738_v34, %v10990_v58  ;;  %v11148_v21 = vmax.f32 %v11691_v27, %v4808_v62  ;;  %v2971_v54 = vadd.f32 %v11694_v20, %v2898_v49  ;;  %v11696_v62 = vld [vmem:[#allocation42_spill] sm:$0xff]  ;;  %v11698_v49 = vld [vmem:[#allocation16_spill] sm:$0xff]  ;;  %v4831_v34 = vpop.f32.mrf.mxu0 }
 0x41f   :  { %v4740_v35 = vpop.f32.mrf.mxu1  ;;  %v4468_v25 = vmax.f32 %v3107_v6, %v10723_v29  ;;  %v11699_v29 = vld [vmem:[#allocation6_spill] sm:$0xff]  ;;  %v11701_v27 = vmax.f32 %v9876_v44, %v10732_v19  ;;  %v11704_v20 = vld [vmem:[#allocation4_spill] sm:$0xff] }
 0x420   :  { %v4812_v63 = vadd.f32 %v4811_v60, %v4739_v2  ;;  %v4741_v31 = vadd.f32 %v4740_v35, %v10996_v18  ;;  %v11155_v23 = vmax.f32 %v11693_v51, %v4810_v57  ;;  %v3044_v36 = vadd.f32 %v11696_v62, %v2971_v54  ;;  %v4833_v54 = vpop.f32.mrf.mxu0  ;;  %v11709_v62 = vld [vmem:[#allocation14_spill] sm:$0xff] }
 0x421   :  { %v4744_v58 = vpop.f32.mrf.mxu1 }
 0x422   :  { %v4814_v0 = vadd.f32 %v4813_v41, %v4741_v31  ;;  %v4745_v38 = vadd.f32 %v4744_v58, %v11006_v42  ;;  %v11163_v60 = vmax.f32 %v11695_v3, %v4812_v63  ;;  %v2908_v41 = vadd.f32 %v11699_v29, %v11698_v49  ;;  %v11700_v42 = vld [vmem:[#allocation37_spill] sm:$0xff]  ;;  %v11714_v49 = vld [vmem:[#allocation44_spill] sm:$0xff] }
 0x423   :  { %v4746_v18 = vpop.f32.mrf.mxu1  ;;  %v11703_v31 = vmax.f32 %v11657_v37, %v10749_v47  ;;  %v11707_v37 = vld [vmem:[#allocation38_spill] sm:$0xff] }
 0x424   :  { %v4818_v9 = vadd.f32 %v4817_v10, %v4745_v38  ;;  %5197 = vmatmul.mubr.bf16.gmra.mxu1 %v11697_v12  ;;  %v4747_v57 = vadd.f32 %v4746_v18, %v11015_v30  ;;  %v11168_v26 = vmax.f32 %v4468_v25, %v4814_v0  ;;  %v3117_v30 = vadd.f32 %v11702_v17, %v3044_v36  ;;  %v11706_v0 = vld [vmem:[#allocation47_spill] sm:$0xff]  ;;  %v4837_v36 = vpop.f32.mrf.mxu0  ;;  %v11720_v17 = vld [vmem:[#allocation53_spill] sm:$0xff] }
 0x425   :  { %5206 = vmatprep.mubr.bf16.mxu1 %v11700_v42  ;;  %v4748_v2 = vpop.f32.mrf.mxu1  ;;  %v11705_v25 = vmax.f32 %v11658_v33, %v10762_v24  ;;  %v11712_v12 = vmax.f32 %v11659_v7, %v10784_v40  ;;  %v11715_v42 = vmax.f32 %v11662_v4, %v10798_v46 }
 0x426   :  { %v4820_v56 = vadd.f32 %v4819_v11, %v4747_v57  ;;  %v4749_v5 = vadd.f32 %v4748_v2, %v11021_v16  ;;  %v11177_v10 = vmax.f32 %v11701_v27, %v4818_v9  ;;  %v2981_v11 = vadd.f32 %v11704_v20, %v2908_v41  ;;  %v11722_v20 = vld [vmem:[#allocation7_spill] sm:$0xff] }
 0x427   :  { %v4750_v35 = vpop.f32.mrf.mxu1  ;;  %v4472_v58 = vmax.f32 %v3117_v30, %v10775_v50  ;;  %v11710_v50 = vld [vmem:[#allocation18_spill] sm:$0xff] }
 0x428   :  { %v4822_v6 = vadd.f32 %v4821_v22, %v4749_v5  ;;  %v4751_v63 = vadd.f32 %v4750_v35, %v11027_v52  ;;  %v11184_v51 = vmax.f32 %v11703_v31, %v4820_v56  ;;  %v3054_v38 = vadd.f32 %v11706_v0, %v2981_v11  ;;  %v11717_v56 = vld [vmem:[#allocation10_spill] sm:$0xff]  ;;  %v4839_v5 = vpop.f32.mrf.mxu0 }
 0x429   :  { %v4754_v16 = vpop.f32.mrf.mxu1  ;;  %v11718_v35 = vmax.f32 %v11663_v45, %v10810_v55  ;;  %v11723_v55 = vmax.f32 %v11665_v8, %v11722_v20 }
 0x42a   :  { %v4824_v44 = vadd.f32 %v4823_v15, %v4751_v63  ;;  %v4755_v19 = vadd.f32 %v4754_v16, %v11036_v14  ;;  %v11192_v22 = vmax.f32 %v11705_v25, %v4822_v6  ;;  %v2918_v15 = vadd.f32 %v11710_v50, %v11709_v62  ;;  %v11711_v14 = vld [vmem:[#allocation34_spill] sm:$0xff]  ;;  %v4841_v63 = vpop.f32.mrf.mxu0 }
 0x42b   :  { %v4756_v52 = vpop.f32.mrf.mxu1 }
 0x42c   :  { %v4828_v47 = vadd.f32 %v4827_v39, %v4755_v19  ;;  %5207 = vmatmul.mubr.bf16.gmra.mxu1 %v11707_v37  ;;  %v4757_v3 = vadd.f32 %v4756_v52, %v11045_v59  ;;  %v11197_v18 = vmax.f32 %v4472_v58, %v4824_v44  ;;  %v3127_v59 = vadd.f32 %v11714_v49, %v3054_v38  ;;  %v11726_v44 = vld [vmem:[#allocation41_spill] sm:$0xff]  ;;  %v11727_v19 = vld [vmem:[#allocation50_spill] sm:$0xff]  ;;  %v4843_v0 = vpop.f32.mrf.mxu0  ;;  %v11731_v38 = vld [vmem:[#allocation3_spill] sm:$0xff] }
 0x42d   :  { %5216 = vmatprep.mubr.bf16.mxu1 %v11711_v14  ;;  %v4758_v9 = vpop.f32.mrf.mxu1  ;;  %v11732_v37 = vld [vmem:[#allocation51_spill] sm:$0xff] }
 0x42e   :  { %11708 = vst [vmem:[#allocation43_spill] sm:$0xff] %v11197_v18  ;;  %v4830_v24 = vadd.f32 %v4829_v61, %v4757_v3  ;;  %v4759_v33 = vadd.f32 %v4758_v9, %v11051_v43  ;;  %v11206_v39 = vmax.f32 %v11712_v12, %v4828_v47  ;;  %v2991_v61 = vadd.f32 %v11717_v56, %v2918_v15  ;;  %v11733_v3 = vld [vmem:[#allocation28_spill] sm:$0xff] }
 0x42f   :  { %v4760_v57 = vpop.f32.mrf.mxu1  ;;  %v4476_v27 = vmax.f32 %v3127_v59, %v10823_v53  ;;  %v11734_v8 = vmax.f32 %v11732_v37, %v11733_v3 }
 0x430   :  { %11713 = vst [vmem:[#allocation45_spill] sm:$0xff] %v11206_v39  ;;  %v4832_v29 = vadd.f32 %v4831_v34, %v4759_v33  ;;  %v4761_v41 = vadd.f32 %v4760_v57, %v11057_v48  ;;  %v11213_v2 = vmax.f32 %v11715_v42, %v4830_v24  ;;  %v3064_v30 = vadd.f32 %v11720_v17, %v2991_v61 }
 0x431   :  { %v4764_v43 = vpop.f32.mrf.mxu1 }
 0x432   :  { %11716 = vst [vmem:[#allocation31_spill] sm:$0xff] %v11213_v2  ;;  %v4834_v40 = vadd.f32 %v4833_v54, %v4761_v41  ;;  %v4765_v7 = vadd.f32 %v4764_v43, %v11066_v13  ;;  %v11221_v34 = vmax.f32 %v11718_v35, %v4832_v29  ;;  %v11725_v54 = vld [vmem:[#allocation52_spill] sm:$0xff] }
 0x433   :  { %v4766_v48 = vpop.f32.mrf.mxu1  ;;  %v3137_v16 = vadd.f32 %v11725_v54, %v3064_v30 }
 0x434   :  { %11719 = vst [vmem:[#allocation36_spill] sm:$0xff] %v11221_v34  ;;  %v4838_v46 = vadd.f32 %v4837_v36, %v4765_v7  ;;  %5217 = vmatmul.mubr.bf16.gmra.mxu1 %v10434_v28  ;;  %v4767_v4 = vadd.f32 %v4766_v48, %v11073_v32  ;;  %v11226_v6 = vmax.f32 %v4476_v27, %v4834_v40  ;;  %v11728_v32 = vld [vmem:[#allocation35_spill] sm:$0xff] }
 0x435   :  { %v4768_v53 = vpop.f32.mrf.mxu1  ;;  %v11729_v25 = vmax.f32 %v11727_v19, %v11728_v32  ;;  %v4480_v47 = vmax.f32 %v3137_v16, %v11731_v38 }
 0x436   :  { %11721 = vst [vmem:[#allocation46_spill] sm:$0xff] %v11226_v6  ;;  %v4840_v31 = vadd.f32 %v4839_v5, %v4767_v4  ;;  %v4769_v13 = vadd.f32 %v4768_v53, %v11079_v1  ;;  %v11232_v45 = vmax.f32 %v11723_v55, %v4838_v46 }
 0x437   :  { %v4770_v11 = vpop.f32.mrf.mxu1 }
 0x438   :  { %11724 = vst [vmem:[#allocation48_spill] sm:$0xff] %v11232_v45  ;;  %v4842_v58 = vadd.f32 %v4841_v63, %v4769_v13  ;;  %v4771_v28 = vadd.f32 %v4770_v11, %v11726_v44  ;;  %v11239_v52 = vmax.f32 %v11729_v25, %v4840_v31 }
 0x43a   :  { %11730 = vst [vmem:[#allocation49_spill] sm:$0xff] %v11239_v52  ;;  %v4844_v1 = vadd.f32 %v4843_v0, %v4771_v28  ;;  %v11245_v62 = vmax.f32 %v11734_v8, %v4842_v58 }
 0x43c   :  { %11735 = vst [vmem:[#allocation39_spill] sm:$0xff] %v11245_v62  ;;  %v11247_v50 = vmax.f32 %v4480_v47, %v4844_v1 }
 0x43e   :  { %11736 = vst [vmem:[#allocation40_spill] sm:$0xff] %v11247_v50 }
 0x44a   :  { %v4969_v49 = vpop.f32.mrf.mxu0 }
 0x44c   :  { %v4971_v29 = vpop.f32.mrf.mxu0 }
 0x44e   :  { %v4973_v42 = vpop.f32.mrf.mxu0 }
 0x450   :  { %v4975_v61 = vpop.f32.mrf.mxu0 }
 0x452   :  { %v4979_v43 = vpop.f32.mrf.mxu0 }
 0x454   :  { %v4981_v40 = vpop.f32.mrf.mxu0 }
 0x456   :  { %v4983_v35 = vpop.f32.mrf.mxu0 }
 0x458   :  { %v11271_v17 = vpop.f32.mrf.mxu0 }
 0x45a   :  { %v4896_v15 = vpop.f32.mrf.mxu1  ;;  %v11275_v46 = vpop.f32.mrf.mxu0 }
 0x45b   :  { %v4970_v34 = vadd.f32 %v4969_v49, %v4896_v15 }
 0x45c   :  { %v4898_v36 = vpop.f32.mrf.mxu1  ;;  %v11277_v63 = vpop.f32.mrf.mxu0 }
 0x45e   :  { %v4900_v14 = vpop.f32.mrf.mxu1  ;;  %v11279_v31 = vpop.f32.mrf.mxu0 }
 0x460   :  { %v4902_v9 = vpop.f32.mrf.mxu1  ;;  %v11281_v20 = vpop.f32.mrf.mxu0 }
 0x462   :  { %v11249_v24 = vpop.f32.mrf.mxu1  ;;  %v11283_v11 = vpop.f32.mrf.mxu0 }
 0x463   :  { %v4980_v15 = vadd.f32 %v4979_v43, %v11249_v24 }
 0x464   :  { %v11251_v33 = vpop.f32.mrf.mxu1  ;;  %v11285_v16 = vpop.f32.mrf.mxu0 }
 0x465   :  { %11740 = vst [vmem:[#allocation22_spill] sm:$0xff] %v11285_v16 }
 0x466   :  { %v11253_v12 = vpop.f32.mrf.mxu1  ;;  %v11287_v44 = vpop.f32.mrf.mxu0 }
 0x467   :  { %11741 = vst [vmem:[#allocation25_spill] sm:$0xff] %v11287_v44  ;;  %v4984_v43 = vadd.f32 %v4983_v35, %v11253_v12 }
 0x468   :  { %v11255_v57 = vpop.f32.mrf.mxu1  ;;  %v11289_v19 = vpop.f32.mrf.mxu0 }
 0x469   :  { %11742 = vst [vmem:[#allocation24_spill] sm:$0xff] %v11289_v19 }
 0x46a   :  { %v11257_v59 = vpop.f32.mrf.mxu1 }
 0x46c   :  { %v11259_v41 = vpop.f32.mrf.mxu1 }
 0x46e   :  { %v11261_v56 = vpop.f32.mrf.mxu1 }
 0x470   :  { %v11263_v5 = vpop.f32.mrf.mxu1 }
 0x472   :  { %v11265_v27 = vpop.f32.mrf.mxu1 }
 0x474   :  { %v11267_v7 = vpop.f32.mrf.mxu1 }
 0x475   :  { %11737 = vst [vmem:[#allocation5_spill] sm:$0xff] %v11267_v7  ;;  %v5243_v7 = vld [vmem:[%s11440_s4] sm:$0x3] }
 0x476   :  { %v11269_v48 = vpop.f32.mrf.mxu1 }
 0x477   :  { %11738 = vst [vmem:[#allocation21_spill] sm:$0xff] %v11269_v48  ;;  %v4974_v48 = vadd.f32 %v4973_v42, %v4900_v14 }
 0x478   :  { %v11273_v30 = vpop.f32.mrf.mxu1 }
 0x479   :  { %11739 = vst [vmem:[#allocation23_spill] sm:$0xff] %v11273_v30  ;;  %v4972_v30 = vadd.f32 %v4971_v29, %v4898_v36 }
 0x48b   :  { %v5115_v25 = vpop.f32.mrf.mxu0 }
 0x48d   :  { %v5117_v38 = vpop.f32.mrf.mxu0 }
 0x48f   :  { %v5119_v1 = vpop.f32.mrf.mxu0 }
 0x491   :  { %v5121_v3 = vpop.f32.mrf.mxu0 }
 0x493   :  { %v5125_v50 = vpop.f32.mrf.mxu0 }
 0x495   :  { %v5127_v52 = vpop.f32.mrf.mxu0 }
 0x497   :  { %v5129_v6 = vpop.f32.mrf.mxu0 }
 0x499   :  { %v11305_v2 = vpop.f32.mrf.mxu0 }
 0x49b   :  { %v5042_v4 = vpop.f32.mrf.mxu1  ;;  %v11312_v18 = vpop.f32.mrf.mxu0 }
 0x49c   :  { %v5043_v44 = vadd.f32 %v5042_v4, %v4970_v34 }
 0x49d   :  { %v5044_v53 = vpop.f32.mrf.mxu1 }
 0x49e   :  { %v5045_v39 = vadd.f32 %v5044_v53, %v4972_v30  ;;  %v4982_v30 = vadd.f32 %v4981_v40, %v11251_v33 }
 0x49f   :  { %v5046_v13 = vpop.f32.mrf.mxu1 }
 0x4a0   :  { %v5118_v42 = vadd.f32 %v5117_v38, %v5045_v39 }
 0x4a1   :  { %v5048_v55 = vpop.f32.mrf.mxu1 }
 0x4a3   :  { %v5052_v54 = vpop.f32.mrf.mxu1 }
 0x4a4   :  { %v5053_v4 = vadd.f32 %v5052_v54, %v4980_v15 }
 0x4a5   :  { %v5054_v58 = vpop.f32.mrf.mxu1 }
 0x4a6   :  { %v5126_v38 = vadd.f32 %v5125_v50, %v5053_v4 }
 0x4a7   :  { %v5056_v28 = vpop.f32.mrf.mxu1 }
 0x4a9   :  { %v5058_v32 = vpop.f32.mrf.mxu1 }
 0x4ab   :  { %v11291_v0 = vpop.f32.mrf.mxu1 }
 0x4ad   :  { %v11293_v47 = vpop.f32.mrf.mxu1 }
 0x4af   :  { %v11295_v37 = vpop.f32.mrf.mxu1 }
 0x4b1   :  { %v11297_v8 = vpop.f32.mrf.mxu1 }
 0x4b2   :  { %11743 = vst [vmem:[#allocation27_spill] sm:$0xff] %v11297_v8  ;;  %v5116_v8 = vadd.f32 %v5115_v25, %v5043_v44  ;;  %v4986_v44 = vadd.f32 %v11271_v17, %v11255_v57 }
 0x4b3   :  { %v11299_v62 = vpop.f32.mrf.mxu1 }
 0x4b4   :  { %11744 = vst [vmem:[#allocation26_spill] sm:$0xff] %v11299_v62  ;;  %v4976_v62 = vadd.f32 %v4975_v61, %v4902_v9 }
 0x4b5   :  { %v11301_v45 = vpop.f32.mrf.mxu1 }
 0x4b6   :  { %11745 = vst [vmem:[#allocation30_spill] sm:$0xff] %v11301_v45  ;;  %v5047_v45 = vadd.f32 %v5046_v13, %v4974_v48  ;;  %v5049_v36 = vadd.f32 %v5048_v55, %v4976_v62  ;;  %v5055_v13 = vadd.f32 %v5054_v58, %v4982_v30  ;;  %v4990_v58 = vadd.f32 %v11275_v46, %v11257_v59 }
 0x4b7   :  { %v11303_v19 = vpop.f32.mrf.mxu1 }
 0x4b8   :  { %11746 = vst [vmem:[#allocation11_spill] sm:$0xff] %v11303_v19  ;;  %v11748_v19 = vld [vmem:[#allocation2_spill] sm:$0xff]  ;;  %v5120_v62 = vadd.f32 %v5119_v1, %v5047_v45  ;;  %v5122_v54 = vadd.f32 %v5121_v3, %v5049_v36  ;;  %v5059_v1 = vadd.f32 %v5058_v32, %v4986_v44  ;;  %v5063_v3 = vadd.f32 %v11291_v0, %v4990_v58 }
 0x4b9   :  { %v11307_v16 = vpop.f32.mrf.mxu1  ;;  %v11749_v34 = vsub.s32 0, %v11748_v19  ;;  %v11750_v48 = vsub.s32 1, %v11748_v19 }
 0x4ba   :  { %11747 = vst [vmem:[#allocation8_spill] sm:$0xff] %v11307_v16  ;;  %v11320_v16 = vpop.f32.mrf.mxu0  ;;  %v5132_v0 = vadd.f32 %v11305_v2, %v5059_v1 }
 0x4bb   :  { %v11317_v14 = vrot.slane %v5243_v7, %v11749_v34  ;;  %v11325_v24 = vrot.slane %v5243_v7, %v11750_v48 }
 0x4bc   :  { %v5139_v19 = vpop.f32.mrf.mxu0 }
 0x4be   :  { %v5141_v46 = vpop.f32.mrf.mxu0 }
 0x4c0   :  { %v5145_v30 = vpop.f32.mrf.mxu0 }
 0x4dc   :  { %v5188_v49 = vpop.f32.mrf.mxu1 }
 0x4dd   :  { %v5189_v29 = vadd.f32 %v5188_v49, %v5116_v8  ;;  %v5128_v8 = vadd.f32 %v5127_v52, %v5055_v13 }
 0x4de   :  { %v5190_v53 = vpop.f32.mrf.mxu1 }
 0x4df   :  { %v5227_v9 = vmax.f32 %v11148_v21, %v5189_v29  ;;  %v5191_v61 = vadd.f32 %v5190_v53, %v5118_v42  ;;  %v5057_v21 = vadd.f32 %v5056_v28, %v4984_v43 }
 0x4e0   :  { %v5192_v55 = vpop.f32.mrf.mxu1 }
 0x4e1   :  { %v5255_v39 = vadd.f32 %v11317_v14, %v5227_v9  ;;  %v5228_v33 = vmax.f32 %v11155_v23, %v5191_v61  ;;  %v5193_v40 = vadd.f32 %v5192_v55, %v5120_v62  ;;  %v5130_v59 = vadd.f32 %v5129_v6, %v5057_v21  ;;  %v11752_v62 = vld [vmem:[#allocation43_spill] sm:$0xff]  ;;  %v11754_v55 = vld [vmem:[#allocation22_spill] sm:$0xff]  ;;  %v11756_v21 = vld [vmem:[#allocation45_spill] sm:$0xff] }
 0x4e2   :  { %v5194_v25 = vpop.f32.mrf.mxu1  ;;  %v5000_v9 = vadd.f32 %v11283_v11, %v11265_v27 }
 0x4e3   :  { %v5271_v7 = vmax.f32 %v5255_v39, 0.0  ;;  %v5256_v45 = vadd.f32 %v11325_v24, %v5228_v33  ;;  %v5229_v12 = vmax.f32 %v11163_v60, %v5193_v40  ;;  %v5195_v35 = vadd.f32 %v5194_v25, %v5122_v54  ;;  %v11755_v33 = vld [vmem:[#allocation26_spill] sm:$0xff]  ;;  %v5147_v54 = vpop.f32.mrf.mxu0 }
 0x4e4   :  { %v5198_v23 = vpop.f32.mrf.mxu1  ;;  %v4992_v60 = vadd.f32 %v11277_v63, %v11259_v41  ;;  %v5073_v27 = vadd.f32 %v11755_v33, %v5000_v9  ;;  %v11767_v9 = vld [vmem:[#allocation48_spill] sm:$0xff]  ;;  %v11769_v33 = vld [vmem:[#allocation39_spill] sm:$0xff] }
 0x4e5   :  { %5287 = vst [vmem:[%s11441_s5] sm:$0xff] %v5271_v7  ;;  %v5272_v57 = vmax.f32 %v5256_v45, 0.0  ;;  %v5257_v50 = vadd.f32 %v11317_v14, %v5229_v12  ;;  %v5230_v17 = vmax.f32 %v11168_v26, %v5195_v35  ;;  %v5199_v28 = vadd.f32 %v5198_v23, %v5126_v38  ;;  %v11757_v7 = vld [vmem:[#allocation21_spill] sm:$0xff]  ;;  %v11759_v35 = vld [vmem:[#allocation30_spill] sm:$0xff] }
 0x4e6   :  { %v5200_v15 = vpop.f32.mrf.mxu1  ;;  %v4994_v26 = vadd.f32 %v11279_v31, %v11261_v56  ;;  %v5065_v41 = vadd.f32 %v11293_v47, %v4992_v60  ;;  %v5136_v47 = vadd.f32 %v11312_v18, %v5063_v3  ;;  %v11758_v45 = vld [vmem:[#allocation25_spill] sm:$0xff]  ;;  %v11762_v60 = vld [vmem:[#allocation24_spill] sm:$0xff] }
 0x4e7   :  { %5288 = vst [vmem:[%s11441_s5 + $0x8] sm:$0xff] %v5272_v57  ;;  %v5273_v52 = vmax.f32 %v5257_v50, 0.0  ;;  %v5258_v32 = vadd.f32 %v11325_v24, %v5230_v17  ;;  %v5231_v49 = vmax.f32 %v11177_v10, %v5199_v28  ;;  %v5201_v36 = vadd.f32 %v5200_v15, %v5128_v8  ;;  %v11760_v57 = vld [vmem:[#allocation31_spill] sm:$0xff] }
 0x4e8   :  { %v5202_v63 = vpop.f32.mrf.mxu1  ;;  %v4996_v10 = vadd.f32 %v11281_v20, %v11263_v5  ;;  %v5067_v56 = vadd.f32 %v11295_v37, %v4994_v26  ;;  %v11751_v5 = vld [vmem:[#allocation27_spill] sm:$0xff]  ;;  %v5138_v61 = vadd.f32 %v11320_v16, %v5065_v41  ;;  %v5004_v12 = vadd.f32 %v11758_v45, %v11757_v7  ;;  %v11764_v26 = vld [vmem:[#allocation36_spill] sm:$0xff] }
 0x4e9   :  { %5289 = vst [vmem:[%s11441_s5 + $0x10] sm:$0xff] %v5273_v52  ;;  %v5274_v6 = vmax.f32 %v5258_v32, 0.0  ;;  %v5259_v29 = vadd.f32 %v11317_v14, %v5231_v49  ;;  %v5232_v34 = vmax.f32 %v11184_v51, %v5201_v36  ;;  %v5203_v42 = vadd.f32 %v5202_v63, %v5130_v59  ;;  %v11761_v28 = vld [vmem:[#allocation23_spill] sm:$0xff]  ;;  %v5149_v49 = vpop.f32.mrf.mxu0 }
 0x4ea   :  { %v5204_v31 = vpop.f32.mrf.mxu1  ;;  %v5069_v20 = vadd.f32 %v11751_v5, %v4996_v10  ;;  %v5140_v40 = vadd.f32 %v5139_v19, %v5067_v56  ;;  %v5006_v3 = vadd.f32 %v11762_v60, %v11761_v28  ;;  %v11763_v15 = vld [vmem:[#allocation11_spill] sm:$0xff]  ;;  %v5146_v32 = vadd.f32 %v5145_v30, %v5073_v27  ;;  %v11766_v56 = vld [vmem:[#allocation46_spill] sm:$0xff] }
 0x4eb   :  { %5290 = vst [vmem:[%s11441_s5 + $0x18] sm:$0xff] %v5274_v6  ;;  %v5275_v2 = vmax.f32 %v5259_v29, 0.0  ;;  %v5260_v4 = vadd.f32 %v11325_v24, %v5232_v34  ;;  %v5233_v53 = vmax.f32 %v11192_v22, %v5203_v42  ;;  %v5205_v51 = vadd.f32 %v5204_v31, %v5132_v0  ;;  %v11753_v22 = vld [vmem:[#allocation5_spill] sm:$0xff]  ;;  %v11765_v0 = vld [vmem:[#allocation8_spill] sm:$0xff] }
 0x4ec   :  { %v5208_v37 = vpop.f32.mrf.mxu1  ;;  %v5002_v39 = vadd.f32 %v11754_v55, %v11753_v22  ;;  %v5142_v23 = vadd.f32 %v5141_v46, %v5069_v20  ;;  %v5077_v59 = vadd.f32 %v11763_v15, %v5004_v12  ;;  %v5079_v6 = vadd.f32 %v11765_v0, %v5006_v3 }
 0x4ed   :  { %5291 = vst [vmem:[%s11441_s5 + $0x20] sm:$0xff] %v5275_v2  ;;  %v5276_v18 = vmax.f32 %v5260_v4, 0.0  ;;  %v5261_v48 = vadd.f32 %v11317_v14, %v5233_v53  ;;  %v5234_v43 = vmax.f32 %v11752_v62, %v5205_v51  ;;  %v5209_v13 = vadd.f32 %v5208_v37, %v5136_v47  ;;  %v5151_v4 = vpop.f32.mrf.mxu0  ;;  %v11768_v62 = vld [vmem:[#allocation49_spill] sm:$0xff] }
 0x4ee   :  { %v5210_v11 = vpop.f32.mrf.mxu1  ;;  %v5075_v58 = vadd.f32 %v11759_v35, %v5002_v39  ;;  %v5150_v2 = vadd.f32 %v5149_v49, %v5077_v59 }
 0x4ef   :  { %5292 = vst [vmem:[%s11441_s5 + $0x28] sm:$0xff] %v5276_v18  ;;  %v5277_v16 = vmax.f32 %v5261_v48, 0.0  ;;  %v5262_v44 = vadd.f32 %v11325_v24, %v5234_v43  ;;  %v5235_v25 = vmax.f32 %v11756_v21, %v5209_v13  ;;  %v5211_v38 = vadd.f32 %v5210_v11, %v5138_v61 }
 0x4f0   :  { %v5212_v1 = vpop.f32.mrf.mxu1  ;;  %v5148_v34 = vadd.f32 %v5147_v54, %v5075_v58  ;;  %v5152_v61 = vadd.f32 %v5151_v4, %v5079_v6 }
 0x4f1   :  { %5293 = vst [vmem:[%s11441_s5 + $0x30] sm:$0xff] %v5277_v16  ;;  %v5278_v19 = vmax.f32 %v5262_v44, 0.0  ;;  %v5263_v8 = vadd.f32 %v11317_v14, %v5235_v25  ;;  %v5236_v50 = vmax.f32 %v11760_v57, %v5211_v38  ;;  %v5213_v17 = vadd.f32 %v5212_v1, %v5140_v40  ;;  %v11770_v16 = vld [vmem:[#allocation40_spill] sm:$0xff] }
 0x4f2   :  { %v5214_v52 = vpop.f32.mrf.mxu1 }
 0x4f3   :  { %5294 = vst [vmem:[%s11441_s5 + $0x38] sm:$0xff] %v5278_v19  ;;  %v5279_v46 = vmax.f32 %v5263_v8, 0.0  ;;  %v5264_v36 = vadd.f32 %v11325_v24, %v5236_v50  ;;  %v5237_v41 = vmax.f32 %v11764_v26, %v5213_v17  ;;  %v5215_v63 = vadd.f32 %v5214_v52, %v5142_v23 }
 0x4f4   :  { %v5218_v29 = vpop.f32.mrf.mxu1 }
 0x4f5   :  { %5295 = vst [vmem:[%s11441_s5 + $0x40] sm:$0xff] %v5279_v46  ;;  %v5280_v42 = vmax.f32 %v5264_v36, 0.0  ;;  %v5265_v10 = vadd.f32 %v11317_v14, %v5237_v41  ;;  %v5238_v31 = vmax.f32 %v11766_v56, %v5215_v63  ;;  %v5219_v47 = vadd.f32 %v5218_v29, %v5146_v32 }
 0x4f6   :  { %v5220_v30 = vpop.f32.mrf.mxu1 }
 0x4f7   :  { %5296 = vst [vmem:[%s11441_s5 + $0x48] sm:$0xff] %v5280_v42  ;;  %v5281_v53 = vmax.f32 %v5265_v10, 0.0  ;;  %v5266_v51 = vadd.f32 %v11325_v24, %v5238_v31  ;;  %v5239_v5 = vmax.f32 %v11767_v9, %v5219_v47  ;;  %v5221_v20 = vadd.f32 %v5220_v30, %v5148_v34 }
 0x4f8   :  { %v5222_v37 = vpop.f32.mrf.mxu1 }
 0x4f9   :  { %5297 = vst [vmem:[%s11441_s5 + $0x50] sm:$0xff] %v5281_v53  ;;  %v5282_v18 = vmax.f32 %v5266_v51, 0.0  ;;  %v5267_v48 = vadd.f32 %v11317_v14, %v5239_v5  ;;  %v5240_v43 = vmax.f32 %v11768_v62, %v5221_v20  ;;  %v5223_v13 = vadd.f32 %v5222_v37, %v5150_v2 }
 0x4fa   :  { %v5224_v22 = vpop.f32.mrf.mxu1 }
 0x4fb   :  { %5298 = vst [vmem:[%s11441_s5 + $0x58] sm:$0xff] %v5282_v18  ;;  %v5283_v55 = vmax.f32 %v5267_v48, 0.0  ;;  %v5268_v39 = vadd.f32 %v11325_v24, %v5240_v43  ;;  %v5241_v27 = vmax.f32 %v11769_v33, %v5223_v13  ;;  %v5225_v11 = vadd.f32 %v5224_v22, %v5152_v61 }
 0x4fd   :  { %5299 = vst [vmem:[%s11441_s5 + $0x60] sm:$0xff] %v5283_v55  ;;  %v5284_v40 = vmax.f32 %v5268_v39, 0.0  ;;  %v5269_v54 = vadd.f32 %v11317_v14, %v5241_v27  ;;  %v5242_v44 = vmax.f32 %v11770_v16, %v5225_v11 }
 0x4ff   :  { %5300 = vst [vmem:[%s11441_s5 + $0x68] sm:$0xff] %v5284_v40  ;;  %v5285_v21 = vmax.f32 %v5269_v54, 0.0  ;;  %v5270_v25 = vadd.f32 %v11325_v24, %v5242_v44 }
 0x501   :  { %5301 = vst [vmem:[%s11441_s5 + $0x70] sm:$0xff] %v5285_v21  ;;  %v5286_v38 = vmax.f32 %v5270_v25, 0.0 }
 0x503   :  { %5302 = vst [vmem:[%s11441_s5 + $0x78] sm:$0xff] %v5286_v38 }

</bundles_post_ra>
